<compile_context>
chip_gen: v7x
topology: tpu7x:2x2x1
jax: 0.10.0
libtpu: 0.0.40
codegen_flags: <defaults>
</compile_context>

<pallas_src>
import functools

import jax
import jax.numpy as jnp
from jax.experimental import pallas as pl
from jax.experimental.pallas import tpu as pltpu


def _round_up(x, m):
    return (x + m - 1) // m * m


# ---------------------------------------------------------------------------
# Pallas kernel: embedding gather (via in-vreg multi-hot @ gather-matrix),
# FM first + second order, DNN tower, final sum — all fused.
# ---------------------------------------------------------------------------
def deepfm_kernel(xoff_ref, wcomb_ref, w1_ref, b1_ref, w2_ref, b2_ref, w3_ref,
                  blin_ref, out_ref, *, num_fields, embed_dim):
    F = num_fields
    D = embed_dim
    idx = xoff_ref[...]                                   # (TB, F) int32 (offset ids)
    TB = idx.shape[0]
    V = wcomb_ref.shape[0]                                # padded vocab (mult of 128)

    # Multi-hot built from indices (no HBM one-hot, no scatter). Field index
    # ranges are disjoint, so the sum of one-hots is exactly the multi-hot.
    lane = jax.lax.broadcasted_iota(jnp.int32, (TB, V), 1)
    mh = jnp.zeros((TB, V), jnp.float32)
    for f in range(F):                                    # static, F is tiny
        mh = mh + (lane == idx[:, f:f + 1]).astype(jnp.float32)

    # One lane-dense MXU pass gathers all field embeddings (cols [0, F*D)) and
    # the FM first-order weights (col F*D); remaining cols are zero padding.
    r = jnp.dot(mh, wcomb_ref[...], preferred_element_type=jnp.float32)  # (TB, HP)

    emb = r[:, :F * D]                                    # (TB, F*D) flat embeddings
    lin = r[:, F * D:F * D + 1] + blin_ref[0, 0]          # (TB, 1) FM first order

    # FM second order with static lane slices (no reshape / relayout).
    sum_f = jnp.zeros((TB, D), jnp.float32)
    sum_sq = jnp.zeros((TB, D), jnp.float32)
    for f in range(F):
        e = emb[:, f * D:(f + 1) * D]
        sum_f = sum_f + e
        sum_sq = sum_sq + e * e
    fm2 = 0.5 * jnp.sum(sum_f * sum_f - sum_sq, axis=1, keepdims=True)   # (TB, 1)

    # DNN tower.  w1 rows >= F*D are zero, so feeding the full lane-dense `r`
    # (which carries lin + zeros in cols >= F*D) is numerically exact.
    h = jnp.maximum(
        jnp.dot(r, w1_ref[...], preferred_element_type=jnp.float32) + b1_ref[...], 0.0)
    h = jnp.maximum(
        jnp.dot(h, w2_ref[...], preferred_element_type=jnp.float32) + b2_ref[...], 0.0)
    y_dnn = jnp.dot(h, w3_ref[...], preferred_element_type=jnp.float32)  # (TB, 1)

    out_ref[...] = lin + fm2 + y_dnn


# ---------------------------------------------------------------------------
# One-time parameter packing: block-diagonal gather matrix + lane-padded DNN.
# ---------------------------------------------------------------------------
def pack_params(params, field_dims, embed_dim):
    F = len(field_dims)
    D = embed_dim
    input_dim = int(sum(field_dims))
    H1 = params["w1"].shape[1]
    H2 = params["w2"].shape[1]

    VP = _round_up(input_dim, 128)                        # padded vocab
    HP = _round_up(max(F * D + 1, H1, H2), 128)           # padded hidden / lane width

    # combined gather matrix: per-field embedding tables block-diagonal in
    # cols [f*D, (f+1)*D), FM linear weight in col F*D, zeros elsewhere.
    wcomb = jnp.zeros((VP, HP), jnp.float32)
    off = 0
    for f in range(F):
        fd = field_dims[f]
        wcomb = wcomb.at[off:off + fd, f * D:(f + 1) * D].set(
            params["emb"][f].astype(jnp.float32))
        off += fd
    wcomb = wcomb.at[:input_dim, F * D].set(params["wlin"][:, 0])

    w1p = jnp.zeros((HP, HP), jnp.float32).at[:F * D, :H1].set(params["w1"])
    b1p = jnp.zeros((1, HP), jnp.float32).at[:, :H1].set(params["b1"])
    w2p = jnp.zeros((HP, HP), jnp.float32).at[:H1, :H2].set(params["w2"])
    b2p = jnp.zeros((1, HP), jnp.float32).at[:, :H2].set(params["b2"])
    w3p = jnp.zeros((HP, 1), jnp.float32).at[:H2, :].set(params["w3"])

    return {"wcomb": wcomb, "w1": w1p, "b1": b1p, "w2": w2p, "b2": b2p,
            "w3": w3p, "blin": params["blin"].astype(jnp.float32)}


# ---------------------------------------------------------------------------
# Wrapper: offsets + batch tiling + pallas_call.
# ---------------------------------------------------------------------------
def deepfm_forward(x, packed, *, field_dims, embed_dim, tile_b=512):
    B, F = x.shape
    D = embed_dim
    VP, HP = packed["wcomb"].shape

    # field offsets -> global ids (only per-row data the kernel reads from HBM)
    offs = [0]
    for fd in field_dims[:-1]:
        offs.append(offs[-1] + fd)
    x_off = x.astype(jnp.int32) + jnp.asarray(offs, jnp.int32)[None, :]

    TB = min(tile_b, _round_up(B, 8))
    Bp = _round_up(B, TB)
    if Bp != B:
        # padded rows use index 0 (valid); their outputs are sliced off below.
        x_off = jnp.pad(x_off, ((0, Bp - B), (0, 0)))
    grid = (Bp // TB,)

    kernel = functools.partial(deepfm_kernel, num_fields=F, embed_dim=D)

    out = pl.pallas_call(
        kernel,
        out_shape=jax.ShapeDtypeStruct((Bp, 1), jnp.float32),
        grid_spec=pltpu.PrefetchScalarGridSpec(
            num_scalar_prefetch=0,
            grid=grid,
            in_specs=[
                pl.BlockSpec((TB, F), lambda i: (i, 0)),           # indices (tiled)
                pl.BlockSpec((VP, HP), lambda i: (0, 0)),          # gather matrix (resident)
                pl.BlockSpec((HP, HP), lambda i: (0, 0)),          # w1
                pl.BlockSpec((1, HP), lambda i: (0, 0)),           # b1
                pl.BlockSpec((HP, HP), lambda i: (0, 0)),          # w2
                pl.BlockSpec((1, HP), lambda i: (0, 0)),           # b2
                pl.BlockSpec((HP, 1), lambda i: (0, 0)),           # w3
                pl.BlockSpec(memory_space=pltpu.MemorySpace.SMEM), # FM bias scalar
            ],
            out_specs=pl.BlockSpec((TB, 1), lambda i: (i, 0)),
        ),
        compiler_params=pltpu.CompilerParams(
            dimension_semantics=("parallel",)),
    )(x_off, packed["wcomb"], packed["w1"], packed["b1"],
      packed["w2"], packed["b2"], packed["w3"], packed["blin"])

    return out[:B, 0]   # (B,) — matches torch `y_fm + y_dnn.squeeze(1)`


# ---------------------------------------------------------------------------
# Pure-JAX reference (mirrors the nn.Module math) for a sanity check.
# ---------------------------------------------------------------------------
def deepfm_reference(x, params, field_dims):
    B, F = x.shape
    input_dim = int(sum(field_dims))
    dense_x = [jnp.take(params["emb"][f], x[:, f], axis=0) for f in range(F)]
    emb = jnp.stack(dense_x, axis=1).astype(jnp.float32)
    offs = [0]
    for fd in field_dims[:-1]:
        offs.append(offs[-1] + fd)
    x_off = x + jnp.asarray(offs, dtype=x.dtype)[None, :]
    sparse_x = jnp.zeros((B, input_dim), jnp.float32).at[
        jnp.arange(B)[:, None], x_off].set(1.0)

    lin = sparse_x @ params["wlin"] + params["blin"][0, 0]
    sum_f = emb.sum(axis=1)
    fm2 = 0.5 * jnp.sum(sum_f ** 2 - (emb ** 2).sum(axis=1), axis=1, keepdims=True)
    y_fm = lin + fm2

    h = emb.reshape(B, -1)
    h = jnp.maximum(h @ params["w1"] + params["b1"], 0.0)
    h = jnp.maximum(h @ params["w2"] + params["b2"], 0.0)
    y_dnn = h @ params["w3"]
    return (y_fm + y_dnn)[:, 0]


# ---------------------------------------------------------------------------
# Deterministic parameter init (synthetic; shapes follow the nn.Module).
# ---------------------------------------------------------------------------
def init_params(key, field_dims, embed_dim, mlp_dims):
    F = len(field_dims)
    input_dim = int(sum(field_dims))
    dnn_in = F * embed_dim
    H1, H2 = mlp_dims

    keys = jax.random.split(key, F + 5)
    emb_tables = [
        jax.random.normal(keys[f], (field_dims[f], embed_dim), jnp.float32) * 0.1
        for f in range(F)
    ]
    params = {
        "emb": emb_tables,
        # FM linear: nn.Linear(input_dim, 1) — uniform weight, zero bias
        "wlin": jax.random.uniform(keys[F], (input_dim, 1), jnp.float32),
        "blin": jnp.zeros((1, 1), jnp.float32),
        # DNN: Linear(dnn_in,H1)+ReLU, Linear(H1,H2)+ReLU, Linear(H2,1,no bias)
        "w1": jax.random.normal(keys[F + 1], (dnn_in, H1), jnp.float32) * (1.0 / dnn_in) ** 0.5,
        "b1": jnp.zeros((1, H1), jnp.float32),
        "w2": jax.random.normal(keys[F + 2], (H1, H2), jnp.float32) * (1.0 / H1) ** 0.5,
        "b2": jnp.zeros((1, H2), jnp.float32),
        "w3": jax.random.normal(keys[F + 3], (H2, 1), jnp.float32) * (1.0 / H2) ** 0.5,
    }
    return params


if __name__ == "__main__":
    # 4 categorical fields, embed_dim=8, mlp_dims=[32,16], dropout=0, no BN,
    # merge_summary=False.  Batch chosen non-multiple of the tile to exercise
    # the padding path and a grid with several tiles (pipelining / megacore).
    field_dims = [8, 12, 6, 10]
    embed_dim = 8
    mlp_dims = (32, 16)
    B = 1000
    TILE_B = 256

    key = jax.random.PRNGKey(0)
    pkey, xkey = jax.random.split(key)
    params = init_params(pkey, field_dims, embed_dim, mlp_dims)
    packed = pack_params(params, field_dims, embed_dim)

    # x: (B, num_fields) int32, x[:, f] in [0, field_dims[f])
    cols = []
    xkeys = jax.random.split(xkey, len(field_dims))
    for f, fd in enumerate(field_dims):
        cols.append(jax.random.randint(xkeys[f], (B,), 0, fd, dtype=jnp.int32))
    x = jnp.stack(cols, axis=1)

    fwd = jax.jit(functools.partial(
        deepfm_forward, field_dims=tuple(field_dims), embed_dim=embed_dim,
        tile_b=TILE_B))
    y = fwd(x, packed)
    jax.block_until_ready(y)

    y_ref = deepfm_reference(x, params, field_dims)
    assert y.shape == (B,)
    max_err = float(jnp.max(jnp.abs(y - y_ref)))
    assert jnp.allclose(y, y_ref, atol=1e-3, rtol=1e-3), max_err

    print("KERNEL_OK")
</pallas_src>

<mosaic_0001>
module attributes {stable_mosaic.version = 11 : i64} {
  func.func @deepfm_kernel(%arg0: i32, %arg1: memref<256x4xi32, #tpu.memory_space<vmem>>, %arg2: memref<128x128xf32, #tpu.memory_space<vmem>>, %arg3: memref<128x128xf32, #tpu.memory_space<vmem>>, %arg4: memref<1x128xf32, #tpu.memory_space<vmem>>, %arg5: memref<128x128xf32, #tpu.memory_space<vmem>>, %arg6: memref<1x128xf32, #tpu.memory_space<vmem>>, %arg7: memref<128x1xf32, #tpu.memory_space<vmem>>, %arg8: memref<1x1xf32, #tpu.memory_space<smem>>, %arg9: memref<256x1xf32, #tpu.memory_space<vmem>>) attributes {dimension_semantics = [#tpu.dimension_semantics<parallel>], iteration_bounds = array<i64: 4>, scalar_prefetch = 0 : i64, scratch_operands = 0 : i64, tpu.core_type = #tpu.core_type<tc>, window_params = [{transform_indices = @transform_0, window_bounds = array<i64: 256, 4>}, {pipeline_mode = #tpu.pipeline_mode<synchronous>, transform_indices = @transform_1, window_bounds = array<i64: 128, 128>}, {pipeline_mode = #tpu.pipeline_mode<synchronous>, transform_indices = @transform_2, window_bounds = array<i64: 128, 128>}, {pipeline_mode = #tpu.pipeline_mode<synchronous>, transform_indices = @transform_3, window_bounds = array<i64: 1, 128>}, {pipeline_mode = #tpu.pipeline_mode<synchronous>, transform_indices = @transform_4, window_bounds = array<i64: 128, 128>}, {pipeline_mode = #tpu.pipeline_mode<synchronous>, transform_indices = @transform_5, window_bounds = array<i64: 1, 128>}, {pipeline_mode = #tpu.pipeline_mode<synchronous>, transform_indices = @transform_6, window_bounds = array<i64: 128, 1>}, {transform_indices = @transform_7, window_bounds = array<i64: 1, 1>}, {transform_indices = @transform_8, window_bounds = array<i64: 256, 1>}]} {
    %c0 = arith.constant 0 : index
    %c0_0 = arith.constant 0 : index
    %0 = vector.load %arg1[%c0, %c0_0] : memref<256x4xi32, #tpu.memory_space<vmem>>, vector<256x4xi32>
    %1 = tpu.iota {dimensions = array<i32: 1>} : vector<256x128xi32>
    %cst = arith.constant 0.000000e+00 : f32
    %2 = vector.broadcast %cst : f32 to vector<256x128xf32>
    %3 = vector.extract_strided_slice %0 {offsets = [0, 0], sizes = [256, 1], strides = [1, 1]} : vector<256x4xi32> to vector<256x1xi32>
    %4 = vector.broadcast %3 : vector<256x1xi32> to vector<256x128xi32>
    %5 = arith.cmpi eq, %1, %4 : vector<256x128xi32>
    %6 = arith.extui %5 : vector<256x128xi1> to vector<256x128xi32>
    %7 = arith.sitofp %6 : vector<256x128xi32> to vector<256x128xf32>
    %8 = arith.addf %2, %7 : vector<256x128xf32>
    %9 = vector.extract_strided_slice %0 {offsets = [0, 1], sizes = [256, 1], strides = [1, 1]} : vector<256x4xi32> to vector<256x1xi32>
    %10 = vector.broadcast %9 : vector<256x1xi32> to vector<256x128xi32>
    %11 = arith.cmpi eq, %1, %10 : vector<256x128xi32>
    %12 = arith.extui %11 : vector<256x128xi1> to vector<256x128xi32>
    %13 = arith.sitofp %12 : vector<256x128xi32> to vector<256x128xf32>
    %14 = arith.addf %8, %13 : vector<256x128xf32>
    %15 = vector.extract_strided_slice %0 {offsets = [0, 2], sizes = [256, 1], strides = [1, 1]} : vector<256x4xi32> to vector<256x1xi32>
    %16 = vector.broadcast %15 : vector<256x1xi32> to vector<256x128xi32>
    %17 = arith.cmpi eq, %1, %16 : vector<256x128xi32>
    %18 = arith.extui %17 : vector<256x128xi1> to vector<256x128xi32>
    %19 = arith.sitofp %18 : vector<256x128xi32> to vector<256x128xf32>
    %20 = arith.addf %14, %19 : vector<256x128xf32>
    %21 = vector.extract_strided_slice %0 {offsets = [0, 3], sizes = [256, 1], strides = [1, 1]} : vector<256x4xi32> to vector<256x1xi32>
    %22 = vector.broadcast %21 : vector<256x1xi32> to vector<256x128xi32>
    %23 = arith.cmpi eq, %1, %22 : vector<256x128xi32>
    %24 = arith.extui %23 : vector<256x128xi1> to vector<256x128xi32>
    %25 = arith.sitofp %24 : vector<256x128xi32> to vector<256x128xf32>
    %26 = arith.addf %20, %25 : vector<256x128xf32>
    %c0_1 = arith.constant 0 : index
    %c0_2 = arith.constant 0 : index
    %27 = vector.load %arg2[%c0_1, %c0_2] : memref<128x128xf32, #tpu.memory_space<vmem>>, vector<128x128xf32>
    %cst_3 = arith.constant dense<0.000000e+00> : vector<256x128xf32>
    %28 = tpu.matmul %26, %27, %cst_3 {dimension_numbers = #tpu.dot_dimension_numbers<[1], [0], [0], [1], [0, 0, 1, 1], [], []>} : vector<256x128xf32>, vector<128x128xf32>, vector<256x128xf32> -> vector<256x128xf32>
    %29 = vector.extract_strided_slice %28 {offsets = [0, 0], sizes = [256, 32], strides = [1, 1]} : vector<256x128xf32> to vector<256x32xf32>
    %30 = vector.extract_strided_slice %28 {offsets = [0, 32], sizes = [256, 1], strides = [1, 1]} : vector<256x128xf32> to vector<256x1xf32>
    %c0_4 = arith.constant 0 : index
    %c0_5 = arith.constant 0 : index
    %31 = memref.load %arg8[%c0_4, %c0_5] : memref<1x1xf32, #tpu.memory_space<smem>>
    %32 = vector.broadcast %31 : f32 to vector<256x1xf32>
    %33 = arith.addf %30, %32 : vector<256x1xf32>
    %cst_6 = arith.constant 0.000000e+00 : f32
    %34 = vector.broadcast %cst_6 : f32 to vector<256x8xf32>
    %cst_7 = arith.constant 0.000000e+00 : f32
    %35 = vector.broadcast %cst_7 : f32 to vector<256x8xf32>
    %36 = vector.extract_strided_slice %29 {offsets = [0, 0], sizes = [256, 8], strides = [1, 1]} : vector<256x32xf32> to vector<256x8xf32>
    %37 = arith.addf %34, %36 : vector<256x8xf32>
    %38 = arith.mulf %36, %36 : vector<256x8xf32>
    %39 = arith.addf %35, %38 : vector<256x8xf32>
    %40 = vector.extract_strided_slice %29 {offsets = [0, 8], sizes = [256, 8], strides = [1, 1]} : vector<256x32xf32> to vector<256x8xf32>
    %41 = arith.addf %37, %40 : vector<256x8xf32>
    %42 = arith.mulf %40, %40 : vector<256x8xf32>
    %43 = arith.addf %39, %42 : vector<256x8xf32>
    %44 = vector.extract_strided_slice %29 {offsets = [0, 16], sizes = [256, 8], strides = [1, 1]} : vector<256x32xf32> to vector<256x8xf32>
    %45 = arith.addf %41, %44 : vector<256x8xf32>
    %46 = arith.mulf %44, %44 : vector<256x8xf32>
    %47 = arith.addf %43, %46 : vector<256x8xf32>
    %48 = vector.extract_strided_slice %29 {offsets = [0, 24], sizes = [256, 8], strides = [1, 1]} : vector<256x32xf32> to vector<256x8xf32>
    %49 = arith.addf %45, %48 : vector<256x8xf32>
    %50 = arith.mulf %48, %48 : vector<256x8xf32>
    %51 = arith.addf %47, %50 : vector<256x8xf32>
    %52 = arith.mulf %49, %49 : vector<256x8xf32>
    %53 = arith.subf %52, %51 : vector<256x8xf32>
    %cst_8 = arith.constant dense<0.000000e+00> : vector<256xf32>
    %54 = vector.multi_reduction <add>, %53, %cst_8 [1] : vector<256x8xf32> to vector<256xf32>
    %55 = vector.shape_cast %54 : vector<256xf32> to vector<256x1xf32>
    %cst_9 = arith.constant 5.000000e-01 : f32
    %56 = vector.broadcast %cst_9 : f32 to vector<256x1xf32>
    %57 = arith.mulf %56, %55 : vector<256x1xf32>
    %c0_10 = arith.constant 0 : index
    %c0_11 = arith.constant 0 : index
    %58 = vector.load %arg3[%c0_10, %c0_11] : memref<128x128xf32, #tpu.memory_space<vmem>>, vector<128x128xf32>
    %cst_12 = arith.constant dense<0.000000e+00> : vector<256x128xf32>
    %59 = tpu.matmul %28, %58, %cst_12 {dimension_numbers = #tpu.dot_dimension_numbers<[1], [0], [0], [1], [0, 0, 1, 1], [], []>} : vector<256x128xf32>, vector<128x128xf32>, vector<256x128xf32> -> vector<256x128xf32>
    %c0_13 = arith.constant 0 : index
    %c0_14 = arith.constant 0 : index
    %60 = vector.load %arg4[%c0_13, %c0_14] : memref<1x128xf32, #tpu.memory_space<vmem>>, vector<1x128xf32>
    %61 = vector.broadcast %60 : vector<1x128xf32> to vector<256x128xf32>
    %62 = arith.addf %59, %61 : vector<256x128xf32>
    %cst_15 = arith.constant 0.000000e+00 : f32
    %63 = vector.broadcast %cst_15 : f32 to vector<256x128xf32>
    %64 = arith.maximumf %62, %63 : vector<256x128xf32>
    %c0_16 = arith.constant 0 : index
    %c0_17 = arith.constant 0 : index
    %65 = vector.load %arg5[%c0_16, %c0_17] : memref<128x128xf32, #tpu.memory_space<vmem>>, vector<128x128xf32>
    %cst_18 = arith.constant dense<0.000000e+00> : vector<256x128xf32>
    %66 = tpu.matmul %64, %65, %cst_18 {dimension_numbers = #tpu.dot_dimension_numbers<[1], [0], [0], [1], [0, 0, 1, 1], [], []>} : vector<256x128xf32>, vector<128x128xf32>, vector<256x128xf32> -> vector<256x128xf32>
    %c0_19 = arith.constant 0 : index
    %c0_20 = arith.constant 0 : index
    %67 = vector.load %arg6[%c0_19, %c0_20] : memref<1x128xf32, #tpu.memory_space<vmem>>, vector<1x128xf32>
    %68 = vector.broadcast %67 : vector<1x128xf32> to vector<256x128xf32>
    %69 = arith.addf %66, %68 : vector<256x128xf32>
    %cst_21 = arith.constant 0.000000e+00 : f32
    %70 = vector.broadcast %cst_21 : f32 to vector<256x128xf32>
    %71 = arith.maximumf %69, %70 : vector<256x128xf32>
    %c0_22 = arith.constant 0 : index
    %c0_23 = arith.constant 0 : index
    %72 = vector.load %arg7[%c0_22, %c0_23] : memref<128x1xf32, #tpu.memory_space<vmem>>, vector<128x1xf32>
    %cst_24 = arith.constant dense<0.000000e+00> : vector<256x1xf32>
    %73 = tpu.matmul %71, %72, %cst_24 {dimension_numbers = #tpu.dot_dimension_numbers<[1], [0], [0], [1], [0, 0, 1, 1], [], []>} : vector<256x128xf32>, vector<128x1xf32>, vector<256x1xf32> -> vector<256x1xf32>
    %74 = arith.addf %33, %57 : vector<256x1xf32>
    %75 = arith.addf %74, %73 : vector<256x1xf32>
    %c0_25 = arith.constant 0 : index
    %c0_26 = arith.constant 0 : index
    %76 = vector.load %arg9[%c0_25, %c0_26] : memref<256x1xf32, #tpu.memory_space<vmem>>, vector<256x1xf32>
    tpu.vector_store %arg9[%c0_25, %c0_26], %75 {strides = array<i32>} : memref<256x1xf32, #tpu.memory_space<vmem>>, vector<256x1xf32>,
    return
  }
  func.func @transform_0(%arg0: i32) -> (i32, i32) {
    %c0_i32 = arith.constant 0 : i32
    %c0_i32_0 = arith.constant 0 : i32
    return %arg0, %c0_i32 : i32, i32
  }
  func.func @transform_1(%arg0: i32) -> (i32, i32) {
    %c0_i32 = arith.constant 0 : i32
    %c0_i32_0 = arith.constant 0 : i32
    %c0_i32_1 = arith.constant 0 : i32
    return %c0_i32, %c0_i32_0 : i32, i32
  }
  func.func @transform_2(%arg0: i32) -> (i32, i32) {
    %c0_i32 = arith.constant 0 : i32
    %c0_i32_0 = arith.constant 0 : i32
    %c0_i32_1 = arith.constant 0 : i32
    return %c0_i32, %c0_i32_0 : i32, i32
  }
  func.func @transform_3(%arg0: i32) -> (i32, i32) {
    %c0_i32 = arith.constant 0 : i32
    %c0_i32_0 = arith.constant 0 : i32
    %c0_i32_1 = arith.constant 0 : i32
    return %c0_i32, %c0_i32_0 : i32, i32
  }
  func.func @transform_4(%arg0: i32) -> (i32, i32) {
    %c0_i32 = arith.constant 0 : i32
    %c0_i32_0 = arith.constant 0 : i32
    %c0_i32_1 = arith.constant 0 : i32
    return %c0_i32, %c0_i32_0 : i32, i32
  }
  func.func @transform_5(%arg0: i32) -> (i32, i32) {
    %c0_i32 = arith.constant 0 : i32
    %c0_i32_0 = arith.constant 0 : i32
    %c0_i32_1 = arith.constant 0 : i32
    return %c0_i32, %c0_i32_0 : i32, i32
  }
  func.func @transform_6(%arg0: i32) -> (i32, i32) {
    %c0_i32 = arith.constant 0 : i32
    %c0_i32_0 = arith.constant 0 : i32
    %c0_i32_1 = arith.constant 0 : i32
    return %c0_i32, %c0_i32_0 : i32, i32
  }
  func.func @transform_7(%arg0: i32) -> (i32, i32) {
    %c0_i32 = arith.constant 0 : i32
    %c0_i32_0 = arith.constant 0 : i32
    %c0_i32_1 = arith.constant 0 : i32
    return %c0_i32, %c0_i32_0 : i32, i32
  }
  func.func @transform_8(%arg0: i32) -> (i32, i32) {
    %c0_i32 = arith.constant 0 : i32
    %c0_i32_0 = arith.constant 0 : i32
    return %arg0, %c0_i32 : i32, i32
  }
}

</mosaic_0001>

<bundles_post_ra>
// kernel: deepfm_forward.1
= control target key start
LH: loop header
LB: loop body
LE: loop exit
PB: predicated region body
PF: predicated region fallthrough
CT: control target
= control target key end

     0   :  { %s4796_s29 = smov 0   ;;  %s7501_s0 = inlined_call_operand.vmem [shape: s32[1024,4], index: 0, kind: input, shape index: {}]   ;;  %s7502_s1 = inlined_call_operand.vmem [shape: f32[128,128], index: 1, kind: input, shape index: {}]   ;;  %s7503_s2 = inlined_call_operand.vmem [shape: f32[128,128], index: 2, kind: input, shape index: {}]   ;;  %s7504_s3 = inlined_call_operand.vmem [shape: f32[1,128], index: 3, kind: input, shape index: {}]   ;;  %s7505_s4 = inlined_call_operand.vmem [shape: f32[128,128], index: 4, kind: input, shape index: {}]   ;;  %s7506_s5 = inlined_call_operand.vmem [shape: f32[1,128], index: 5, kind: input, shape index: {}]   ;;  %s7507_s6 = inlined_call_operand.vmem [shape: f32[128,1], index: 6, kind: input, shape index: {}]   ;;  %s7508_s7 = inlined_call_operand.<no memory space> [shape: f32[1,1], index: 7, kind: input, shape index: {}]   ;;  %s7509_s8 = inlined_call_operand.vmem [shape: f32[1024,1], index: 8, kind: output, shape index: {}]  }
   0x1   :  { %13 = sst [smem:[#allocation2]] %s7508_s7 }
   0x2 LB: > { %s3846_s30 = sadd.s32 4294967295, %s4736_s29   ;;  %p3850_p0 = scmp.ge.s32.totalorder %s4736_s29, 1  ;;  %s4736_s29 = sphi %s4796_s29, %s19_s29  }
   0x3   : > { %p264_p1 = scmp.lt.s32.totalorder %s4736_s29, 5 }
   0x5   : > { %p265_p2 = pnand %p3850_p0, %p264_p1 }
   0x7   : > { %268 = sbr.rel (%p265_p2) target bundleno = 1644 (0x66c), region = 52 }
   0xe   : > { %s3851_s9 = sshll.u32 %s3846_s30, 5  ;;  %v7517_v0 = vmov 0   ;;  %v7513_v3 = vmov 1   ;;  %v7515_v4 = vmov 2   ;;  %v7510_v5 = vmov 3   ;;  %v1240_v28 = vld [vmem:[%s7502_s1] sm:$0xff] }
   0xf   : > { %4647 = vset.pattern.permute.xlu1 %v7517_v0  ;;  %4645 = vset.pattern.permute.xlu0 %v7517_v0  ;;  %p299_p3 = scmp.lt.s32.totalorder %s3851_s9, 127  ;;  %v1241_v29 = vld [vmem:[%s7502_s1 + $0x8] sm:$0xff]  ;;  %v1242_v32 = vld [vmem:[%s7502_s1 + $0x10] sm:$0xff]  ;;  %v1243_v33 = vld [vmem:[%s7502_s1 + $0x18] sm:$0xff]  ;;  %v342_v52 = vlaneseq  ;;  %s4744_s17 = smov 112  }
  0x10   : > { %v4499_v31 = vpack.c.bf16 %v1241_v29, %v1240_v28  ;;  %v4503_v35 = vpack.c.bf16 %v1243_v33, %v1242_v32  ;;  %v1244_v36 = vld [vmem:[%s7502_s1 + $0x20] sm:$0xff]  ;;  %v1245_v37 = vld [vmem:[%s7502_s1 + $0x28] sm:$0xff]  ;;  %v1246_v40 = vld [vmem:[%s7502_s1 + $0x30] sm:$0xff]  ;;  %s4745_s30 = smov 104   ;;  %s4746_s15 = smov 32  }
  0x11   : > { %s8068_s9 = smov (!%p299_p3, %s3851_s9), 127  ;;  %v4507_v39 = vpack.c.bf16 %v1245_v37, %v1244_v36  ;;  %v1247_v41 = vld [vmem:[%s7502_s1 + $0x38] sm:$0xff]  ;;  %v1248_v44 = vld [vmem:[%s7502_s1 + $0x40] sm:$0xff]  ;;  %v1249_v45 = vld [vmem:[%s7502_s1 + $0x48] sm:$0xff]  ;;  %v5011_v58 = vand.u32 127, %v342_v52  ;;  %s1481_s16 = sld [smem:[#allocation2]] }
  0x12   : > { %s3852_s7 = sshll.u32 %s8068_s9, 3  ;;  %4500 = vmatprep.subr.bf16.mxu0 %v4499_v31  ;;  %v4511_v43 = vpack.c.bf16 %v1247_v41, %v1246_v40  ;;  %v4515_v47 = vpack.c.bf16 %v1249_v45, %v1248_v44  ;;  %v1250_v48 = vld [vmem:[%s7502_s1 + $0x50] sm:$0xff]  ;;  %v1251_v49 = vld [vmem:[%s7502_s1 + $0x58] sm:$0xff]  ;;  %v1252_v53 = vld [vmem:[%s7502_s1 + $0x60] sm:$0xff] }
  0x13   : > { %s4814_s12 = scalar_lea.vmem %s7501_s0, %s3852_s7  ;;  %4502 = vmatpush3.bf16.msra.mxu0 %v4499_v31  ;;  %v4519_v51 = vpack.c.bf16 %v1251_v49, %v1250_v48  ;;  %v1253_v54 = vld [vmem:[%s7502_s1 + $0x68] sm:$0xff]  ;;  %v1254_v59 = vld [vmem:[%s7502_s1 + $0x70] sm:$0xff]  ;;  %v1255_v60 = vld [vmem:[%s7502_s1 + $0x78] sm:$0xff]  ;;  %s7430_s19 = scalar_lea.vmem %s7509_s8, %s3852_s7 }
  0x14   : > { %v4817_v1 = vld [vmem:[%s4814_s12 + $0x8] sm:$0xff]  ;;  %v310_v2 = vld [vmem:[%s4814_s12] sm:$0xff]  ;;  %v312_v6 = vld [vmem:[%s4814_s12 + $0x10] sm:$0xff]  ;;  %4504 = vmatprep.subr.bf16.mxu0 %v4503_v35  ;;  %v4523_v57 = vpack.c.bf16 %v1253_v54, %v1252_v53  ;;  %v4527_v61 = vpack.c.bf16 %v1255_v60, %v1254_v59 }
  0x15   : > { %348 = vperm.xlu1 %4647, %v4817_v1   ;;  %345 = vperm.xlu0 %4645, %v310_v2   ;;  %v4831_v7 = vld [vmem:[%s4814_s12 + $0x18] sm:$0xff]  ;;  %v314_v8 = vld [vmem:[%s4814_s12 + $0x20] sm:$0xff]  ;;  %v4838_v9 = vld [vmem:[%s4814_s12 + $0x28] sm:$0xff] }
  0x16   : > { %v316_v10 = vld [vmem:[%s4814_s12 + $0x30] sm:$0xff]  ;;  %v4846_v11 = vld [vmem:[%s4814_s12 + $0x38] sm:$0xff]  ;;  %v4851_v12 = vld [vmem:[%s4814_s12 + $0x40] sm:$0xff] }
  0x17   : > { %v4855_v13 = vld [vmem:[%s4814_s12 + $0x48] sm:$0xff]  ;;  %v4860_v14 = vld [vmem:[%s4814_s12 + $0x50] sm:$0xff]  ;;  %v4866_v15 = vld [vmem:[%s4814_s12 + $0x58] sm:$0xff]  ;;  %4506 = vmatpush3.bf16.msra.mxu0 %v4503_v35 }
  0x18   : > { %v4872_v16 = vld [vmem:[%s4814_s12 + $0x60] sm:$0xff]  ;;  %v4877_v17 = vld [vmem:[%s4814_s12 + $0x68] sm:$0xff]  ;;  %v4881_v18 = vld [vmem:[%s4814_s12 + $0x70] sm:$0xff]  ;;  %4508 = vmatprep.subr.bf16.mxu0 %v4507_v39 }
  0x19   : > { %4648 = vset.pattern.permute.xlu1 %v7513_v3  ;;  %4646 = vset.pattern.permute.xlu0 %v7513_v3  ;;  %v4886_v19 = vld [vmem:[%s4814_s12 + $0x78] sm:$0xff]  ;;  %v4891_v20 = vld [vmem:[%s4814_s12 + $0x80] sm:$0xff]  ;;  %v4897_v21 = vld [vmem:[%s4814_s12 + $0x88] sm:$0xff] }
  0x1a   : > { %572 = vperm.xlu1 %4648, %v4817_v1   ;;  %569 = vperm.xlu0 %4646, %v310_v2   ;;  %v4902_v22 = vld [vmem:[%s4814_s12 + $0x90] sm:$0xff]  ;;  %v4907_v23 = vld [vmem:[%s4814_s12 + $0x98] sm:$0xff]  ;;  %v4912_v24 = vld [vmem:[%s4814_s12 + $0xa0] sm:$0xff] }
  0x1b   : > { %v4918_v25 = vld [vmem:[%s4814_s12 + $0xa8] sm:$0xff]  ;;  %v4924_v26 = vld [vmem:[%s4814_s12 + $0xb0] sm:$0xff]  ;;  %v4929_v27 = vld [vmem:[%s4814_s12 + $0xb8] sm:$0xff]  ;;  %4510 = vmatpush3.bf16.msra.mxu0 %v4507_v39 }
  0x1c   : > { %v4940_v30 = vld [vmem:[%s4814_s12 + $0xc0] sm:$0xff]  ;;  %v4952_v34 = vld [vmem:[%s4814_s12 + $0xc8] sm:$0xff]  ;;  %v4964_v38 = vld [vmem:[%s4814_s12 + $0xd0] sm:$0xff]  ;;  %4512 = vmatprep.subr.bf16.mxu0 %v4511_v43 }
  0x1d   : > { %v4976_v42 = vld [vmem:[%s4814_s12 + $0xd8] sm:$0xff]  ;;  %v4987_v46 = vld [vmem:[%s4814_s12 + $0xe0] sm:$0xff]  ;;  %v4998_v50 = vld [vmem:[%s4814_s12 + $0xe8] sm:$0xff] }
  0x1e   : > { %4649 = vset.pattern.permute.xlu1 %v7515_v4  ;;  %4652 = vset.pattern.permute.xlu0 %v7510_v5 }
  0x1f   : > { %793 = vperm.xlu1 %4649, %v310_v2   ;;  %1017 = vperm.xlu0 %4652, %v310_v2   ;;  %v7511_v2 = vmov 0.0  }
  0x20   : > { %4514 = vmatpush3.bf16.msra.mxu0 %v4511_v43 }
  0x21   : > { %4516 = vmatprep.subr.bf16.mxu0 %v4515_v47 }
  0x23   : > { %4650 = vset.pattern.permute.xlu1 %v7517_v0  ;;  %1020 = vperm.xlu0 %4652, %v4817_v1  }
  0x24   : > { %351 = vperm.xlu1 %4650, %v312_v6   ;;  %4518 = vmatpush3.bf16.msra.mxu0 %v4515_v47 }
  0x25   : > { %4520 = vmatprep.subr.bf16.mxu0 %v4519_v51 }
  0x27   : > { %1023 = vperm.xlu0 %4652, %v312_v6  }
  0x28   : > { %4651 = vset.pattern.permute.xlu1 %v7513_v3  ;;  %4522 = vmatpush3.bf16.msra.mxu0 %v4519_v51 }
  0x29   : > { %575 = vperm.xlu1 %4651, %v312_v6   ;;  %4524 = vmatprep.subr.bf16.mxu0 %v4523_v57 }
  0x2b   : > { %1026 = vperm.xlu0 %4652, %v4831_v7  }
  0x2c   : > { %4526 = vmatpush3.bf16.msra.mxu0 %v4523_v57 }
  0x2d   : > { %4653 = vset.pattern.permute.xlu1 %v7517_v0  ;;  %4528 = vmatprep.subr.bf16.mxu0 %v4527_v61 }
  0x2e   : > { %354 = vperm.xlu1 %4653, %v4831_v7  }
  0x2f   : > { %1029 = vperm.xlu0 %4652, %v314_v8  }
  0x30   : > { %4530 = vmatpush3.bf16.msra.mxu0 %v4527_v61 }
  0x32   : > { %4654 = vset.pattern.permute.xlu1 %v7513_v3 }
  0x33   : > { %578 = vperm.xlu1 %4654, %v4831_v7   ;;  %1032 = vperm.xlu0 %4652, %v4838_v9  }
  0x37   : > { %4655 = vset.pattern.permute.xlu1 %v7515_v4  ;;  %1035 = vperm.xlu0 %4652, %v316_v10  }
  0x38   : > { %799 = vperm.xlu1 %4655, %v312_v6  }
  0x3b   : > { %1038 = vperm.xlu0 %4652, %v4846_v11  }
  0x3c   : > { %4656 = vset.pattern.permute.xlu1 %v7517_v0 }
  0x3d   : > { %357 = vperm.xlu1 %4656, %v314_v8  }
  0x3f   : > { %1041 = vperm.xlu0 %4652, %v4851_v12  }
  0x41   : > { %4657 = vset.pattern.permute.xlu1 %v7513_v3 }
  0x42   : > { %581 = vperm.xlu1 %4657, %v314_v8  }
  0x43   : > { %1044 = vperm.xlu0 %4652, %v4855_v13  }
  0x46   : > { %4658 = vset.pattern.permute.xlu1 %v7517_v0 }
  0x47   : > { %360 = vperm.xlu1 %4658, %v4838_v9   ;;  %1047 = vperm.xlu0 %4652, %v4860_v14  }
  0x4b   : > { %4659 = vset.pattern.permute.xlu1 %v7513_v3  ;;  %1050 = vperm.xlu0 %4652, %v4866_v15  }
  0x4c   : > { %584 = vperm.xlu1 %4659, %v4838_v9  }
  0x4f   : > { %1053 = vperm.xlu0 %4652, %v4872_v16  }
  0x50   : > { %4660 = vset.pattern.permute.xlu1 %v7515_v4 }
  0x51   : > { %805 = vperm.xlu1 %4660, %v314_v8  }
  0x53   : > { %1056 = vperm.xlu0 %4652, %v4877_v17  }
  0x55   : > { %4661 = vset.pattern.permute.xlu1 %v7517_v0 }
  0x56   : > { %363 = vperm.xlu1 %4661, %v316_v10  }
  0x57   : > { %1059 = vperm.xlu0 %4652, %v4881_v18  }
  0x5a   : > { %4662 = vset.pattern.permute.xlu1 %v7513_v3 }
  0x5b   : > { %587 = vperm.xlu1 %4662, %v316_v10   ;;  %1062 = vperm.xlu0 %4652, %v4886_v19  }
  0x5f   : > { %4663 = vset.pattern.permute.xlu1 %v7517_v0  ;;  %1065 = vperm.xlu0 %4652, %v4891_v20  }
  0x60   : > { %366 = vperm.xlu1 %4663, %v4846_v11  }
  0x63   : > { %1068 = vperm.xlu0 %4652, %v4897_v21  }
  0x64   : > { %4664 = vset.pattern.permute.xlu1 %v7513_v3 }
  0x65   : > { %590 = vperm.xlu1 %4664, %v4846_v11  }
  0x67   : > { %1071 = vperm.xlu0 %4652, %v4902_v22  }
  0x69   : > { %4665 = vset.pattern.permute.xlu1 %v7515_v4 }
  0x6a   : > { %811 = vperm.xlu1 %4665, %v316_v10  }
  0x6b   : > { %1074 = vperm.xlu0 %4652, %v4907_v23  }
  0x6e   : > { %4666 = vset.pattern.permute.xlu1 %v7517_v0 }
  0x6f   : > { %369 = vperm.xlu1 %4666, %v4851_v12   ;;  %1077 = vperm.xlu0 %4652, %v4912_v24  }
  0x73   : > { %4667 = vset.pattern.permute.xlu1 %v7513_v3  ;;  %1080 = vperm.xlu0 %4652, %v4918_v25  }
  0x74   : > { %593 = vperm.xlu1 %4667, %v4851_v12  }
  0x77   : > { %1083 = vperm.xlu0 %4652, %v4924_v26  }
  0x78   : > { %4668 = vset.pattern.permute.xlu1 %v7517_v0 }
  0x79   : > { %372 = vperm.xlu1 %4668, %v4855_v13  }
  0x7b   : > { %1086 = vperm.xlu0 %4652, %v4929_v27  }
  0x7d   : > { %4669 = vset.pattern.permute.xlu1 %v7513_v3 }
  0x7e   : > { %596 = vperm.xlu1 %4669, %v4855_v13  }
  0x7f   : > { %1089 = vperm.xlu0 %4652, %v4940_v30  }
  0x82   : > { %4670 = vset.pattern.permute.xlu1 %v7515_v4 }
  0x83   : > { %817 = vperm.xlu1 %4670, %v4851_v12   ;;  %1092 = vperm.xlu0 %4652, %v4952_v34  }
  0x87   : > { %4671 = vset.pattern.permute.xlu1 %v7517_v0  ;;  %1095 = vperm.xlu0 %4652, %v4964_v38  }
  0x88   : > { %375 = vperm.xlu1 %4671, %v4860_v14  }
  0x8b   : > { %1098 = vperm.xlu0 %4652, %v4976_v42  }
  0x8c   : > { %4672 = vset.pattern.permute.xlu1 %v7513_v3 }
  0x8d   : > { %599 = vperm.xlu1 %4672, %v4860_v14  }
  0x8f   : > { %1101 = vperm.xlu0 %4652, %v4987_v46  }
  0x91   : > { %4673 = vset.pattern.permute.xlu1 %v7517_v0 }
  0x92   : > { %378 = vperm.xlu1 %4673, %v4866_v15  }
  0x93   : > { %1104 = vperm.xlu0 %4652, %v4998_v50  }
  0x94   : > { %v5009_v55 = vpop.permute.xlu1 %348  ;;  %v346_v56 = vpop.permute.xlu0 %345 }
  0x95   : > { %vm440_vm0 = vcmp.eq.s32.totalorder %v5011_v58, %v346_v56  ;;  %v5129_v56 = vld [vmem:[%s4814_s12 + $0xf8] sm:$0xff]  ;;  %vm441_vm5 = vcmp.eq.s32.totalorder %v5011_v58, %v5009_v55 }
  0x96   : > { %4674 = vset.pattern.permute.xlu1 %v7513_v3  ;;  %v3855_v6 = vsel %vm440_vm0, 1.0, %v7511_v2 }
  0x97   : > { %602 = vperm.xlu1 %4674, %v4866_v15   ;;  %4725 = vset.pattern.permute.xlu0 %v7515_v4 }
  0x98   : > { %796 = vperm.xlu0 %4725, %v4817_v1  }
  0x99   : > { %v5024_v62 = vpop.permute.xlu1 %572  ;;  %v570_v63 = vpop.permute.xlu0 %569 }
  0x9a   : > { %vm664_vm1 = vcmp.eq.s32.totalorder %v5011_v58, %v570_v63  ;;  %vm665_vm4 = vcmp.eq.s32.totalorder %v5011_v58, %v5024_v62 }
  0x9b   : > { %4675 = vset.pattern.permute.xlu1 %v7515_v4  ;;  %v3887_v8 = vsel %vm664_vm1, 1.0, %v7511_v2 }
  0x9c   : > { %823 = vperm.xlu1 %4675, %v4860_v14   ;;  %802 = vperm.xlu0 %4725, %v4831_v7   ;;  %v760_v1 = vadd.f32 %v3887_v8, %v3855_v6 }
  0x9e   : > { %v794_v10 = vpop.permute.xlu1 %793  ;;  %v1018_v12 = vpop.permute.xlu0 %1017 }
  0x9f   : > { %vm888_vm2 = vcmp.eq.s32.totalorder %v5011_v58, %v794_v10  ;;  %vm1112_vm3 = vcmp.eq.s32.totalorder %v5011_v58, %v1018_v12 }
  0xa0   : > { %v3919_v28 = vsel %vm888_vm2, 1.0, %v7511_v2  ;;  %4676 = vset.pattern.permute.xlu1 %v7517_v0  ;;  %808 = vperm.xlu0 %4725, %v4838_v9   ;;  %v3951_v29 = vsel %vm1112_vm3, 1.0, %v7511_v2 }
  0xa1   : > { %381 = vperm.xlu1 %4676, %v4872_v16   ;;  %v984_v14 = vadd.f32 %v3919_v28, %v760_v1 }
  0xa2   : > { %v5039_v7 = vpop.permute.xlu0 %1020 }
  0xa3   : > { %v5041_v31 = vpop.permute.xlu1 %351  ;;  %v1208_v32 = vadd.f32 %v3951_v29, %v984_v14  ;;  %vm1113_vm8 = vcmp.eq.s32.totalorder %v5011_v58, %v5039_v7 }
  0xa4   : > { %814 = vperm.xlu0 %4725, %v4846_v11   ;;  %vm442_vm7 = vcmp.eq.s32.totalorder %v5011_v58, %v5041_v31 }
  0xa5   : > { %4677 = vset.pattern.permute.xlu1 %v7513_v3  ;;  %4211 = vmatprep.mubr.f32.mxu0 %v1208_v32 }
  0xa6   : > { %605 = vperm.xlu1 %4677, %v4872_v16   ;;  %v5046_v33 = vpop.permute.xlu0 %1023 }
  0xa7   : > { %vm1114_vm9 = vcmp.eq.s32.totalorder %v5011_v58, %v5046_v33 }
  0xa8   : > { %v5048_v9 = vpop.permute.xlu1 %575  ;;  %820 = vperm.xlu0 %4725, %v4855_v13  }
  0xa9   : > { %vm666_vm6 = vcmp.eq.s32.totalorder %v5011_v58, %v5048_v9 }
  0xaa   : > { %4678 = vset.pattern.permute.xlu1 %v7517_v0  ;;  %v5052_v35 = vpop.permute.xlu0 %1026 }
  0xab   : > { %384 = vperm.xlu1 %4678, %v4877_v17   ;;  %vm1115_vm12 = vcmp.eq.s32.totalorder %v5011_v58, %v5052_v35 }
  0xac   : > { %826 = vperm.xlu0 %4725, %v4866_v15  }
  0xad   : > { %v5056_v11 = vpop.permute.xlu1 %354 }
  0xae   : > { %v5058_v36 = vpop.permute.xlu0 %1029  ;;  %vm443_vm13 = vcmp.eq.s32.totalorder %v5011_v58, %v5056_v11 }
  0xaf   : > { %4679 = vset.pattern.permute.xlu1 %v7513_v3  ;;  %vm1116_vm14 = vcmp.eq.s32.totalorder %v5011_v58, %v5058_v36 }
  0xb0   : > { %608 = vperm.xlu1 %4679, %v4877_v17   ;;  %832 = vperm.xlu0 %4725, %v4877_v17  }
  0xb2   : > { %v5063_v37 = vpop.permute.xlu1 %578  ;;  %v5065_v13 = vpop.permute.xlu0 %1032 }
  0xb3   : > { %vm667_vm11 = vcmp.eq.s32.totalorder %v5011_v58, %v5063_v37  ;;  %vm1117_vm0 = vcmp.eq.s32.totalorder %v5011_v58, %v5065_v13 }
  0xb4   : > { %4680 = vset.pattern.permute.xlu1 %v7515_v4  ;;  %838 = vperm.xlu0 %4725, %v4886_v19  }
  0xb5   : > { %829 = vperm.xlu1 %4680, %v4872_v16  }
  0xb6   : > { %v5070_v15 = vpop.permute.xlu0 %1035 }
  0xb7   : > { %v5072_v39 = vpop.permute.xlu1 %799  ;;  %vm1118_vm1 = vcmp.eq.s32.totalorder %v5011_v58, %v5070_v15 }
  0xb8   : > { %844 = vperm.xlu0 %4725, %v4897_v21   ;;  %vm890_vm10 = vcmp.eq.s32.totalorder %v5011_v58, %v5072_v39 }
  0xb9   : > { %4681 = vset.pattern.permute.xlu1 %v7517_v0 }
  0xba   : > { %387 = vperm.xlu1 %4681, %v4881_v18   ;;  %v5077_v17 = vpop.permute.xlu0 %1038 }
  0xbb   : > { %vm1119_vm2 = vcmp.eq.s32.totalorder %v5011_v58, %v5077_v17 }
  0xbc   : > { %v5079_v40 = vpop.permute.xlu1 %357  ;;  %850 = vperm.xlu0 %4725, %v4907_v23  }
  0xbd   : > { %vm444_vm3 = vcmp.eq.s32.totalorder %v5011_v58, %v5079_v40 }
  0xbe   : > { %4682 = vset.pattern.permute.xlu1 %v7513_v3  ;;  %v5083_v41 = vpop.permute.xlu0 %1041 }
  0xbf   : > { %611 = vperm.xlu1 %4682, %v4881_v18  }
  0xc0   : > { %856 = vperm.xlu0 %4725, %v4918_v25  }
  0xc1   : > { %v5087_v16 = vpop.permute.xlu1 %581 }
  0xc2   : > { %v5089_v43 = vpop.permute.xlu0 %1044  ;;  %vm668_vm15 = vcmp.eq.s32.totalorder %v5011_v58, %v5087_v16 }
  0xc3   : > { %4683 = vset.pattern.permute.xlu1 %v7517_v0 }
  0xc4   : > { %390 = vperm.xlu1 %4683, %v4886_v19   ;;  %862 = vperm.xlu0 %4725, %v4929_v27  }
  0xc6   : > { %v5094_v44 = vpop.permute.xlu1 %360  ;;  %v5096_v45 = vpop.permute.xlu0 %1047 }
  0xc8   : > { %4684 = vset.pattern.permute.xlu1 %v7513_v3  ;;  %868 = vperm.xlu0 %4725, %v4952_v34  }
  0xc9   : > { %614 = vperm.xlu1 %4684, %v4886_v19  }
  0xca   : > { %v5101_v47 = vpop.permute.xlu0 %1050 }
  0xcb   : > { %v5103_v48 = vpop.permute.xlu1 %584 }
  0xcc   : > { %874 = vperm.xlu0 %4725, %v4976_v42  }
  0xcd   : > { %4685 = vset.pattern.permute.xlu1 %v7515_v4 }
  0xce   : > { %835 = vperm.xlu1 %4685, %v4881_v18   ;;  %v5108_v49 = vpop.permute.xlu0 %1053 }
  0xd0   : > { %v5110_v51 = vpop.permute.xlu1 %805  ;;  %880 = vperm.xlu0 %4725, %v4998_v50  }
  0xd2   : > { %4686 = vset.pattern.permute.xlu1 %v7517_v0  ;;  %v5114_v19 = vpop.permute.xlu0 %1056 }
  0xd3   : > { %393 = vperm.xlu1 %4686, %v4891_v20  }
  0xd4   : > { %886 = vperm.xlu0 %4725, %v5129_v56  }
  0xd5   : > { %v5117_v52 = vpop.permute.xlu1 %363 }
  0xd6   : > { %v5119_v53 = vpop.permute.xlu0 %1059 }
  0xd7   : > { %4687 = vset.pattern.permute.xlu1 %v7513_v3 }
  0xd8   : > { %617 = vperm.xlu1 %4687, %v4891_v20   ;;  %4728 = vset.pattern.permute.xlu0 %v7510_v5 }
  0xda   : > { %v5123_v18 = vpop.permute.xlu1 %587  ;;  %v5125_v54 = vpop.permute.xlu0 %1062 }
  0xdc   : > { %4688 = vset.pattern.permute.xlu1 %v7517_v0 }
  0xdd   : > { %396 = vperm.xlu1 %4688, %v4897_v21  }
  0xde   : > { %v5133_v57 = vpop.permute.xlu0 %1065 }
  0xdf   : > { %v5135_v59 = vpop.permute.xlu1 %366 }
  0xe1   : > { %4689 = vset.pattern.permute.xlu1 %v7513_v3 }
  0xe2   : > { %620 = vperm.xlu1 %4689, %v4897_v21   ;;  %v5140_v60 = vpop.permute.xlu0 %1068 }
  0xe4   : > { %v5142_v61 = vpop.permute.xlu1 %590 }
  0xe6   : > { %4690 = vset.pattern.permute.xlu1 %v7515_v4  ;;  %v5145_v63 = vpop.permute.xlu0 %1071 }
  0xe7   : > { %841 = vperm.xlu1 %4690, %v4891_v20  }
  0xe9   : > { %v5148_v6 = vpop.permute.xlu1 %811 }
  0xea   : > { %v5150_v8 = vpop.permute.xlu0 %1074 }
  0xeb   : > { %4691 = vset.pattern.permute.xlu1 %v7517_v0 }
  0xec   : > { %399 = vperm.xlu1 %4691, %v4902_v22  }
  0xee   : > { %v5154_v1 = vpop.permute.xlu1 %369  ;;  %v5156_v21 = vpop.permute.xlu0 %1077 }
  0xf0   : > { %4692 = vset.pattern.permute.xlu1 %v7513_v3 }
  0xf1   : > { %623 = vperm.xlu1 %4692, %v4902_v22  }
  0xf2   : > { %v5160_v10 = vpop.permute.xlu0 %1080 }
  0xf3   : > { %v5162_v12 = vpop.permute.xlu1 %593 }
  0xf5   : > { %4693 = vset.pattern.permute.xlu1 %v7517_v0 }
  0xf6   : > { %402 = vperm.xlu1 %4693, %v4907_v23   ;;  %v5166_v20 = vpop.permute.xlu0 %1083 }
  0xf8   : > { %v5168_v28 = vpop.permute.xlu1 %372 }
  0xfa   : > { %4694 = vset.pattern.permute.xlu1 %v7513_v3  ;;  %v5171_v29 = vpop.permute.xlu0 %1086 }
  0xfb   : > { %7588 = vst [vmem:[#allocation3_spill] sm:$0xff] %v5171_v29  ;;  %626 = vperm.xlu1 %4694, %v4907_v23   ;;  %v7592_v23 = vmov 1  }
  0xfd   : > { %v5174_v14 = vpop.permute.xlu1 %596 }
  0xfe   : > { %v5176_v32 = vpop.permute.xlu0 %1089 }
  0xff   : > { %7589 = vst [vmem:[#allocation4_spill] sm:$0xff] %v5176_v32  ;;  %4695 = vset.pattern.permute.xlu1 %v7515_v4  ;;  %v7594_v4 = vmov 0.0  }
 0x100   : > { %847 = vperm.xlu1 %4695, %v4902_v22   ;;  %v3856_v55 = vsel %vm441_vm5, 1.0, %v7594_v4  ;;  %v3889_v9 = vsel %vm666_vm6, 1.0, %v7594_v4  ;;  %v3857_v7 = vsel %vm442_vm7, 1.0, %v7594_v4  ;;  %v3953_v33 = vsel %vm1114_vm9, 1.0, %v7594_v4 }
 0x101   : > { %v762_v37 = vadd.f32 %v3889_v9, %v3857_v7  ;;  %v3890_v39 = vsel %vm667_vm11, 1.0, %v7594_v4  ;;  %v3954_v35 = vsel %vm1115_vm12, 1.0, %v7594_v4  ;;  %v3858_v11 = vsel %vm443_vm13, 1.0, %v7594_v4 }
 0x102   : > { %v5180_v5 = vpop.permute.xlu1 %817  ;;  %v5182_v2 = vpop.permute.xlu0 %1092  ;;  %v3955_v36 = vsel %vm1116_vm14, 1.0, %v7594_v4  ;;  %v3891_v15 = vsel %vm668_vm15, 1.0, %v7594_v4  ;;  %v5258_v17 = vsel %vm1118_vm1, 1.0, %v7594_v4  ;;  %vm669_vm5 = vcmp.eq.s32.totalorder %v5011_v58, %v5103_v48 }
 0x103   : > { %7590 = vst [vmem:[#allocation5_spill] sm:$0xff] %v5182_v2  ;;  %v3859_v9 = vsel %vm444_vm3, 1.0, %v7594_v4  ;;  %vm445_vm7 = vcmp.eq.s32.totalorder %v5011_v58, %v5094_v44  ;;  %vm1120_vm9 = vcmp.eq.s32.totalorder %v5011_v58, %v5083_v41  ;;  %vm671_vm11 = vcmp.eq.s32.totalorder %v5011_v58, %v5142_v61 }
 0x104   : > { %4696 = vset.pattern.permute.xlu1 %v7517_v0  ;;  %v3888_v0 = vsel %vm665_vm4, 1.0, %v7594_v4  ;;  %vm892_vm4 = vcmp.eq.s32.totalorder %v5011_v58, %v5110_v51  ;;  %v5263_v51 = vsel %vm1119_vm2, 1.0, %v7594_v4  ;;  %vm894_vm12 = vcmp.eq.s32.totalorder %v5011_v58, %v5148_v6 }
 0x105   : > { %405 = vperm.xlu1 %4696, %v4912_v24   ;;  %v761_v62 = vadd.f32 %v3888_v0, %v3856_v55  ;;  %v3921_v0 = vsel %vm890_vm10, 1.0, %v7594_v4  ;;  %v5255_v55 = vsel %vm1117_vm0, 1.0, %v7594_v4  ;;  %v3923_v7 = vsel %vm892_vm4, 1.0, %v7594_v4 }
 0x106   : > { %v5186_v3 = vpop.permute.xlu0 %1095  ;;  %v986_v13 = vadd.f32 %v3921_v0, %v762_v37  ;;  %v7598_v0 = vmov 2   ;;  %v764_v37 = vadd.f32 %v3891_v15, %v3859_v9  ;;  %vm446_vm10 = vcmp.eq.s32.totalorder %v5011_v58, %v5117_v52 }
 0x107   : > { %7591 = vst [vmem:[#allocation6_spill] sm:$0xff] %v5186_v3  ;;  %v5188_v29 = vpop.permute.xlu1 %375  ;;  %v7595_v3 = vmov 0   ;;  %vm1121_vm13 = vcmp.eq.s32.totalorder %v5011_v58, %v5089_v43  ;;  %vm447_vm15 = vcmp.eq.s32.totalorder %v5011_v58, %v5135_v59  ;;  %vm672_vm0 = vcmp.eq.s32.totalorder %v5011_v58, %v5162_v12 }
 0x108   : > { %v3861_v61 = vsel %vm446_vm10, 1.0, %v7594_v4  ;;  %v3894_v6 = vsel %vm671_vm11, 1.0, %v7594_v4  ;;  %v3925_v15 = vsel %vm894_vm12, 1.0, %v7594_v4  ;;  %vm448_vm1 = vcmp.eq.s32.totalorder %v5011_v58, %v5154_v1 }
 0x109   : > { %4697 = vset.pattern.permute.xlu1 %v7592_v23  ;;  %vm896_vm2 = vcmp.eq.s32.totalorder %v5011_v58, %v5180_v5  ;;  %v3863_v59 = vsel %vm448_vm1, 1.0, %v7594_v4  ;;  %vm1122_vm11 = vcmp.eq.s32.totalorder %v5011_v58, %v5096_v45 }
 0x10a   : > { %629 = vperm.xlu1 %4697, %v4912_v24   ;;  %v5192_v32 = vpop.permute.xlu0 %1098  ;;  %v3927_v12 = vsel %vm896_vm2, 1.0, %v7594_v4 }
 0x10b   : > { %7593 = vst [vmem:[#allocation7_spill] sm:$0xff] %v5192_v32 }
 0x10c   : > { %v5196_v22 = vpop.permute.xlu1 %599 }
 0x10d   : > { %vm674_vm4 = vcmp.eq.s32.totalorder %v5011_v58, %v5196_v22 }
 0x10e   : > { %4698 = vset.pattern.permute.xlu1 %v7595_v3  ;;  %v5204_v2 = vpop.permute.xlu0 %1101 }
 0x10f   : > { %7596 = vst [vmem:[#allocation8_spill] sm:$0xff] %v5204_v2  ;;  %408 = vperm.xlu1 %4698, %v4918_v25   ;;  %v3952_v2 = vsel %vm1113_vm8, 1.0, %v7594_v4  ;;  %vm670_vm8 = vcmp.eq.s32.totalorder %v5011_v58, %v5123_v18 }
 0x111   : > { %v5219_v31 = vpop.permute.xlu1 %378 }
 0x112   : > { %v5226_v32 = vpop.permute.xlu0 %1104  ;;  %vm451_vm12 = vcmp.eq.s32.totalorder %v5011_v58, %v5219_v31 }
 0x113   : > { %7597 = vst [vmem:[#allocation9_spill] sm:$0xff] %v5226_v32  ;;  %4699 = vset.pattern.permute.xlu1 %v7592_v23  ;;  %v988_v32 = vadd.f32 %v3923_v7, %v764_v37 }
 0x114   : > { %632 = vperm.xlu1 %4699, %v4918_v25   ;;  %v763_v25 = vadd.f32 %v3890_v39, %v3858_v11  ;;  %v3892_v39 = vsel %vm669_vm5, 1.0, %v7594_v4  ;;  %vm673_vm5 = vcmp.eq.s32.totalorder %v5011_v58, %v5174_v14  ;;  %v3960_v14 = vsel %vm1121_vm13, 1.0, %v7594_v4 }
 0x115   : > { %v1212_v37 = vadd.f32 %v3955_v36, %v988_v32  ;;  %vm1123_vm13 = vcmp.eq.s32.totalorder %v5011_v58, %v5101_v47 }
 0x116   : > { %v5252_v16 = vpop.permute.xlu1 %602 }
 0x117   : > { %v797_v40 = vpop.permute.xlu0 %796  ;;  %vm675_vm10 = vcmp.eq.s32.totalorder %v5011_v58, %v5252_v16 }
 0x118   : > { %vm889_vm6 = vcmp.eq.s32.totalorder %v5011_v58, %v797_v40  ;;  %4700 = vset.pattern.permute.xlu1 %v7598_v0  ;;  %v1210_v40 = vadd.f32 %v3953_v33, %v986_v13  ;;  %v3898_v45 = vsel %vm675_vm10, 1.0, %v7594_v4 }
 0x119   : > { %v3920_v48 = vsel %vm889_vm6, 1.0, %v7594_v4  ;;  %853 = vperm.xlu1 %4700, %v4912_v24   ;;  %v3860_v24 = vsel %vm445_vm7, 1.0, %v7594_v4  ;;  %vm450_vm6 = vcmp.eq.s32.totalorder %v5011_v58, %v5188_v29  ;;  %v3896_v29 = vsel %vm673_vm5, 1.0, %v7594_v4 }
 0x11a   : > { %v985_v11 = vadd.f32 %v3920_v48, %v761_v62  ;;  %v3893_v62 = vsel %vm670_vm8, 1.0, %v7594_v4  ;;  %v765_v13 = vadd.f32 %v3892_v39, %v3860_v24  ;;  %v3862_v48 = vsel %vm447_vm15, 1.0, %v7594_v4 }
 0x11b   : > { %v824_v44 = vpop.permute.xlu1 %823  ;;  %v803_v18 = vpop.permute.xlu0 %802  ;;  %vm449_vm8 = vcmp.eq.s32.totalorder %v5011_v58, %v5168_v28  ;;  %v3897_v24 = vsel %vm674_vm4, 1.0, %v7594_v4  ;;  %vm1124_vm5 = vcmp.eq.s32.totalorder %v5011_v58, %v5108_v49 }
 0x11c   : > { %vm891_vm14 = vcmp.eq.s32.totalorder %v5011_v58, %v803_v18  ;;  %v1209_v33 = vadd.f32 %v3952_v2, %v985_v11  ;;  %v766_v2 = vadd.f32 %v3893_v62, %v3861_v61  ;;  %v767_v11 = vadd.f32 %v3894_v6, %v3862_v48 }
 0x11d   : > { %v3922_v52 = vsel %vm891_vm14, 1.0, %v7594_v4  ;;  %4701 = vset.pattern.permute.xlu1 %v7595_v3  ;;  %vm898_vm7 = vcmp.eq.s32.totalorder %v5011_v58, %v824_v44  ;;  %v3866_v48 = vsel %vm451_vm12, 1.0, %v7594_v4 }
 0x11e   : > { %v987_v9 = vadd.f32 %v3922_v52, %v763_v25  ;;  %411 = vperm.xlu1 %4701, %v4924_v26   ;;  %4212 = vmatmul.mubr.f32.vlgmr.msra.gmra.mrb[0].mxu0 %v1209_v33  ;;  %v3895_v25 = vsel %vm672_vm0, 1.0, %v7594_v4  ;;  %v990_v5 = vadd.f32 %v3925_v15, %v766_v2  ;;  %v3865_v52 = vsel %vm450_vm6, 1.0, %v7594_v4 }
 0x11f   : > { %4214 = vmatprep.mubr.f32.mxu0 %v1210_v40  ;;  %v809_v7 = vpop.permute.xlu0 %808  ;;  %v768_v40 = vadd.f32 %v3895_v25, %v3863_v59  ;;  %v3929_v22 = vsel %vm898_vm7, 1.0, %v7594_v4  ;;  %v771_v25 = vadd.f32 %v3898_v45, %v3866_v48  ;;  %vm1125_vm6 = vcmp.eq.s32.totalorder %v5011_v58, %v5114_v19 }
 0x120   : > { %vm893_vm3 = vcmp.eq.s32.totalorder %v5011_v58, %v809_v7  ;;  %v5312_v39 = vpop.permute.xlu1 %381  ;;  %v1211_v1 = vadd.f32 %v3954_v35, %v987_v9  ;;  %v3959_v35 = vsel %vm1120_vm9, 1.0, %v7594_v4  ;;  %v3961_v7 = vsel %vm1122_vm11, 1.0, %v7594_v4 }
 0x121   : > { %v3924_v32 = vsel %vm893_vm3, 1.0, %v7594_v4  ;;  %v992_v44 = vadd.f32 %v3927_v12, %v768_v40  ;;  %vm452_vm4 = vcmp.eq.s32.totalorder %v5011_v58, %v5312_v39  ;;  %v3964_v49 = vsel %vm1125_vm6, 1.0, %v7594_v4 }
 0x122   : > { %v989_v36 = vadd.f32 %v3924_v32, %v765_v13  ;;  %4702 = vset.pattern.permute.xlu1 %v7592_v23  ;;  %4215 = vmatmul.mubr.f32.gmra.mrb[2].mxu0 %v1211_v1  ;;  %v1214_v13 = vadd.f32 %v5258_v17, %v990_v5  ;;  %v770_v17 = vadd.f32 %v3897_v24, %v3865_v52  ;;  %v3962_v1 = vsel %vm1123_vm13, 1.0, %v7594_v4 }
 0x123   : > { %635 = vperm.xlu1 %4702, %v4924_v26   ;;  %4217 = vmatprep.mubr.f32.mxu0 %v1212_v37  ;;  %v815_v18 = vpop.permute.xlu0 %814  ;;  %v1216_v2 = vadd.f32 %v3959_v35, %v992_v44  ;;  %v3867_v39 = vsel %vm452_vm4, 1.0, %v7594_v4  ;;  %vm1127_vm13 = vcmp.eq.s32.totalorder %v5011_v58, %v5125_v54  ;;  %v2636_v54 = vld [vmem:[%s7503_s2] sm:$0xff] }
 0x124   : > { %vm895_vm9 = vcmp.eq.s32.totalorder %v5011_v58, %v815_v18  ;;  %v1213_v41 = vadd.f32 %v5255_v55, %v989_v36  ;;  %v3864_v55 = vsel %vm449_vm8, 1.0, %v7594_v4  ;;  %v994_v28 = vadd.f32 %v3929_v22, %v770_v17 }
 0x125   : > { %v3926_v62 = vsel %vm895_vm9, 1.0, %v7594_v4  ;;  %v606_v33 = vpop.permute.xlu1 %605  ;;  %v769_v15 = vadd.f32 %v3896_v29, %v3864_v55  ;;  %v3963_v29 = vsel %vm1124_vm5, 1.0, %v7594_v4  ;;  %vm1128_vm5 = vcmp.eq.s32.totalorder %v5011_v58, %v5133_v57  ;;  %v2648_v57 = vld [vmem:[%s7503_s2 + $0x60] sm:$0xff] }
 0x126   : > { %v991_v61 = vadd.f32 %v3926_v62, %v767_v11  ;;  %4218 = vmatmul.mubr.f32.gmra.mrb[4].mxu0 %v1213_v41  ;;  %v1218_v47 = vadd.f32 %v3961_v7, %v994_v28  ;;  %vm676_vm1 = vcmp.eq.s32.totalorder %v5011_v58, %v606_v33 }
 0x127   : > { %4703 = vset.pattern.permute.xlu1 %v7595_v3  ;;  %4220 = vmatprep.mubr.f32.mxu0 %v1214_v13  ;;  %v821_v6 = vpop.permute.xlu0 %820  ;;  %v3899_v35 = vsel %vm676_vm1, 1.0, %v7594_v4 }
 0x128   : > { %vm897_vm14 = vcmp.eq.s32.totalorder %v5011_v58, %v821_v6  ;;  %414 = vperm.xlu1 %4703, %v4929_v27   ;;  %v1215_v43 = vadd.f32 %v5263_v51, %v991_v61  ;;  %v772_v41 = vadd.f32 %v3899_v35, %v3867_v39  ;;  %v2644_v39 = vld [vmem:[%s7503_s2 + $0x40] sm:$0xff] }
 0x129   : > { %v3928_v9 = vsel %vm897_vm14, 1.0, %v7594_v4  ;;  %vm1126_vm14 = vcmp.eq.s32.totalorder %v5011_v58, %v5119_v53 }
 0x12a   : > { %v993_v31 = vadd.f32 %v3928_v9, %v769_v15  ;;  %v385_v37 = vpop.permute.xlu1 %384  ;;  %4221 = vmatmul.mubr.f32.gmra.mrb[6].mxu0 %v1215_v43  ;;  %v3965_v9 = vsel %vm1126_vm14, 1.0, %v7594_v4  ;;  %vm1130_vm14 = vcmp.eq.s32.totalorder %v5011_v58, %v5145_v63 }
 0x12b   : > { %4223 = vmatprep.mubr.f32.mxu0 %v1216_v2  ;;  %v827_v51 = vpop.permute.xlu0 %826  ;;  %vm453_vm0 = vcmp.eq.s32.totalorder %v5011_v58, %v385_v37 }
 0x12c   : > { %vm899_vm15 = vcmp.eq.s32.totalorder %v5011_v58, %v827_v51  ;;  %4704 = vset.pattern.permute.xlu1 %v7592_v23  ;;  %v1217_v16 = vadd.f32 %v3960_v14, %v993_v31  ;;  %v2637_v31 = vld [vmem:[%s7503_s2 + $0x8] sm:$0xff] }
 0x12d   : > { %v3930_v11 = vsel %vm899_vm15, 1.0, %v7594_v4  ;;  %638 = vperm.xlu1 %4704, %v4929_v27   ;;  %v3868_v27 = vsel %vm453_vm0, 1.0, %v7594_v4  ;;  %v4531_v51 = vpack.c.bf16 %v2637_v31, %v2636_v54 }
 0x12e   : > { %v995_v5 = vadd.f32 %v3930_v11, %v771_v25  ;;  %4224 = vmatmul.mubr.f32.gmra.mrb[8].mxu0 %v1217_v16  ;;  %v2638_v16 = vld [vmem:[%s7503_s2 + $0x10] sm:$0xff] }
 0x12f   : > { %v609_v32 = vpop.permute.xlu1 %608  ;;  %4226 = vmatprep.mubr.f32.mxu0 %v1218_v47  ;;  %v833_v59 = vpop.permute.xlu0 %832  ;;  %4532 = vmatprep.subr.bf16.mxu1 %v4531_v51 }
 0x130   : > { %vm677_vm2 = vcmp.eq.s32.totalorder %v5011_v58, %v609_v32  ;;  %vm901_vm3 = vcmp.eq.s32.totalorder %v5011_v58, %v833_v59  ;;  %v1219_v12 = vadd.f32 %v3962_v1, %v995_v5  ;;  %v2639_v1 = vld [vmem:[%s7503_s2 + $0x18] sm:$0xff]  ;;  %4534 = vmatpush3.bf16.msra.mxu1 %v4531_v51  ;;  %v2640_v5 = vld [vmem:[%s7503_s2 + $0x20] sm:$0xff]  ;;  %v2641_v32 = vld [vmem:[%s7503_s2 + $0x28] sm:$0xff] }
 0x131   : > { %v3900_v36 = vsel %vm677_vm2, 1.0, %v7594_v4  ;;  %4705 = vset.pattern.permute.xlu1 %v7598_v0  ;;  %v3932_v18 = vsel %vm901_vm3, 1.0, %v7594_v4  ;;  %v4535_v11 = vpack.c.bf16 %v2639_v1, %v2638_v16  ;;  %v4539_v59 = vpack.c.bf16 %v2641_v32, %v2640_v5  ;;  %v340_v16 = vld [vmem:[%s4814_s12 + $0xf0] sm:$0xff]  ;;  %s4743_s12 = smov 120  }
 0x132   : > { %v773_v40 = vadd.f32 %v3900_v36, %v3868_v27  ;;  %859 = vperm.xlu1 %4705, %v4924_v26   ;;  %4227 = vmatmul.mubr.f32.gmra.mrb[10].mxu0 %v1219_v12  ;;  %v2642_v27 = vld [vmem:[%s7503_s2 + $0x30] sm:$0xff]  ;;  %v2643_v36 = vld [vmem:[%s7503_s2 + $0x38] sm:$0xff]  ;;  %v3969_v5 = vsel %vm1130_vm14, 1.0, %v7594_v4  ;;  %vm1134_vm14 = vcmp.eq.s32.totalorder %v5011_v58, %v5166_v20 }
 0x133   : > { %v839_v61 = vpop.permute.xlu0 %838  ;;  %4536 = vmatprep.subr.bf16.mxu1 %v4535_v11  ;;  %v4543_v35 = vpack.c.bf16 %v2643_v36, %v2642_v27 }
 0x134   : > { %v830_v24 = vpop.permute.xlu1 %829  ;;  %v997_v44 = vadd.f32 %v3932_v18, %v773_v40  ;;  %vm903_vm11 = vcmp.eq.s32.totalorder %v5011_v58, %v839_v61  ;;  %4538 = vmatpush3.bf16.msra.mxu1 %v4535_v11 }
 0x135   : > { %vm900_vm7 = vcmp.eq.s32.totalorder %v5011_v58, %v830_v24  ;;  %v3934_v15 = vsel %vm903_vm11, 1.0, %v7594_v4  ;;  %4540 = vmatprep.subr.bf16.mxu1 %v4539_v59  ;;  %v2645_v24 = vld [vmem:[%s7503_s2 + $0x48] sm:$0xff] }
 0x136   : > { %v3931_v26 = vsel %vm900_vm7, 1.0, %v7594_v4  ;;  %4706 = vset.pattern.permute.xlu1 %v7595_v3  ;;  %v1221_v13 = vadd.f32 %v3964_v49, %v997_v44  ;;  %vm1129_vm7 = vcmp.eq.s32.totalorder %v5011_v58, %v5140_v60 }
 0x137   : > { %v996_v62 = vadd.f32 %v3931_v26, %v772_v41  ;;  %417 = vperm.xlu1 %4706, %v4940_v30   ;;  %v845_v40 = vpop.permute.xlu0 %844 }
 0x138   : > { %4542 = vmatpush3.bf16.msra.mxu1 %v4539_v59  ;;  %vm905_vm3 = vcmp.eq.s32.totalorder %v5011_v58, %v845_v40 }
 0x139   : > { %v388_v33 = vpop.permute.xlu1 %387  ;;  %v1220_v19 = vadd.f32 %v3963_v29, %v996_v62  ;;  %4544 = vmatprep.subr.bf16.mxu1 %v4543_v35  ;;  %v3936_v49 = vsel %vm905_vm3, 1.0, %v7594_v4  ;;  %v2646_v62 = vld [vmem:[%s7503_s2 + $0x50] sm:$0xff] }
 0x13a   : > { %vm454_vm12 = vcmp.eq.s32.totalorder %v5011_v58, %v388_v33  ;;  %v2647_v33 = vld [vmem:[%s7503_s2 + $0x58] sm:$0xff] }
 0x13b   : > { %4707 = vset.pattern.permute.xlu1 %v7592_v23  ;;  %4229 = vmatprep.mubr.f32.mxu0 %v1220_v19  ;;  %v3869_v43 = vsel %vm454_vm12, 1.0, %v7594_v4 }
 0x13c   : > { %641 = vperm.xlu1 %4707, %v4940_v30   ;;  %4230 = vmatmul.mubr.f32.gmra.mrb[12].mxu0 %v1221_v13 }
 0x13d   : > { %4546 = vmatpush3.bf16.msra.mxu1 %v4543_v35 }
 0x13e   : > { %v612_v52 = vpop.permute.xlu1 %611 }
 0x13f   : > { %vm678_vm9 = vcmp.eq.s32.totalorder %v5011_v58, %v612_v52  ;;  %v4551_v52 = vpack.c.bf16 %v2647_v33, %v2646_v62 }
 0x140   : > { %4708 = vset.pattern.permute.xlu1 %v7595_v3 }
 0x141   : > { %420 = vperm.xlu1 %4708, %v4952_v34  }
 0x143   : > { %v391_v22 = vpop.permute.xlu1 %390 }
 0x144   : > { %vm455_vm8 = vcmp.eq.s32.totalorder %v5011_v58, %v391_v22 }
 0x145   : > { %4709 = vset.pattern.permute.xlu1 %v7592_v23  ;;  %v3870_v55 = vsel %vm455_vm8, 1.0, %v7594_v4 }
 0x146   : > { %644 = vperm.xlu1 %4709, %v4952_v34   ;;  %v3901_v34 = vsel %vm678_vm9, 1.0, %v7594_v4 }
 0x147   : > { %v774_v28 = vadd.f32 %v3901_v34, %v3869_v43  ;;  %v3968_v34 = vsel %vm1129_vm7, 1.0, %v7594_v4  ;;  %vm1133_vm7 = vcmp.eq.s32.totalorder %v5011_v58, %v5160_v10 }
 0x148   : > { %v615_v14 = vpop.permute.xlu1 %614  ;;  %v3972_v62 = vsel %vm1133_vm7, 1.0, %v7594_v4 }
 0x149   : > { %vm679_vm10 = vcmp.eq.s32.totalorder %v5011_v58, %v615_v14 }
 0x14a   : > { %v3902_v17 = vsel %vm679_vm10, 1.0, %v7594_v4  ;;  %4710 = vset.pattern.permute.xlu1 %v7598_v0 }
 0x14b   : > { %v775_v6 = vadd.f32 %v3902_v17, %v3870_v55  ;;  %865 = vperm.xlu1 %4710, %v4940_v30   ;;  %v3966_v30 = vsel %vm1127_vm13, 1.0, %v7594_v4  ;;  %v2649_v55 = vld [vmem:[%s7503_s2 + $0x68] sm:$0xff]  ;;  %v3967_v17 = vsel %vm1128_vm5, 1.0, %v7594_v4  ;;  %vm1132_vm5 = vcmp.eq.s32.totalorder %v5011_v58, %v5156_v21 }
 0x14c   : > { %v4555_v60 = vpack.c.bf16 %v2649_v55, %v2648_v57 }
 0x14d   : > { %v836_v45 = vpop.permute.xlu1 %835  ;;  %v999_v2 = vadd.f32 %v3934_v15, %v775_v6 }
 0x14e   : > { %vm902_vm15 = vcmp.eq.s32.totalorder %v5011_v58, %v836_v45  ;;  %v2650_v45 = vld [vmem:[%s7503_s2 + $0x70] sm:$0xff] }
 0x14f   : > { %v3933_v7 = vsel %vm902_vm15, 1.0, %v7594_v4  ;;  %4711 = vset.pattern.permute.xlu1 %v7595_v3  ;;  %v1223_v25 = vadd.f32 %v3966_v30, %v999_v2  ;;  %v851_v30 = vpop.permute.xlu0 %850  ;;  %vm1131_vm15 = vcmp.eq.s32.totalorder %v5011_v58, %v5150_v8 }
 0x150   : > { %v998_v53 = vadd.f32 %v3933_v7, %v774_v28  ;;  %423 = vperm.xlu1 %4711, %v4964_v38   ;;  %v2651_v28 = vld [vmem:[%s7503_s2 + $0x78] sm:$0xff]  ;;  %vm907_vm11 = vcmp.eq.s32.totalorder %v5011_v58, %v851_v30  ;;  %v3970_v32 = vsel %vm1131_vm15, 1.0, %v7594_v4 }
 0x152   : > { %v394_v37 = vpop.permute.xlu1 %393  ;;  %v1222_v48 = vadd.f32 %v3965_v9, %v998_v53  ;;  %v4559_v9 = vpack.c.bf16 %v2651_v28, %v2650_v45  ;;  %v3973_v45 = vsel %vm1134_vm14, 1.0, %v7594_v4 }
 0x153   : > { %vm456_vm4 = vcmp.eq.s32.totalorder %v5011_v58, %v394_v37  ;;  %v857_v36 = vpop.permute.xlu0 %856 }
 0x154   : > { %4712 = vset.pattern.permute.xlu1 %v7592_v23  ;;  %4232 = vmatprep.mubr.f32.mxu0 %v1222_v48  ;;  %v3871_v19 = vsel %vm456_vm4, 1.0, %v7594_v4  ;;  %v3938_v48 = vsel %vm907_vm11, 1.0, %v7594_v4  ;;  %vm909_vm3 = vcmp.eq.s32.totalorder %v5011_v58, %v857_v36 }
 0x155   : > { %647 = vperm.xlu1 %4712, %v4964_v38   ;;  %4233 = vmatmul.mubr.f32.gmra.mrb[14].mxu0 %v1223_v25 }
 0x157   : > { %v618_v47 = vpop.permute.xlu1 %617 }
 0x158   : > { %vm680_vm1 = vcmp.eq.s32.totalorder %v5011_v58, %v618_v47 }
 0x159   : > { %4713 = vset.pattern.permute.xlu1 %v7595_v3  ;;  %v3903_v44 = vsel %vm680_vm1, 1.0, %v7594_v4 }
 0x15a   : > { %426 = vperm.xlu1 %4713, %v4976_v42   ;;  %v776_v22 = vadd.f32 %v3903_v44, %v3871_v19  ;;  %v7599_v44 = vmov 3  }
 0x15c   : > { %v397_v12 = vpop.permute.xlu1 %396 }
 0x15d   : > { %vm457_vm0 = vcmp.eq.s32.totalorder %v5011_v58, %v397_v12 }
 0x15e   : > { %4714 = vset.pattern.permute.xlu1 %v7592_v23  ;;  %v3872_v41 = vsel %vm457_vm0, 1.0, %v7594_v4 }
 0x15f   : > { %650 = vperm.xlu1 %4714, %v4976_v42   ;;  %v4547_v42 = vpack.c.bf16 %v2645_v24, %v2644_v39  ;;  %v3940_v39 = vsel %vm909_vm3, 1.0, %v7594_v4 }
 0x161   : > { %v621_v18 = vpop.permute.xlu1 %620  ;;  %4548 = vmatprep.subr.bf16.mxu1 %v4547_v42 }
 0x162   : > { %vm681_vm2 = vcmp.eq.s32.totalorder %v5011_v58, %v621_v18  ;;  %4550 = vmatpush3.bf16.msra.mxu1 %v4547_v42 }
 0x163   : > { %v3904_v29 = vsel %vm681_vm2, 1.0, %v7594_v4  ;;  %4715 = vset.pattern.permute.xlu1 %v7598_v0  ;;  %4552 = vmatprep.subr.bf16.mxu1 %v4551_v52 }
 0x164   : > { %v777_v26 = vadd.f32 %v3904_v29, %v3872_v41  ;;  %871 = vperm.xlu1 %4715, %v4964_v38  }
 0x166   : > { %v842_v13 = vpop.permute.xlu1 %841  ;;  %v1001_v38 = vadd.f32 %v3936_v49, %v777_v26  ;;  %4554 = vmatpush3.bf16.msra.mxu1 %v4551_v52  ;;  %v3971_v49 = vsel %vm1132_vm5, 1.0, %v7594_v4  ;;  %v863_v52 = vpop.permute.xlu0 %862 }
 0x167   : > { %vm904_vm6 = vcmp.eq.s32.totalorder %v5011_v58, %v842_v13  ;;  %4556 = vmatprep.subr.bf16.mxu1 %v4555_v60  ;;  %vm911_vm11 = vcmp.eq.s32.totalorder %v5011_v58, %v863_v52 }
 0x168   : > { %v3935_v61 = vsel %vm904_vm6, 1.0, %v7594_v4  ;;  %4716 = vset.pattern.permute.xlu1 %v7595_v3  ;;  %v1225_v43 = vadd.f32 %v3968_v34, %v1001_v38  ;;  %v3942_v57 = vsel %vm911_vm11, 1.0, %v7594_v4  ;;  %v7600_v34 = vld [vmem:[#allocation3_spill] sm:$0xff] }
 0x169   : > { %v1000_v14 = vadd.f32 %v3935_v61, %v776_v22  ;;  %429 = vperm.xlu1 %4716, %v4987_v46   ;;  %vm1135_vm15 = vcmp.eq.s32.totalorder %v5011_v58, %v7600_v34 }
 0x16a   : > { %4558 = vmatpush3.bf16.msra.mxu1 %v4555_v60  ;;  %v3974_v28 = vsel %vm1135_vm15, 1.0, %v7594_v4 }
 0x16b   : > { %v400_v6 = vpop.permute.xlu1 %399  ;;  %v1224_v15 = vadd.f32 %v3967_v17, %v1000_v14  ;;  %4560 = vmatprep.subr.bf16.mxu1 %v4559_v9 }
 0x16c   : > { %vm458_vm12 = vcmp.eq.s32.totalorder %v5011_v58, %v400_v6 }
 0x16d   : > { %4717 = vset.pattern.permute.xlu1 %v7592_v23  ;;  %4235 = vmatprep.mubr.f32.mxu0 %v1224_v15  ;;  %v3873_v51 = vsel %vm458_vm12, 1.0, %v7594_v4 }
 0x16e   : > { %653 = vperm.xlu1 %4717, %v4987_v46   ;;  %4236 = vmatmul.mubr.f32.gmra.mrb[16].mxu0 %v1225_v43 }
 0x16f   : > { %4562 = vmatpush3.bf16.msra.mxu1 %v4559_v9 }
 0x170   : > { %v624_v2 = vpop.permute.xlu1 %623 }
 0x171   : > { %vm682_vm9 = vcmp.eq.s32.totalorder %v5011_v58, %v624_v2 }
 0x172   : > { %4718 = vset.pattern.permute.xlu1 %v7595_v3 }
 0x173   : > { %432 = vperm.xlu1 %4718, %v4998_v50  }
 0x175   : > { %v403_v7 = vpop.permute.xlu1 %402 }
 0x176   : > { %vm459_vm8 = vcmp.eq.s32.totalorder %v5011_v58, %v403_v7 }
 0x177   : > { %4719 = vset.pattern.permute.xlu1 %v7592_v23  ;;  %v3874_v54 = vsel %vm459_vm8, 1.0, %v7594_v4 }
 0x178   : > { %656 = vperm.xlu1 %4719, %v4998_v50   ;;  %v3905_v50 = vsel %vm682_vm9, 1.0, %v7594_v4 }
 0x179   : > { %v778_v1 = vadd.f32 %v3905_v50, %v3873_v51 }
 0x17a   : > { %v627_v53 = vpop.permute.xlu1 %626 }
 0x17b   : > { %vm683_vm10 = vcmp.eq.s32.totalorder %v5011_v58, %v627_v53  ;;  %v869_v53 = vpop.permute.xlu0 %868 }
 0x17c   : > { %v3906_v31 = vsel %vm683_vm10, 1.0, %v7594_v4  ;;  %4720 = vset.pattern.permute.xlu1 %v7598_v0  ;;  %vm913_vm3 = vcmp.eq.s32.totalorder %v5011_v58, %v869_v53 }
 0x17d   : > { %v779_v37 = vadd.f32 %v3906_v31, %v3874_v54  ;;  %877 = vperm.xlu1 %4720, %v4987_v46   ;;  %v3944_v51 = vsel %vm913_vm3, 1.0, %v7594_v4 }
 0x17f   : > { %v848_v25 = vpop.permute.xlu1 %847  ;;  %v1003_v11 = vadd.f32 %v3938_v48, %v779_v37 }
 0x180   : > { %vm906_vm13 = vcmp.eq.s32.totalorder %v5011_v58, %v848_v25 }
 0x181   : > { %v3937_v47 = vsel %vm906_vm13, 1.0, %v7594_v4  ;;  %4721 = vset.pattern.permute.xlu1 %v7595_v3  ;;  %v1227_v63 = vadd.f32 %v3970_v32, %v1003_v11 }
 0x182   : > { %v1002_v46 = vadd.f32 %v3937_v47, %v778_v1  ;;  %435 = vperm.xlu1 %4721, %v340_v16   ;;  %v7601_v1 = vld [vmem:[#allocation4_spill] sm:$0xff]  ;;  %v7602_v47 = vld [vmem:[#allocation5_spill] sm:$0xff] }
 0x183   : > { %vm1136_vm5 = vcmp.eq.s32.totalorder %v5011_v58, %v7601_v1  ;;  %vm1137_vm7 = vcmp.eq.s32.totalorder %v5011_v58, %v7602_v47 }
 0x184   : > { %v406_v59 = vpop.permute.xlu1 %405  ;;  %v1226_v12 = vadd.f32 %v3969_v5, %v1002_v46 }
 0x185   : > { %vm460_vm4 = vcmp.eq.s32.totalorder %v5011_v58, %v406_v59  ;;  %v3975_v59 = vsel %vm1136_vm5, 1.0, %v7594_v4 }
 0x186   : > { %4722 = vset.pattern.permute.xlu1 %v7592_v23  ;;  %4238 = vmatprep.mubr.f32.mxu0 %v1226_v12  ;;  %v3875_v24 = vsel %vm460_vm4, 1.0, %v7594_v4  ;;  %v3976_v12 = vsel %vm1137_vm7, 1.0, %v7594_v4 }
 0x187   : > { %659 = vperm.xlu1 %4722, %v340_v16   ;;  %4239 = vmatmul.mubr.f32.gmra.mrb[18].mxu0 %v1227_v63 }
 0x189   : > { %v630_v8 = vpop.permute.xlu1 %629 }
 0x18a   : > { %vm684_vm1 = vcmp.eq.s32.totalorder %v5011_v58, %v630_v8 }
 0x18b   : > { %4723 = vset.pattern.permute.xlu1 %v7595_v3 }
 0x18c   : > { %438 = vperm.xlu1 %4723, %v5129_v56  }
 0x18e   : > { %v409_v27 = vpop.permute.xlu1 %408 }
 0x18f   : > { %vm461_vm0 = vcmp.eq.s32.totalorder %v5011_v58, %v409_v27 }
 0x190   : > { %4724 = vset.pattern.permute.xlu1 %v7592_v23  ;;  %v3876_v3 = vsel %vm461_vm0, 1.0, %v7594_v4  ;;  %v3907_v23 = vsel %vm684_vm1, 1.0, %v7594_v4 }
 0x191   : > { %662 = vperm.xlu1 %4724, %v5129_v56   ;;  %v780_v41 = vadd.f32 %v3907_v23, %v3875_v24 }
 0x193   : > { %v633_v35 = vpop.permute.xlu1 %632 }
 0x194   : > { %vm685_vm2 = vcmp.eq.s32.totalorder %v5011_v58, %v633_v35 }
 0x195   : > { %v3908_v40 = vsel %vm685_vm2, 1.0, %v7594_v4  ;;  %4726 = vset.pattern.permute.xlu1 %v7598_v0 }
 0x196   : > { %v781_v18 = vadd.f32 %v3908_v40, %v3876_v3  ;;  %883 = vperm.xlu1 %4726, %v340_v16   ;;  %v875_v40 = vpop.permute.xlu0 %874 }
 0x198   : > { %v854_v42 = vpop.permute.xlu1 %853  ;;  %v1005_v29 = vadd.f32 %v3940_v39, %v781_v18 }
 0x199   : > { %vm908_vm6 = vcmp.eq.s32.totalorder %v5011_v58, %v854_v42 }
 0x19a   : > { %v3939_v0 = vsel %vm908_vm6, 1.0, %v7594_v4  ;;  %4727 = vset.pattern.permute.xlu1 %v7599_v44  ;;  %v1229_v21 = vadd.f32 %v3972_v62, %v1005_v29  ;;  %v7603_v29 = vld [vmem:[#allocation6_spill] sm:$0xff]  ;;  %v881_v34 = vpop.permute.xlu0 %880 }
 0x19b   : > { %v1004_v26 = vadd.f32 %v3939_v0, %v780_v41  ;;  %1107 = vperm.xlu1 %4727, %v340_v16   ;;  %vm1138_vm14 = vcmp.eq.s32.totalorder %v5011_v58, %v7603_v29 }
 0x19d   : > { %v412_v33 = vpop.permute.xlu1 %411  ;;  %v1228_v19 = vadd.f32 %v3971_v49, %v1004_v26  ;;  %v7604_v26 = vld [vmem:[#allocation7_spill] sm:$0xff] }
 0x19e   : > { %vm462_vm12 = vcmp.eq.s32.totalorder %v5011_v58, %v412_v33  ;;  %vm1139_vm15 = vcmp.eq.s32.totalorder %v5011_v58, %v7604_v26 }
 0x19f   : > { %1110 = vperm.xlu1 %4727, %v5129_v56   ;;  %4241 = vmatprep.mubr.f32.mxu0 %v1228_v19  ;;  %v3877_v55 = vsel %vm462_vm12, 1.0, %v7594_v4  ;;  %vm915_vm12 = vcmp.eq.s32.totalorder %v5011_v58, %v875_v40  ;;  %v3977_v19 = vsel %vm1138_vm14, 1.0, %v7594_v4 }
 0x1a0   : > { %4242 = vmatmul.mubr.f32.gmra.mrb[20].mxu0 %v1229_v21  ;;  %v3946_v44 = vsel %vm915_vm12, 1.0, %v7594_v4  ;;  %v3978_v21 = vsel %vm1139_vm15, 1.0, %v7594_v4 }
 0x1a2   : > { %v636_v13 = vpop.permute.xlu1 %635 }
 0x1a3   : > { %vm686_vm9 = vcmp.eq.s32.totalorder %v5011_v58, %v636_v13 }
 0x1a4   : > { %v3909_v61 = vsel %vm686_vm9, 1.0, %v7594_v4 }
 0x1a5   : > { %v782_v60 = vadd.f32 %v3909_v61, %v3877_v55 }
 0x1a7   : > { %v415_v10 = vpop.permute.xlu1 %414 }
 0x1a8   : > { %vm463_vm8 = vcmp.eq.s32.totalorder %v5011_v58, %v415_v10 }
 0x1a9   : > { %v3878_v38 = vsel %vm463_vm8, 1.0, %v7594_v4 }
 0x1ac   : > { %v639_v22 = vpop.permute.xlu1 %638 }
 0x1ad   : > { %vm687_vm10 = vcmp.eq.s32.totalorder %v5011_v58, %v639_v22 }
 0x1ae   : > { %v3910_v56 = vsel %vm687_vm10, 1.0, %v7594_v4 }
 0x1af   : > { %v783_v14 = vadd.f32 %v3910_v56, %v3878_v38 }
 0x1b1   : > { %v860_v17 = vpop.permute.xlu1 %859  ;;  %v1007_v6 = vadd.f32 %v3942_v57, %v783_v14 }
 0x1b2   : > { %vm910_vm13 = vcmp.eq.s32.totalorder %v5011_v58, %v860_v17 }
 0x1b3   : > { %v3941_v15 = vsel %vm910_vm13, 1.0, %v7594_v4  ;;  %v1231_v7 = vadd.f32 %v3974_v28, %v1007_v6 }
 0x1b4   : > { %v1006_v43 = vadd.f32 %v3941_v15, %v782_v60 }
 0x1b6   : > { %v418_v9 = vpop.permute.xlu1 %417  ;;  %v1230_v2 = vadd.f32 %v3973_v45, %v1006_v43 }
 0x1b7   : > { %vm464_vm4 = vcmp.eq.s32.totalorder %v5011_v58, %v418_v9 }
 0x1b8   : > { %4244 = vmatprep.mubr.f32.mxu0 %v1230_v2  ;;  %v3879_v25 = vsel %vm464_vm4, 1.0, %v7594_v4  ;;  %vm917_vm4 = vcmp.eq.s32.totalorder %v5011_v58, %v881_v34  ;;  %v7611_v2 = vld [vmem:[#allocation8_spill] sm:$0xff] }
 0x1b9   : > { %4245 = vmatmul.mubr.f32.gmra.mrb[22].mxu0 %v1231_v7  ;;  %vm1140_vm5 = vcmp.eq.s32.totalorder %v5011_v58, %v7611_v2  ;;  %v3948_v53 = vsel %vm917_vm4, 1.0, %v7594_v4  ;;  %v2916_v2 = vld [vmem:[%s7505_s4] sm:$0xff] }
 0x1ba   : > { %v3979_v1 = vsel %vm1140_vm5, 1.0, %v7594_v4 }
 0x1bb   : > { %v642_v20 = vpop.permute.xlu1 %641 }
 0x1bc   : > { %vm688_vm1 = vcmp.eq.s32.totalorder %v5011_v58, %v642_v20 }
 0x1bd   : > { %v3911_v37 = vsel %vm688_vm1, 1.0, %v7594_v4 }
 0x1be   : > { %v784_v11 = vadd.f32 %v3911_v37, %v3879_v25  ;;  %v7613_v37 = vld [vmem:[#allocation9_spill] sm:$0xff] }
 0x1bf   : > { %vm1141_vm7 = vcmp.eq.s32.totalorder %v5011_v58, %v7613_v37  ;;  %v2919_v37 = vld [vmem:[%s7505_s4 + $0x18] sm:$0xff] }
 0x1c0   : > { %v421_v30 = vpop.permute.xlu1 %420 }
 0x1c1   : > { %vm465_vm0 = vcmp.eq.s32.totalorder %v5011_v58, %v421_v30 }
 0x1c2   : > { %v3880_v31 = vsel %vm465_vm0, 1.0, %v7594_v4 }
 0x1c5   : > { %v645_v54 = vpop.permute.xlu1 %644 }
 0x1c6   : > { %vm689_vm2 = vcmp.eq.s32.totalorder %v5011_v58, %v645_v54 }
 0x1c7   : > { %v3912_v50 = vsel %vm689_vm2, 1.0, %v7594_v4 }
 0x1c8   : > { %v785_v48 = vadd.f32 %v3912_v50, %v3880_v31 }
 0x1ca   : > { %v866_v16 = vpop.permute.xlu1 %865  ;;  %v1009_v46 = vadd.f32 %v3944_v51, %v785_v48 }
 0x1cb   : > { %vm912_vm6 = vcmp.eq.s32.totalorder %v5011_v58, %v866_v16 }
 0x1cc   : > { %v3943_v5 = vsel %vm912_vm6, 1.0, %v7594_v4  ;;  %v1233_v27 = vadd.f32 %v3976_v12, %v1009_v46 }
 0x1cd   : > { %v1008_v32 = vadd.f32 %v3943_v5, %v784_v11  ;;  %v3980_v11 = vsel %vm1141_vm7, 1.0, %v7594_v4 }
 0x1cf   : > { %v424_v63 = vpop.permute.xlu1 %423  ;;  %v1232_v8 = vadd.f32 %v3975_v59, %v1008_v32 }
 0x1d0   : > { %vm466_vm11 = vcmp.eq.s32.totalorder %v5011_v58, %v424_v63 }
 0x1d1   : > { %4247 = vmatprep.mubr.f32.mxu0 %v1232_v8  ;;  %v3881_v42 = vsel %vm466_vm11, 1.0, %v7594_v4 }
 0x1d2   : > { %4248 = vmatmul.mubr.f32.gmra.mrb[24].mxu0 %v1233_v27 }
 0x1d4   : > { %v648_v36 = vpop.permute.xlu1 %647 }
 0x1d5   : > { %vm690_vm9 = vcmp.eq.s32.totalorder %v5011_v58, %v648_v36 }
 0x1d6   : > { %v3913_v39 = vsel %vm690_vm9, 1.0, %v7594_v4 }
 0x1d7   : > { %v786_v0 = vadd.f32 %v3913_v39, %v3881_v42 }
 0x1d9   : > { %v427_v35 = vpop.permute.xlu1 %426 }
 0x1da   : > { %vm467_vm8 = vcmp.eq.s32.totalorder %v5011_v58, %v427_v35 }
 0x1db   : > { %v3882_v23 = vsel %vm467_vm8, 1.0, %v7594_v4 }
 0x1de   : > { %v651_v3 = vpop.permute.xlu1 %650 }
 0x1df   : > { %vm691_vm10 = vcmp.eq.s32.totalorder %v5011_v58, %v651_v3 }
 0x1e0   : > { %v3914_v18 = vsel %vm691_vm10, 1.0, %v7594_v4 }
 0x1e1   : > { %v787_v24 = vadd.f32 %v3914_v18, %v3882_v23 }
 0x1e3   : > { %v872_v41 = vpop.permute.xlu1 %871  ;;  %v1011_v49 = vadd.f32 %v3946_v44, %v787_v24 }
 0x1e4   : > { %vm914_vm13 = vcmp.eq.s32.totalorder %v5011_v58, %v872_v41 }
 0x1e5   : > { %v3945_v62 = vsel %vm914_vm13, 1.0, %v7594_v4  ;;  %v1235_v52 = vadd.f32 %v3978_v21, %v1011_v49 }
 0x1e6   : > { %v1010_v33 = vadd.f32 %v3945_v62, %v786_v0  ;;  %v887_v0 = vpop.permute.xlu0 %886 }
 0x1e7   : > { %vm919_vm14 = vcmp.eq.s32.totalorder %v5011_v58, %v887_v0  ;;  %v2927_v0 = vld [vmem:[%s7505_s4 + $0x58] sm:$0xff] }
 0x1e8   : > { %v430_v13 = vpop.permute.xlu1 %429  ;;  %v1234_v10 = vadd.f32 %v3977_v19, %v1010_v33 }
 0x1e9   : > { %vm468_vm3 = vcmp.eq.s32.totalorder %v5011_v58, %v430_v13 }
 0x1ea   : > { %4250 = vmatprep.mubr.f32.mxu0 %v1234_v10  ;;  %v3883_v7 = vsel %vm468_vm3, 1.0, %v7594_v4 }
 0x1eb   : > { %4251 = vmatmul.mubr.f32.gmra.mrb[26].mxu0 %v1235_v52 }
 0x1ed   : > { %v654_v22 = vpop.permute.xlu1 %653 }
 0x1ee   : > { %vm692_vm1 = vcmp.eq.s32.totalorder %v5011_v58, %v654_v22 }
 0x1ef   : > { %v3915_v45 = vsel %vm692_vm1, 1.0, %v7594_v4  ;;  %vm3757_vm1 = vcmask 7168  }
 0x1f0   : > { %v788_v54 = vadd.f32 %v3915_v45, %v3883_v7  ;;  %v2917_v7 = vld [vmem:[%s7505_s4 + $0x8] sm:$0xff] }
 0x1f1   : > { %v5613_v38 = vpop.f32.mrb[0].mxu0 }
 0x1f2   : > { %7605 = vst [vmem:[#allocation3_spill] sm:$0xff] %v5613_v38  ;;  %v433_v56 = vpop.permute.xlu1 %432  ;;  %1645 = vrot.lane.b32.xlu1 %v5613_v38, %s4743_s12  ;;  %v5617_v61 = vpop.f32.mrb[1].mxu0  ;;  %v5625_v14 = vmul.f32 %v5613_v38, %v5613_v38 }
 0x1f3   : > { %7606 = vst [vmem:[#allocation4_spill] sm:$0xff] %v5617_v61  ;;  %1643 = vrot.lane.b32.xlu0 %v5617_v61, %s4743_s12  ;;  %4291 = vmatprep.mubr.f32.mxu1 %v5617_v61  ;;  %v5631_v55 = vmul.f32 %v5617_v61, %v5617_v61  ;;  %vm469_vm0 = vcmp.eq.s32.totalorder %v5011_v58, %v433_v56 }
 0x1f4   : > { %4292 = vmatmul.mubr.f32.vlgmr.msra.gmra.mrb[0].mxu1 %v5613_v38  ;;  %v3884_v6 = vsel %vm469_vm0, 1.0, %v7594_v4  ;;  %vm2507_vm0 = vcmask 64512  }
 0x1f5   : > { %v5627_v57 = vpop.f32.mrb[2].mxu0 }
 0x1f6   : > { %7607 = vst [vmem:[#allocation5_spill] sm:$0xff] %v5627_v57  ;;  %1805 = vrot.lane.b32.xlu1 %v5625_v14, %s4743_s12  ;;  %v5636_v17 = vpop.f32.mrb[3].mxu0  ;;  %v5664_v30 = vmul.f32 %v5627_v57, %v5627_v57 }
 0x1f7   : > { %7608 = vst [vmem:[#allocation6_spill] sm:$0xff] %v5636_v17  ;;  %v657_v60 = vpop.permute.xlu1 %656  ;;  %1803 = vrot.lane.b32.xlu0 %v5631_v55, %s4743_s12  ;;  %4294 = vmatprep.mubr.f32.mxu1 %v5636_v17  ;;  %v5672_v50 = vmul.f32 %v5636_v17, %v5636_v17 }
 0x1f8   : > { %vm693_vm2 = vcmp.eq.s32.totalorder %v5011_v58, %v657_v60  ;;  %4295 = vmatmul.mubr.f32.gmra.mrb[2].mxu1 %v5627_v57  ;;  %v3950_v60 = vsel %vm919_vm14, 1.0, %v7594_v4 }
 0x1f9   : > { %v3916_v15 = vsel %vm693_vm2, 1.0, %v7594_v4  ;;  %v5647_v43 = vpop.f32.mrb[4].mxu0 }
 0x1fa   : > { %7609 = vst [vmem:[#allocation7_spill] sm:$0xff] %v5647_v43  ;;  %v789_v28 = vadd.f32 %v3916_v15, %v3884_v6  ;;  %1649 = vrot.lane.b32.xlu1 %v5627_v57, %s4743_s12  ;;  %v5653_v9 = vpop.f32.mrb[5].mxu0  ;;  %v5701_v12 = vmul.f32 %v5647_v43, %v5647_v43 }
 0x1fb   : > { %7610 = vst [vmem:[#allocation10_spill] sm:$0xff] %v5653_v9  ;;  %1647 = vrot.lane.b32.xlu0 %v5636_v17, %s4743_s12  ;;  %4297 = vmatprep.mubr.f32.mxu1 %v5653_v9  ;;  %v5708_v8 = vmul.f32 %v5653_v9, %v5653_v9 }
 0x1fc   : > { %v878_v20 = vpop.permute.xlu1 %877  ;;  %4298 = vmatmul.mubr.f32.gmra.mrb[4].mxu1 %v5647_v43  ;;  %v1013_v48 = vadd.f32 %v3948_v53, %v789_v28 }
 0x1fd   : > { %vm916_vm6 = vcmp.eq.s32.totalorder %v5011_v58, %v878_v20  ;;  %v5668_v31 = vpop.f32.mrb[6].mxu0  ;;  %v2918_v20 = vld [vmem:[%s7505_s4 + $0x10] sm:$0xff] }
 0x1fe   : > { %7612 = vst [vmem:[#allocation8_spill] sm:$0xff] %v5668_v31  ;;  %v3947_v51 = vsel %vm916_vm6, 1.0, %v7594_v4  ;;  %1809 = vrot.lane.b32.xlu1 %v5664_v30, %s4743_s12  ;;  %v5679_v25 = vpop.f32.mrb[7].mxu0  ;;  %v1237_v59 = vadd.f32 %v3980_v11, %v1013_v48  ;;  %v5724_v3 = vmul.f32 %v5668_v31, %v5668_v31  ;;  %v4567_v48 = vpack.c.bf16 %v2919_v37, %v2918_v20  ;;  %v2921_v11 = vld [vmem:[%s7505_s4 + $0x28] sm:$0xff] }
 0x1ff   : > { %7614 = vst [vmem:[#allocation9_spill] sm:$0xff] %v5679_v25  ;;  %v1012_v16 = vadd.f32 %v3947_v51, %v788_v54  ;;  %1807 = vrot.lane.b32.xlu0 %v5672_v50, %s4743_s12  ;;  %4300 = vmatprep.mubr.f32.mxu1 %v5679_v25  ;;  %v5728_v40 = vmul.f32 %v5679_v25, %v5679_v25 }
 0x200   : > { %4301 = vmatmul.mubr.f32.gmra.mrb[6].mxu1 %v5668_v31  ;;  %v4563_v54 = vpack.c.bf16 %v2917_v7, %v2916_v2 }
 0x201   : > { %v436_v47 = vpop.permute.xlu1 %435  ;;  %v5690_v46 = vpop.f32.mrb[8].mxu0  ;;  %v1236_v5 = vadd.f32 %v3979_v1, %v1012_v16  ;;  %v2920_v1 = vld [vmem:[%s7505_s4 + $0x20] sm:$0xff] }
 0x202   : > { %7615 = vst [vmem:[#allocation11_spill] sm:$0xff] %v5690_v46  ;;  %1653 = vrot.lane.b32.xlu1 %v5647_v43, %s4743_s12  ;;  %v5694_v32 = vpop.f32.mrb[9].mxu0  ;;  %v5747_v24 = vmul.f32 %v5690_v46, %v5690_v46  ;;  %vm470_vm9 = vcmp.eq.s32.totalorder %v5011_v58, %v436_v47  ;;  %4564 = vmatprep.subr.bf16.mxu0 %v4563_v54 }
 0x203   : > { %7616 = vst [vmem:[#allocation12_spill] sm:$0xff] %v5694_v32  ;;  %1651 = vrot.lane.b32.xlu0 %v5653_v9, %s4743_s12  ;;  %4253 = vmatprep.mubr.f32.mxu0 %v1236_v5  ;;  %v5753_v41 = vmul.f32 %v5694_v32, %v5694_v32  ;;  %v3885_v44 = vsel %vm470_vm9, 1.0, %v7594_v4  ;;  %v4571_v47 = vpack.c.bf16 %v2921_v11, %v2920_v1  ;;  %v2922_v5 = vld [vmem:[%s7505_s4 + $0x30] sm:$0xff]  ;;  %v5949_v1 = vld [vmem:[%s7504_s3] ss:$0 sm:$0xff] }
 0x204   : > { %4303 = vmatprep.mubr.f32.mxu1 %v5694_v32  ;;  %4254 = vmatmul.mubr.f32.gmra.mrb[28].mxu0 %v1237_v59  ;;  %v2923_v59 = vld [vmem:[%s7505_s4 + $0x38] sm:$0xff] }
 0x205   : > { %4304 = vmatmul.mubr.f32.gmra.mrb[8].mxu1 %v5690_v46  ;;  %v5704_v63 = vpop.f32.mrb[10].mxu0  ;;  %4566 = vmatpush3.bf16.msra.mxu0 %v4563_v54 }
 0x206   : > { %7617 = vst [vmem:[#allocation13_spill] sm:$0xff] %v5704_v63  ;;  %v660_v27 = vpop.permute.xlu1 %659  ;;  %1813 = vrot.lane.b32.xlu1 %v5701_v12, %s4743_s12  ;;  %v5712_v36 = vpop.f32.mrb[11].mxu0  ;;  %v5775_v52 = vmul.f32 %v5704_v63, %v5704_v63  ;;  %4568 = vmatprep.subr.bf16.mxu0 %v4567_v48 }
 0x207   : > { %7618 = vst [vmem:[#allocation14_spill] sm:$0xff] %v5712_v36  ;;  %1811 = vrot.lane.b32.xlu0 %v5708_v8, %s4743_s12  ;;  %4306 = vmatprep.mubr.f32.mxu1 %v5712_v36  ;;  %vm694_vm8 = vcmp.eq.s32.totalorder %v5011_v58, %v660_v27  ;;  %v5779_v56 = vmul.f32 %v5712_v36, %v5712_v36 }
 0x208   : > { %v3917_v29 = vsel %vm694_vm8, 1.0, %v7594_v4  ;;  %v4575_v27 = vpack.c.bf16 %v2923_v59, %v2922_v5 }
 0x209   : > { %4307 = vmatmul.mubr.f32.gmra.mrb[10].mxu1 %v5704_v63  ;;  %v790_v62 = vadd.f32 %v3917_v29, %v3885_v44  ;;  %4570 = vmatpush3.bf16.msra.mxu0 %v4567_v48  ;;  %v2926_v29 = vld [vmem:[%s7505_s4 + $0x50] sm:$0xff] }
 0x20a   : > { %1657 = vrot.lane.b32.xlu1 %v5668_v31, %s4743_s12  ;;  %4572 = vmatprep.subr.bf16.mxu0 %v4571_v47 }
 0x20b   : > { %v439_v35 = vpop.permute.xlu1 %438  ;;  %1655 = vrot.lane.b32.xlu0 %v5679_v25, %s4743_s12 }
 0x20c   : > { %vm471_vm12 = vcmp.eq.s32.totalorder %v5011_v58, %v439_v35  ;;  %v2924_v35 = vld [vmem:[%s7505_s4 + $0x40] sm:$0xff] }
 0x20d   : > { %v3886_v33 = vsel %vm471_vm12, 1.0, %v7594_v4  ;;  %4574 = vmatpush3.bf16.msra.mxu0 %v4571_v47 }
 0x20e   : > { %1817 = vrot.lane.b32.xlu1 %v5724_v3, %s4743_s12  ;;  %4576 = vmatprep.subr.bf16.mxu0 %v4575_v27 }
 0x20f   : > { %1815 = vrot.lane.b32.xlu0 %v5728_v40, %s4743_s12  ;;  %v5734_v23 = vpop.f32.mrb[12].mxu0 }
 0x210   : > { %7619 = vst [vmem:[#allocation15_spill] sm:$0xff] %v5734_v23  ;;  %v663_v18 = vpop.permute.xlu1 %662  ;;  %v5736_v39 = vpop.f32.mrb[13].mxu0  ;;  %v5794_v28 = vmul.f32 %v5734_v23, %v5734_v23 }
 0x211   : > { %7620 = vst [vmem:[#allocation16_spill] sm:$0xff] %v5736_v39  ;;  %4309 = vmatprep.mubr.f32.mxu1 %v5736_v39  ;;  %vm695_vm10 = vcmp.eq.s32.totalorder %v5011_v58, %v663_v18  ;;  %4578 = vmatpush3.bf16.msra.mxu0 %v4575_v27  ;;  %v2925_v18 = vld [vmem:[%s7505_s4 + $0x48] sm:$0xff] }
 0x212   : > { %1661 = vrot.lane.b32.xlu1 %v5690_v46, %s4743_s12  ;;  %4310 = vmatmul.mubr.f32.gmra.mrb[12].mxu1 %v5734_v23  ;;  %v3918_v26 = vsel %vm695_vm10, 1.0, %v7594_v4 }
 0x213   : > { %1659 = vrot.lane.b32.xlu0 %v5694_v32, %s4743_s12  ;;  %v791_v21 = vadd.f32 %v3918_v26, %v3886_v33  ;;  %v4583_v26 = vpack.c.bf16 %v2927_v0, %v2926_v29 }
 0x215   : > { %v884_v42 = vpop.permute.xlu1 %883  ;;  %v1015_v6 = vadd.f32 %v3950_v60, %v791_v21 }
 0x216   : > { %vm918_vm11 = vcmp.eq.s32.totalorder %v5011_v58, %v884_v42  ;;  %1821 = vrot.lane.b32.xlu1 %v5747_v24, %s4743_s12  ;;  %v4579_v42 = vpack.c.bf16 %v2925_v18, %v2924_v35 }
 0x217   : > { %1819 = vrot.lane.b32.xlu0 %v5753_v41, %s4743_s12  ;;  %v3949_v49 = vsel %vm918_vm11, 1.0, %v7594_v4 }
 0x218   : > { %v1014_v13 = vadd.f32 %v3949_v49, %v790_v62  ;;  %4580 = vmatprep.subr.bf16.mxu0 %v4579_v42  ;;  %v2928_v49 = vld [vmem:[%s7505_s4 + $0x60] sm:$0xff]  ;;  %v2929_v62 = vld [vmem:[%s7505_s4 + $0x68] sm:$0xff] }
 0x219   : > { %4582 = vmatpush3.bf16.msra.mxu0 %v4579_v42 }
 0x21a   : > { %v1108_v19 = vpop.permute.xlu1 %1107  ;;  %1665 = vrot.lane.b32.xlu1 %v5704_v63, %s4743_s12  ;;  %4584 = vmatprep.subr.bf16.mxu0 %v4583_v26 }
 0x21b   : > { %vm1142_vm13 = vcmp.eq.s32.totalorder %v5011_v58, %v1108_v19  ;;  %1663 = vrot.lane.b32.xlu0 %v5712_v36, %s4743_s12  ;;  %v4587_v19 = vpack.c.bf16 %v2929_v62, %v2928_v49 }
 0x21c   : > { %v3981_v10 = vsel %vm1142_vm13, 1.0, %v7594_v4 }
 0x21d   : > { %v1238_v22 = vadd.f32 %v3981_v10, %v1014_v13  ;;  %4586 = vmatpush3.bf16.msra.mxu0 %v4583_v26  ;;  %v2930_v10 = vld [vmem:[%s7505_s4 + $0x70] sm:$0xff] }
 0x21e   : > { %v1111_v34 = vpop.permute.xlu1 %1110  ;;  %1825 = vrot.lane.b32.xlu1 %v5775_v52, %s4743_s12  ;;  %4588 = vmatprep.subr.bf16.mxu0 %v4587_v19 }
 0x21f   : > { %vm1143_vm15 = vcmp.eq.s32.totalorder %v5011_v58, %v1111_v34  ;;  %1823 = vrot.lane.b32.xlu0 %v5779_v56, %s4743_s12  ;;  %4256 = vmatprep.mubr.f32.mxu0 %v1238_v22  ;;  %v5798_v58 = vmul.f32 %v5736_v39, %v5736_v39  ;;  %v2931_v22 = vld [vmem:[%s7505_s4 + $0x78] sm:$0xff] }
 0x220   : > { %v3982_v15 = vsel %vm1143_vm15, 1.0, %v7594_v4  ;;  %v4591_v60 = vpack.c.bf16 %v2931_v22, %v2930_v10 }
 0x221   : > { %v1239_v45 = vadd.f32 %v3982_v15, %v1015_v6  ;;  %4590 = vmatpush3.bf16.msra.mxu0 %v4587_v19 }
 0x222   : > { %1669 = vrot.lane.b32.xlu1 %v5734_v23, %s4743_s12  ;;  %4592 = vmatprep.subr.bf16.mxu0 %v4591_v60 }
 0x223   : > { %1667 = vrot.lane.b32.xlu0 %v5736_v39, %s4743_s12  ;;  %4257 = vmatmul.mubr.f32.gmra.mrb[30].mxu0 %v1239_v45 }
 0x225   : > { %4594 = vmatpush3.bf16.msra.mxu0 %v4591_v60 }
 0x226   : > { %1829 = vrot.lane.b32.xlu1 %v5794_v28, %s4743_s12 }
 0x227   : > { %1827 = vrot.lane.b32.xlu0 %v5798_v58, %s4743_s12 }
 0x228   : > { %v5804_v4 = vpop.f32.mrb[14].mxu0 }
 0x229   : > { %7621 = vst [vmem:[#allocation17_spill] sm:$0xff] %v5804_v4  ;;  %v5815_v53 = vpop.f32.mrb[15].mxu0  ;;  %v5828_v51 = vmul.f32 %v5804_v4, %v5804_v4 }
 0x22a   : > { %7622 = vst [vmem:[#allocation18_spill] sm:$0xff] %v5815_v53  ;;  %1673 = vrot.lane.b32.xlu1 %v5804_v4, %s4743_s12  ;;  %4312 = vmatprep.mubr.f32.mxu1 %v5815_v53  ;;  %v5832_v16 = vmul.f32 %v5815_v53, %v5815_v53 }
 0x22b   : > { %1671 = vrot.lane.b32.xlu0 %v5815_v53, %s4743_s12  ;;  %4313 = vmatmul.mubr.f32.gmra.mrb[14].mxu1 %v5804_v4 }
 0x22e   : > { %1833 = vrot.lane.b32.xlu1 %v5828_v51, %s4743_s12 }
 0x22f   : > { %1831 = vrot.lane.b32.xlu0 %v5832_v16, %s4743_s12 }
 0x241   : > { %v5862_v44 = vpop.f32.mrb[16].mxu0 }
 0x242   : > { %7623 = vst [vmem:[#allocation19_spill] sm:$0xff] %v5862_v44  ;;  %1677 = vrot.lane.b32.xlu1 %v5862_v44, %s4743_s12  ;;  %v5872_v33 = vpop.f32.mrb[17].mxu0  ;;  %v5880_v21 = vmul.f32 %v5862_v44, %v5862_v44 }
 0x243   : > { %7624 = vst [vmem:[#allocation20_spill] sm:$0xff] %v5872_v33  ;;  %1675 = vrot.lane.b32.xlu0 %v5872_v33, %s4743_s12  ;;  %4315 = vmatprep.mubr.f32.mxu1 %v5872_v33  ;;  %v5884_v13 = vmul.f32 %v5872_v33, %v5872_v33 }
 0x244   : > { %4316 = vmatmul.mubr.f32.gmra.mrb[16].mxu1 %v5862_v44 }
 0x246   : > { %1837 = vrot.lane.b32.xlu1 %v5880_v21, %s4743_s12 }
 0x247   : > { %1835 = vrot.lane.b32.xlu0 %v5884_v13, %s4743_s12 }
 0x25a   : > { %v5896_v34 = vpop.f32.mrb[18].mxu0 }
 0x25b   : > { %7625 = vst [vmem:[#allocation21_spill] sm:$0xff] %v5896_v34  ;;  %1681 = vrot.lane.b32.xlu1 %v5896_v34, %s4743_s12  ;;  %v5900_v6 = vpop.f32.mrb[19].mxu0 }
 0x25c   : > { %7626 = vst [vmem:[#allocation22_spill] sm:$0xff] %v5900_v6  ;;  %1679 = vrot.lane.b32.xlu0 %v5900_v6, %s4743_s12  ;;  %4318 = vmatprep.mubr.f32.mxu1 %v5900_v6 }
 0x25d   : > { %4319 = vmatmul.mubr.f32.gmra.mrb[18].mxu1 %v5896_v34 }
 0x273   : > { %v5906_v15 = vpop.f32.mrb[20].mxu0 }
 0x274   : > { %7627 = vst [vmem:[#allocation23_spill] sm:$0xff] %v5906_v15  ;;  %1685 = vrot.lane.b32.xlu1 %v5906_v15, %s4743_s12  ;;  %v5910_v45 = vpop.f32.mrb[21].mxu0 }
 0x275   : > { %7628 = vst [vmem:[#allocation24_spill] sm:$0xff] %v5910_v45  ;;  %1683 = vrot.lane.b32.xlu0 %v5910_v45, %s4743_s12  ;;  %4321 = vmatprep.mubr.f32.mxu1 %v5910_v45 }
 0x276   : > { %4322 = vmatmul.mubr.f32.gmra.mrb[20].mxu1 %v5906_v15 }
 0x28c   : > { %v5916_v2 = vpop.f32.mrb[22].mxu0 }
 0x28d   : > { %7629 = vst [vmem:[#allocation25_spill] sm:$0xff] %v5916_v2  ;;  %1689 = vrot.lane.b32.xlu1 %v5916_v2, %s4743_s12  ;;  %v5920_v7 = vpop.f32.mrb[23].mxu0 }
 0x28e   : > { %7630 = vst [vmem:[#allocation26_spill] sm:$0xff] %v5920_v7  ;;  %1687 = vrot.lane.b32.xlu0 %v5920_v7, %s4743_s12  ;;  %4324 = vmatprep.mubr.f32.mxu1 %v5920_v7 }
 0x28f   : > { %4325 = vmatmul.mubr.f32.gmra.mrb[22].mxu1 %v5916_v2 }
 0x2a5   : > { %v5926_v20 = vpop.f32.mrb[24].mxu0 }
 0x2a6   : > { %7631 = vst [vmem:[#allocation27_spill] sm:$0xff] %v5926_v20  ;;  %1693 = vrot.lane.b32.xlu1 %v5926_v20, %s4743_s12  ;;  %v5930_v54 = vpop.f32.mrb[25].mxu0 }
 0x2a7   : > { %7632 = vst [vmem:[#allocation28_spill] sm:$0xff] %v5930_v54  ;;  %1691 = vrot.lane.b32.xlu0 %v5930_v54, %s4743_s12  ;;  %4327 = vmatprep.mubr.f32.mxu1 %v5930_v54 }
 0x2a8   : > { %4328 = vmatmul.mubr.f32.gmra.mrb[24].mxu1 %v5926_v20 }
 0x2be   : > { %v5936_v37 = vpop.f32.mrb[26].mxu0 }
 0x2bf   : > { %7633 = vst [vmem:[#allocation29_spill] sm:$0xff] %v5936_v37  ;;  %1697 = vrot.lane.b32.xlu1 %v5936_v37, %s4743_s12  ;;  %v5940_v48 = vpop.f32.mrb[27].mxu0 }
 0x2c0   : > { %7634 = vst [vmem:[#allocation30_spill] sm:$0xff] %v5940_v48  ;;  %1695 = vrot.lane.b32.xlu0 %v5940_v48, %s4743_s12  ;;  %4330 = vmatprep.mubr.f32.mxu1 %v5940_v48 }
 0x2c1   : > { %4331 = vmatmul.mubr.f32.gmra.mrb[26].mxu1 %v5936_v37 }
 0x2c7   : > { %v4293_v11 = vpop.f32.mrb[0].mxu1 }
 0x2c8   : > { %v2731_v47 = vadd.f32 %v4293_v11, %v5949_v1  ;;  %v2725_v5 = vpop.f32.mrb[1].mxu1 }
 0x2c9   : > { %v2726_v59 = vadd.f32 %v5949_v1, %v2725_v5 }
 0x2ca   : > { %v2885_v18 = vmax.f32 %v2731_v47, 0.0 }
 0x2cb   : > { %v2884_v27 = vmax.f32 %v2726_v59, 0.0  ;;  %v4296_v35 = vpop.f32.mrb[2].mxu1 }
 0x2cc   : > { %v2741_v42 = vadd.f32 %v4296_v35, %v5949_v1  ;;  %v2735_v29 = vpop.f32.mrb[3].mxu1 }
 0x2cd   : > { %v2736_v0 = vadd.f32 %v5949_v1, %v2735_v29  ;;  %4371 = vmatprep.mubr.f32.mxu0 %v2884_v27 }
 0x2ce   : > { %4372 = vmatmul.mubr.f32.vlgmr.msra.gmra.mrb[32].mxu0 %v2885_v18  ;;  %v2887_v62 = vmax.f32 %v2741_v42, 0.0 }
 0x2cf   : > { %v2886_v26 = vmax.f32 %v2736_v0, 0.0  ;;  %v4299_v49 = vpop.f32.mrb[4].mxu1 }
 0x2d0   : > { %v2751_v19 = vadd.f32 %v4299_v49, %v5949_v1  ;;  %v2745_v10 = vpop.f32.mrb[5].mxu1 }
 0x2d1   : > { %v2746_v22 = vadd.f32 %v5949_v1, %v2745_v10  ;;  %4374 = vmatprep.mubr.f32.mxu0 %v2886_v26 }
 0x2d2   : > { %4375 = vmatmul.mubr.f32.gmra.mrb[34].mxu0 %v2887_v62  ;;  %v2889_v47 = vmax.f32 %v2751_v19, 0.0 }
 0x2d3   : > { %v2888_v60 = vmax.f32 %v2746_v22, 0.0  ;;  %v4302_v11 = vpop.f32.mrb[6].mxu1 }
 0x2d4   : > { %v2755_v5 = vpop.f32.mrb[7].mxu1  ;;  %v2761_v59 = vadd.f32 %v4302_v11, %v5949_v1 }
 0x2d5   : > { %v2756_v35 = vadd.f32 %v5949_v1, %v2755_v5  ;;  %4377 = vmatprep.mubr.f32.mxu0 %v2888_v60 }
 0x2d6   : > { %4378 = vmatmul.mubr.f32.gmra.mrb[36].mxu0 %v2889_v47  ;;  %v2891_v0 = vmax.f32 %v2761_v59, 0.0 }
 0x2d7   : > { %v2890_v27 = vmax.f32 %v2756_v35, 0.0  ;;  %v5959_v18 = vpop.f32.mrb[28].mxu0 }
 0x2d8   : > { %7635 = vst [vmem:[#allocation31_spill] sm:$0xff] %v5959_v18  ;;  %v4305_v42 = vpop.f32.mrb[8].mxu1  ;;  %1701 = vrot.lane.b32.xlu1 %v5959_v18, %s4743_s12  ;;  %v5963_v29 = vpop.f32.mrb[29].mxu0 }
 0x2d9   : > { %7636 = vst [vmem:[#allocation32_spill] sm:$0xff] %v5963_v29  ;;  %v2771_v26 = vadd.f32 %v4305_v42, %v5949_v1  ;;  %v2765_v49 = vpop.f32.mrb[9].mxu1  ;;  %1699 = vrot.lane.b32.xlu0 %v5963_v29, %s4743_s12  ;;  %4333 = vmatprep.mubr.f32.mxu1 %v5963_v29 }
 0x2da   : > { %v2766_v62 = vadd.f32 %v5949_v1, %v2765_v49  ;;  %4380 = vmatprep.mubr.f32.mxu0 %v2890_v27  ;;  %4334 = vmatmul.mubr.f32.gmra.mrb[28].mxu1 %v5959_v18  ;;  %v5975_v49 = vpop.permute.xlu1 %1645 }
 0x2db   : > { %4381 = vmatmul.mubr.f32.gmra.mrb[38].mxu0 %v2891_v0  ;;  %v2893_v22 = vmax.f32 %v2771_v26, 0.0  ;;  %7637 = vst [vmem:[#allocation33_spill] sm:$0xff] %v5975_v49 }
 0x2dc   : > { %v2892_v19 = vmax.f32 %v2766_v62, 0.0  ;;  %v4308_v10 = vpop.f32.mrb[10].mxu1  ;;  %v5977_v62 = vpop.permute.xlu0 %1643 }
 0x2dd   : > { %v2781_v60 = vadd.f32 %v4308_v10, %v5949_v1  ;;  %v2775_v11 = vpop.f32.mrb[11].mxu1  ;;  %7638 = vst [vmem:[#allocation34_spill] sm:$0xff] %v5977_v62 }
 0x2de   : > { %v2776_v47 = vadd.f32 %v5949_v1, %v2775_v11  ;;  %4383 = vmatprep.mubr.f32.mxu0 %v2892_v19  ;;  %v5979_v19 = vpop.permute.xlu1 %1805 }
 0x2df   : > { %4384 = vmatmul.mubr.f32.gmra.mrb[40].mxu0 %v2893_v22  ;;  %v2895_v59 = vmax.f32 %v2781_v60, 0.0  ;;  %7639 = vst [vmem:[#allocation35_spill] sm:$0xff] %v5979_v19 }
 0x2e0   : > { %v2894_v5 = vmax.f32 %v2776_v47, 0.0  ;;  %v5981_v22 = vpop.permute.xlu0 %1803 }
 0x2e1   : > { %7640 = vst [vmem:[#allocation36_spill] sm:$0xff] %v5981_v22  ;;  %v6031_v22 = vmul.f32 %v5916_v2, %v5916_v2 }
 0x2e2   : > { %4386 = vmatprep.mubr.f32.mxu0 %v2894_v5  ;;  %v5983_v60 = vpop.permute.xlu1 %1649 }
 0x2e3   : > { %4387 = vmatmul.mubr.f32.gmra.mrb[42].mxu0 %v2895_v59  ;;  %7641 = vst [vmem:[#allocation37_spill] sm:$0xff] %v5983_v60  ;;  %v5999_v59 = vmul.f32 %v5896_v34, %v5896_v34  ;;  %7650 = vst [vmem:[#allocation46_spill] sm:$0xff] %v6031_v22 }
 0x2e4   : > { %v5985_v11 = vpop.permute.xlu0 %1647 }
 0x2e5   : > { %v4311_v35 = vpop.f32.mrb[12].mxu1  ;;  %7642 = vst [vmem:[#allocation38_spill] sm:$0xff] %v5985_v11 }
 0x2e6   : > { %v2791_v27 = vadd.f32 %v4311_v35, %v5949_v1  ;;  %v2785_v42 = vpop.f32.mrb[13].mxu1  ;;  %v6003_v35 = vmul.f32 %v5900_v6, %v5900_v6 }
 0x2e7   : > { %v2786_v0 = vadd.f32 %v5949_v1, %v2785_v42 }
 0x2e8   : > { %v2897_v10 = vmax.f32 %v2791_v27, 0.0  ;;  %v6005_v27 = vpop.permute.xlu1 %1809  ;;  %v6009_v42 = vpop.permute.xlu0 %1807 }
 0x2e9   : > { %v2896_v26 = vmax.f32 %v2786_v0, 0.0  ;;  %7645 = vst [vmem:[#allocation41_spill] sm:$0xff] %v6005_v27  ;;  %7646 = vst [vmem:[#allocation42_spill] sm:$0xff] %v6009_v42  ;;  %v6015_v0 = vmul.f32 %v5906_v15, %v5906_v15 }
 0x2eb   : > { %4389 = vmatprep.mubr.f32.mxu0 %v2896_v26  ;;  %7647 = vst [vmem:[#allocation43_spill] sm:$0xff] %v6015_v0 }
 0x2ec   : > { %4390 = vmatmul.mubr.f32.gmra.mrb[44].mxu0 %v2897_v10  ;;  %v6019_v10 = vmul.f32 %v5910_v45, %v5910_v45  ;;  %v6027_v60 = vpop.permute.xlu1 %1653  ;;  %v6033_v19 = vpop.permute.xlu0 %1651 }
 0x2ed   : > { %7649 = vst [vmem:[#allocation45_spill] sm:$0xff] %v6027_v60  ;;  %7651 = vst [vmem:[#allocation47_spill] sm:$0xff] %v6033_v19 }
 0x2ee   : > { %7648 = vst [vmem:[#allocation44_spill] sm:$0xff] %v6019_v10 }
 0x2f0   : > { %v6057_v19 = vpop.permute.xlu1 %1813  ;;  %v6061_v60 = vpop.permute.xlu0 %1811 }
 0x2f1   : > { %7655 = vst [vmem:[#allocation51_spill] sm:$0xff] %v6057_v19  ;;  %7656 = vst [vmem:[#allocation52_spill] sm:$0xff] %v6061_v60  ;;  %v3198_v19 = vld [vmem:[%s7507_s6 + $0x10] sm:$0xff] }
 0x2f4   : > { %v6083_v60 = vpop.permute.xlu1 %1657 }
 0x2f5   : > { %7659 = vst [vmem:[#allocation55_spill] sm:$0xff] %v6083_v60 }
 0x2f6   : > { %v5987_v47 = vpop.f32.mrb[30].mxu0 }
 0x2f7   : > { %7643 = vst [vmem:[#allocation39_spill] sm:$0xff] %v5987_v47  ;;  %1705 = vrot.lane.b32.xlu1 %v5987_v47, %s4743_s12  ;;  %v5991_v5 = vpop.f32.mrb[31].mxu0 }
 0x2f8   : > { %7644 = vst [vmem:[#allocation40_spill] sm:$0xff] %v5991_v5  ;;  %1703 = vrot.lane.b32.xlu0 %v5991_v5, %s4743_s12  ;;  %4336 = vmatprep.mubr.f32.mxu1 %v5991_v5 }
 0x2f9   : > { %4337 = vmatmul.mubr.f32.gmra.mrb[30].mxu1 %v5987_v47 }
 0x2fb   : > { %1841 = vrot.lane.b32.xlu1 %v5999_v59, %s4743_s12 }
 0x2fc   : > { %1839 = vrot.lane.b32.xlu0 %v6003_v35, %s4743_s12 }
 0x2fe   : > { %v4314_v26 = vpop.f32.mrb[14].mxu1 }
 0x2ff   : > { %v2801_v11 = vadd.f32 %v4314_v26, %v5949_v1  ;;  %v2795_v27 = vpop.f32.mrb[15].mxu1  ;;  %1845 = vrot.lane.b32.xlu1 %v6015_v0, %s4743_s12  ;;  %v6037_v26 = vmul.f32 %v5920_v7, %v5920_v7 }
 0x300   : > { %v2796_v42 = vadd.f32 %v5949_v1, %v2795_v27  ;;  %1843 = vrot.lane.b32.xlu0 %v6019_v10, %s4743_s12  ;;  %v6045_v27 = vmul.f32 %v5926_v20, %v5926_v20  ;;  %v3206_v10 = vld [vmem:[%s7507_s6 + $0x50] sm:$0xff] }
 0x301   : > { %7652 = vst [vmem:[#allocation48_spill] sm:$0xff] %v6037_v26  ;;  %v2899_v49 = vmax.f32 %v2801_v11, 0.0  ;;  %v3196_v11 = vld [vmem:[%s7507_s6] sm:$0xff] }
 0x302   : > { %v2898_v62 = vmax.f32 %v2796_v42, 0.0  ;;  %7653 = vst [vmem:[#allocation49_spill] sm:$0xff] %v6045_v27  ;;  %v6049_v42 = vmul.f32 %v5930_v54, %v5930_v54 }
 0x303   : > { %1849 = vrot.lane.b32.xlu1 %v6031_v22, %s4743_s12  ;;  %v6071_v22 = vmul.f32 %v5940_v48, %v5940_v48 }
 0x304   : > { %4392 = vmatprep.mubr.f32.mxu0 %v2898_v62  ;;  %1847 = vrot.lane.b32.xlu0 %v6037_v26, %s4743_s12  ;;  %7654 = vst [vmem:[#allocation50_spill] sm:$0xff] %v6049_v42  ;;  %v3197_v62 = vld [vmem:[%s7507_s6 + $0x8] sm:$0xff]  ;;  %v6067_v26 = vmul.f32 %v5936_v37, %v5936_v37 }
 0x305   : > { %4393 = vmatmul.mubr.f32.gmra.mrb[46].mxu0 %v2899_v49  ;;  %v4595_v49 = vpack.c.bf16 %v3197_v62, %v3196_v11  ;;  %7658 = vst [vmem:[#allocation54_spill] sm:$0xff] %v6071_v22  ;;  %v3199_v11 = vld [vmem:[%s7507_s6 + $0x18] sm:$0xff] }
 0x306   : > { %7657 = vst [vmem:[#allocation53_spill] sm:$0xff] %v6067_v26  ;;  %v4599_v62 = vpack.c.bf16 %v3199_v11, %v3198_v19  ;;  %v3200_v19 = vld [vmem:[%s7507_s6 + $0x20] sm:$0xff]  ;;  %v3201_v11 = vld [vmem:[%s7507_s6 + $0x28] sm:$0xff] }
 0x307   : > { %1853 = vrot.lane.b32.xlu1 %v6045_v27, %s4743_s12  ;;  %4596 = vmatprep.subr.bf16.mxu1 %v4595_v49  ;;  %v6093_v27 = vmul.f32 %v5963_v29, %v5963_v29  ;;  %v4603_v60 = vpack.c.bf16 %v3201_v11, %v3200_v19  ;;  %v3203_v19 = vld [vmem:[%s7507_s6 + $0x38] sm:$0xff]  ;;  %v6119_v11 = vpop.permute.xlu1 %1817 }
 0x308   : > { %1851 = vrot.lane.b32.xlu0 %v6049_v42, %s4743_s12  ;;  %4598 = vmatpush3.bf16.msra.mxu1 %v4595_v49  ;;  %v6087_v49 = vmul.f32 %v5959_v18, %v5959_v18  ;;  %v6089_v42 = vpop.permute.xlu0 %1655  ;;  %7665 = vst [vmem:[#allocation61_spill] sm:$0xff] %v6119_v11 }
 0x309   : > { %4600 = vmatprep.subr.bf16.mxu1 %v4599_v62  ;;  %7661 = vst [vmem:[#allocation57_spill] sm:$0xff] %v6089_v42  ;;  %7662 = vst [vmem:[#allocation58_spill] sm:$0xff] %v6093_v27  ;;  %v6107_v42 = vmul.f32 %v5987_v47, %v5987_v47 }
 0x30a   : > { %7660 = vst [vmem:[#allocation56_spill] sm:$0xff] %v6087_v49 }
 0x30b   : > { %1857 = vrot.lane.b32.xlu1 %v6067_v26, %s4743_s12  ;;  %7663 = vst [vmem:[#allocation59_spill] sm:$0xff] %v6107_v42  ;;  %v3205_v26 = vld [vmem:[%s7507_s6 + $0x48] sm:$0xff] }
 0x30c   : > { %1855 = vrot.lane.b32.xlu0 %v6071_v22, %s4743_s12  ;;  %4602 = vmatpush3.bf16.msra.mxu1 %v4599_v62  ;;  %v6111_v62 = vmul.f32 %v5991_v5, %v5991_v5  ;;  %v3202_v22 = vld [vmem:[%s7507_s6 + $0x30] sm:$0xff] }
 0x30d   : > { %4604 = vmatprep.subr.bf16.mxu1 %v4603_v60 }
 0x30e   : > { %7664 = vst [vmem:[#allocation60_spill] sm:$0xff] %v6111_v62 }
 0x30f   : > { %1861 = vrot.lane.b32.xlu1 %v6087_v49, %s4743_s12  ;;  %v6123_v49 = vpop.permute.xlu0 %1815 }
 0x310   : > { %1859 = vrot.lane.b32.xlu0 %v6093_v27, %s4743_s12  ;;  %4606 = vmatpush3.bf16.msra.mxu1 %v4603_v60  ;;  %v4607_v27 = vpack.c.bf16 %v3203_v19, %v3202_v22  ;;  %7666 = vst [vmem:[#allocation62_spill] sm:$0xff] %v6123_v49  ;;  %v3204_v60 = vld [vmem:[%s7507_s6 + $0x40] sm:$0xff] }
 0x311   : > { %v4611_v22 = vpack.c.bf16 %v3205_v26, %v3204_v60  ;;  %v3207_v26 = vld [vmem:[%s7507_s6 + $0x58] sm:$0xff] }
 0x312   : > { %4608 = vmatprep.subr.bf16.mxu1 %v4607_v27  ;;  %v4615_v60 = vpack.c.bf16 %v3207_v26, %v3206_v10  ;;  %v3211_v26 = vld [vmem:[%s7507_s6 + $0x78] sm:$0xff] }
 0x313   : > { %1865 = vrot.lane.b32.xlu1 %v6107_v42, %s4743_s12  ;;  %v6141_v42 = vpop.permute.xlu0 %1659 }
 0x314   : > { %1863 = vrot.lane.b32.xlu0 %v6111_v62, %s4743_s12  ;;  %4610 = vmatpush3.bf16.msra.mxu1 %v4607_v27  ;;  %v6138_v27 = vpop.permute.xlu1 %1661  ;;  %7668 = vst [vmem:[#allocation64_spill] sm:$0xff] %v6141_v42 }
 0x315   : > { %7667 = vst [vmem:[#allocation63_spill] sm:$0xff] %v6138_v27  ;;  %4612 = vmatprep.subr.bf16.mxu1 %v4611_v22 }
 0x317   : > { %v4317_v11 = vpop.f32.mrb[16].mxu1  ;;  %1933 = vrot.lane.b32.xlu1 %v5613_v38, %s4744_s17 }
 0x318   : > { %v2811_v19 = vadd.f32 %v4317_v11, %v5949_v1  ;;  %v2805_v49 = vpop.f32.mrb[17].mxu1  ;;  %1931 = vrot.lane.b32.xlu0 %v5617_v61, %s4744_s17  ;;  %4614 = vmatpush3.bf16.msra.mxu1 %v4611_v22  ;;  %v6159_v22 = vpop.permute.xlu1 %1821 }
 0x319   : > { %v2806_v62 = vadd.f32 %v5949_v1, %v2805_v49  ;;  %4616 = vmatprep.subr.bf16.mxu1 %v4615_v60  ;;  %v3208_v49 = vld [vmem:[%s7507_s6 + $0x60] sm:$0xff]  ;;  %7669 = vst [vmem:[#allocation65_spill] sm:$0xff] %v6159_v22 }
 0x31a   : > { %v2901_v27 = vmax.f32 %v2811_v19, 0.0  ;;  %v6163_v19 = vpop.permute.xlu0 %1819 }
 0x31b   : > { %v2900_v11 = vmax.f32 %v2806_v62, 0.0  ;;  %1937 = vrot.lane.b32.xlu1 %v5627_v57, %s4744_s17  ;;  %v3209_v62 = vld [vmem:[%s7507_s6 + $0x68] sm:$0xff]  ;;  %7670 = vst [vmem:[#allocation66_spill] sm:$0xff] %v6163_v19 }
 0x31c   : > { %1935 = vrot.lane.b32.xlu0 %v5636_v17, %s4744_s17  ;;  %4618 = vmatpush3.bf16.msra.mxu1 %v4615_v60  ;;  %v4619_v10 = vpack.c.bf16 %v3209_v62, %v3208_v49  ;;  %v6177_v60 = vpop.permute.xlu1 %1665 }
 0x31d   : > { %4395 = vmatprep.mubr.f32.mxu0 %v2900_v11  ;;  %7671 = vst [vmem:[#allocation67_spill] sm:$0xff] %v6177_v60 }
 0x31e   : > { %4396 = vmatmul.mubr.f32.gmra.mrb[48].mxu0 %v2901_v27  ;;  %4620 = vmatprep.subr.bf16.mxu1 %v4619_v10  ;;  %v3210_v27 = vld [vmem:[%s7507_s6 + $0x70] sm:$0xff]  ;;  %v6179_v49 = vpop.permute.xlu0 %1663 }
 0x31f   : > { %1941 = vrot.lane.b32.xlu1 %v5647_v43, %s4744_s17  ;;  %v4623_v11 = vpack.c.bf16 %v3211_v26, %v3210_v27  ;;  %7672 = vst [vmem:[#allocation68_spill] sm:$0xff] %v6179_v49 }
 0x320   : > { %1939 = vrot.lane.b32.xlu0 %v5653_v9, %s4744_s17  ;;  %4622 = vmatpush3.bf16.msra.mxu1 %v4619_v10  ;;  %v6185_v62 = vpop.permute.xlu1 %1825 }
 0x321   : > { %4624 = vmatprep.subr.bf16.mxu1 %v4623_v11  ;;  %7673 = vst [vmem:[#allocation69_spill] sm:$0xff] %v6185_v62 }
 0x322   : > { %v6189_v10 = vpop.permute.xlu0 %1823 }
 0x323   : > { %1945 = vrot.lane.b32.xlu1 %v5668_v31, %s4744_s17  ;;  %7674 = vst [vmem:[#allocation70_spill] sm:$0xff] %v6189_v10 }
 0x324   : > { %1943 = vrot.lane.b32.xlu0 %v5679_v25, %s4744_s17  ;;  %4626 = vmatpush3.bf16.msra.mxu1 %v4623_v11  ;;  %v6197_v26 = vpop.permute.xlu1 %1669 }
 0x325   : > { %7675 = vst [vmem:[#allocation71_spill] sm:$0xff] %v6197_v26 }
 0x326   : > { %v6200_v49 = vpop.permute.xlu0 %1667 }
 0x327   : > { %1949 = vrot.lane.b32.xlu1 %v5690_v46, %s4744_s17  ;;  %7676 = vst [vmem:[#allocation72_spill] sm:$0xff] %v6200_v49 }
 0x328   : > { %1947 = vrot.lane.b32.xlu0 %v5694_v32, %s4744_s17  ;;  %v6207_v22 = vpop.permute.xlu1 %1829 }
 0x329   : > { %7677 = vst [vmem:[#allocation73_spill] sm:$0xff] %v6207_v22 }
 0x32b   : > { %1953 = vrot.lane.b32.xlu1 %v5704_v63, %s4744_s17 }
 0x32c   : > { %1951 = vrot.lane.b32.xlu0 %v5712_v36, %s4744_s17 }
 0x32f   : > { %1957 = vrot.lane.b32.xlu1 %v5734_v23, %s4744_s17 }
 0x330   : > { %v4320_v27 = vpop.f32.mrb[18].mxu1  ;;  %1955 = vrot.lane.b32.xlu0 %v5736_v39, %s4744_s17 }
 0x331   : > { %v2821_v11 = vadd.f32 %v4320_v27, %v5949_v1  ;;  %v2815_v62 = vpop.f32.mrb[19].mxu1  ;;  %v6211_v27 = vpop.permute.xlu0 %1827 }
 0x332   : > { %v2816_v60 = vadd.f32 %v5949_v1, %v2815_v62  ;;  %7678 = vst [vmem:[#allocation74_spill] sm:$0xff] %v6211_v27 }
 0x333   : > { %1961 = vrot.lane.b32.xlu1 %v5804_v4, %s4744_s17  ;;  %v2903_v19 = vmax.f32 %v2821_v11, 0.0 }
 0x334   : > { %v2902_v10 = vmax.f32 %v2816_v60, 0.0  ;;  %1959 = vrot.lane.b32.xlu0 %v5815_v53, %s4744_s17  ;;  %v6219_v60 = vpop.permute.xlu1 %1673 }
 0x335   : > { %7679 = vst [vmem:[#allocation75_spill] sm:$0xff] %v6219_v60  ;;  %v6221_v62 = vpop.permute.xlu0 %1671 }
 0x336   : > { %4398 = vmatprep.mubr.f32.mxu0 %v2902_v10  ;;  %7680 = vst [vmem:[#allocation76_spill] sm:$0xff] %v6221_v62 }
 0x337   : > { %4399 = vmatmul.mubr.f32.gmra.mrb[50].mxu0 %v2903_v19  ;;  %1965 = vrot.lane.b32.xlu1 %v5862_v44, %s4744_s17 }
 0x338   : > { %1963 = vrot.lane.b32.xlu0 %v5872_v33, %s4744_s17  ;;  %v6227_v19 = vpop.permute.xlu1 %1833 }
 0x339   : > { %7681 = vst [vmem:[#allocation77_spill] sm:$0xff] %v6227_v19  ;;  %v6231_v10 = vpop.permute.xlu0 %1831 }
 0x33a   : > { %7682 = vst [vmem:[#allocation78_spill] sm:$0xff] %v6231_v10 }
 0x33b   : > { %1969 = vrot.lane.b32.xlu1 %v5896_v34, %s4744_s17 }
 0x33c   : > { %1967 = vrot.lane.b32.xlu0 %v5900_v6, %s4744_s17  ;;  %v6235_v11 = vpop.permute.xlu1 %1677 }
 0x33d   : > { %7683 = vst [vmem:[#allocation79_spill] sm:$0xff] %v6235_v11  ;;  %v6239_v62 = vpop.permute.xlu0 %1675 }
 0x33e   : > { %7684 = vst [vmem:[#allocation80_spill] sm:$0xff] %v6239_v62 }
 0x33f   : > { %1973 = vrot.lane.b32.xlu1 %v5906_v15, %s4744_s17 }
 0x340   : > { %1971 = vrot.lane.b32.xlu0 %v5910_v45, %s4744_s17  ;;  %v6249_v11 = vpop.permute.xlu1 %1837 }
 0x341   : > { %7685 = vst [vmem:[#allocation81_spill] sm:$0xff] %v6249_v11  ;;  %v6251_v49 = vpop.permute.xlu0 %1835 }
 0x342   : > { %7686 = vst [vmem:[#allocation82_spill] sm:$0xff] %v6251_v49 }
 0x343   : > { %1977 = vrot.lane.b32.xlu1 %v5916_v2, %s4744_s17 }
 0x344   : > { %1975 = vrot.lane.b32.xlu0 %v5920_v7, %s4744_s17 }
 0x347   : > { %1981 = vrot.lane.b32.xlu1 %v5926_v20, %s4744_s17 }
 0x348   : > { %1979 = vrot.lane.b32.xlu0 %v5930_v54, %s4744_s17 }
 0x349   : > { %v4323_v60 = vpop.f32.mrb[20].mxu1 }
 0x34a   : > { %v2831_v19 = vadd.f32 %v4323_v60, %v5949_v1  ;;  %v2825_v27 = vpop.f32.mrb[21].mxu1  ;;  %v6259_v60 = vpop.permute.xlu0 %1679 }
 0x34b   : > { %v2826_v22 = vadd.f32 %v5949_v1, %v2825_v27  ;;  %1985 = vrot.lane.b32.xlu1 %v5936_v37, %s4744_s17  ;;  %v6257_v27 = vpop.permute.xlu1 %1681  ;;  %7688 = vst [vmem:[#allocation84_spill] sm:$0xff] %v6259_v60 }
 0x34c   : > { %1983 = vrot.lane.b32.xlu0 %v5940_v48, %s4744_s17  ;;  %v2905_v62 = vmax.f32 %v2831_v19, 0.0  ;;  %7687 = vst [vmem:[#allocation83_spill] sm:$0xff] %v6257_v27 }
 0x34d   : > { %v2904_v10 = vmax.f32 %v2826_v22, 0.0 }
 0x34e   : > { %v6267_v19 = vpop.permute.xlu0 %1683 }
 0x34f   : > { %4401 = vmatprep.mubr.f32.mxu0 %v2904_v10  ;;  %1989 = vrot.lane.b32.xlu1 %v5959_v18, %s4744_s17  ;;  %v6265_v22 = vpop.permute.xlu1 %1685  ;;  %7690 = vst [vmem:[#allocation86_spill] sm:$0xff] %v6267_v19 }
 0x350   : > { %4402 = vmatmul.mubr.f32.gmra.mrb[52].mxu0 %v2905_v62  ;;  %1987 = vrot.lane.b32.xlu0 %v5963_v29, %s4744_s17  ;;  %7689 = vst [vmem:[#allocation85_spill] sm:$0xff] %v6265_v22 }
 0x352   : > { %v6275_v10 = vpop.permute.xlu0 %1687 }
 0x353   : > { %1993 = vrot.lane.b32.xlu1 %v5987_v47, %s4744_s17  ;;  %v6273_v62 = vpop.permute.xlu1 %1689  ;;  %7692 = vst [vmem:[#allocation88_spill] sm:$0xff] %v6275_v10 }
 0x354   : > { %1991 = vrot.lane.b32.xlu0 %v5991_v5, %s4744_s17  ;;  %7691 = vst [vmem:[#allocation87_spill] sm:$0xff] %v6273_v62 }
 0x356   : > { %v6283_v22 = vpop.permute.xlu0 %1691 }
 0x357   : > { %2061 = vrot.lane.b32.xlu1 %v5625_v14, %s4744_s17  ;;  %v6281_v60 = vpop.permute.xlu1 %1693  ;;  %7694 = vst [vmem:[#allocation90_spill] sm:$0xff] %v6283_v22 }
 0x358   : > { %2059 = vrot.lane.b32.xlu0 %v5631_v55, %s4744_s17  ;;  %7693 = vst [vmem:[#allocation89_spill] sm:$0xff] %v6281_v60 }
 0x35a   : > { %v6291_v62 = vpop.permute.xlu0 %1695 }
 0x35b   : > { %2065 = vrot.lane.b32.xlu1 %v5664_v30, %s4744_s17  ;;  %v6289_v19 = vpop.permute.xlu1 %1697  ;;  %7696 = vst [vmem:[#allocation92_spill] sm:$0xff] %v6291_v62 }
 0x35c   : > { %2063 = vrot.lane.b32.xlu0 %v5672_v50, %s4744_s17  ;;  %7695 = vst [vmem:[#allocation91_spill] sm:$0xff] %v6289_v19 }
 0x35e   : > { %v6301_v11 = vpop.permute.xlu0 %1699 }
 0x35f   : > { %2069 = vrot.lane.b32.xlu1 %v5701_v12, %s4744_s17  ;;  %v6299_v22 = vpop.permute.xlu1 %1701  ;;  %7698 = vst [vmem:[#allocation94_spill] sm:$0xff] %v6301_v11 }
 0x360   : > { %2067 = vrot.lane.b32.xlu0 %v5708_v8, %s4744_s17  ;;  %7697 = vst [vmem:[#allocation93_spill] sm:$0xff] %v6299_v22 }
 0x362   : > { %v4326_v10 = vpop.f32.mrb[22].mxu1 }
 0x363   : > { %v2841_v27 = vadd.f32 %v4326_v10, %v5949_v1  ;;  %v2835_v49 = vpop.f32.mrb[23].mxu1  ;;  %2073 = vrot.lane.b32.xlu1 %v5724_v3, %s4744_s17 }
 0x364   : > { %v2836_v60 = vadd.f32 %v5949_v1, %v2835_v49  ;;  %2071 = vrot.lane.b32.xlu0 %v5728_v40, %s4744_s17 }
 0x365   : > { %v2907_v19 = vmax.f32 %v2841_v27, 0.0 }
 0x366   : > { %v2906_v26 = vmax.f32 %v2836_v60, 0.0 }
 0x367   : > { %2077 = vrot.lane.b32.xlu1 %v5747_v24, %s4744_s17 }
 0x368   : > { %4404 = vmatprep.mubr.f32.mxu0 %v2906_v26  ;;  %2075 = vrot.lane.b32.xlu0 %v5753_v41, %s4744_s17 }
 0x369   : > { %4405 = vmatmul.mubr.f32.gmra.mrb[54].mxu0 %v2907_v19  ;;  %v6307_v10 = vpop.permute.xlu1 %1705 }
 0x36a   : > { %7699 = vst [vmem:[#allocation95_spill] sm:$0xff] %v6307_v10  ;;  %v6309_v49 = vpop.permute.xlu0 %1703 }
 0x36b   : > { %7700 = vst [vmem:[#allocation96_spill] sm:$0xff] %v6309_v49  ;;  %2081 = vrot.lane.b32.xlu1 %v5775_v52, %s4744_s17 }
 0x36c   : > { %2079 = vrot.lane.b32.xlu0 %v5779_v56, %s4744_s17 }
 0x36d   : > { %v6315_v60 = vpop.permute.xlu1 %1841 }
 0x36e   : > { %7701 = vst [vmem:[#allocation97_spill] sm:$0xff] %v6315_v60  ;;  %v6317_v27 = vpop.permute.xlu0 %1839 }
 0x36f   : > { %7702 = vst [vmem:[#allocation98_spill] sm:$0xff] %v6317_v27  ;;  %2085 = vrot.lane.b32.xlu1 %v5794_v28, %s4744_s17 }
 0x370   : > { %2083 = vrot.lane.b32.xlu0 %v5798_v58, %s4744_s17 }
 0x371   : > { %v6323_v26 = vpop.permute.xlu1 %1845 }
 0x372   : > { %7703 = vst [vmem:[#allocation99_spill] sm:$0xff] %v6323_v26  ;;  %v6325_v19 = vpop.permute.xlu0 %1843 }
 0x373   : > { %7704 = vst [vmem:[#allocation100_spill] sm:$0xff] %v6325_v19  ;;  %2089 = vrot.lane.b32.xlu1 %v5828_v51, %s4744_s17 }
 0x374   : > { %2087 = vrot.lane.b32.xlu0 %v5832_v16, %s4744_s17 }
 0x375   : > { %v6331_v49 = vpop.permute.xlu1 %1849 }
 0x376   : > { %7705 = vst [vmem:[#allocation101_spill] sm:$0xff] %v6331_v49  ;;  %v6333_v60 = vpop.permute.xlu0 %1847 }
 0x377   : > { %7706 = vst [vmem:[#allocation102_spill] sm:$0xff] %v6333_v60  ;;  %2093 = vrot.lane.b32.xlu1 %v5880_v21, %s4744_s17 }
 0x378   : > { %2091 = vrot.lane.b32.xlu0 %v5884_v13, %s4744_s17 }
 0x379   : > { %v6339_v27 = vpop.permute.xlu1 %1853 }
 0x37a   : > { %7707 = vst [vmem:[#allocation103_spill] sm:$0xff] %v6339_v27  ;;  %v6341_v26 = vpop.permute.xlu0 %1851  ;;  %v7711_v27 = vld [vmem:[#allocation44_spill] sm:$0xff] }
 0x37b   : > { %7708 = vst [vmem:[#allocation104_spill] sm:$0xff] %v6341_v26  ;;  %v4329_v19 = vpop.f32.mrb[24].mxu1  ;;  %2097 = vrot.lane.b32.xlu1 %v5999_v59, %s4744_s17 }
 0x37c   : > { %v2851_v10 = vadd.f32 %v4329_v19, %v5949_v1  ;;  %v2845_v11 = vpop.f32.mrb[25].mxu1  ;;  %2095 = vrot.lane.b32.xlu0 %v6003_v35, %s4744_s17 }
 0x37d   : > { %v2846_v60 = vadd.f32 %v5949_v1, %v2845_v11  ;;  %v6349_v49 = vpop.permute.xlu1 %1857  ;;  %v7714_v11 = vld [vmem:[#allocation46_spill] sm:$0xff] }
 0x37e   : > { %7709 = vst [vmem:[#allocation105_spill] sm:$0xff] %v6349_v49  ;;  %v6351_v22 = vpop.permute.xlu0 %1855  ;;  %v2909_v26 = vmax.f32 %v2851_v10, 0.0  ;;  %v7715_v49 = vld [vmem:[#allocation48_spill] sm:$0xff]  ;;  %v7718_v10 = vld [vmem:[#allocation49_spill] sm:$0xff] }
 0x37f   : > { %7710 = vst [vmem:[#allocation106_spill] sm:$0xff] %v6351_v22  ;;  %v2908_v62 = vmax.f32 %v2846_v60, 0.0  ;;  %2101 = vrot.lane.b32.xlu1 %v6015_v0, %s4744_s17 }
 0x380   : > { %2099 = vrot.lane.b32.xlu0 %v7711_v27, %s4744_s17 }
 0x381   : > { %4407 = vmatprep.mubr.f32.mxu0 %v2908_v62  ;;  %v6357_v19 = vpop.permute.xlu1 %1861  ;;  %v7719_v62 = vld [vmem:[#allocation50_spill] sm:$0xff] }
 0x382   : > { %7712 = vst [vmem:[#allocation107_spill] sm:$0xff] %v6357_v19  ;;  %4408 = vmatmul.mubr.f32.gmra.mrb[56].mxu0 %v2909_v26  ;;  %v6359_v42 = vpop.permute.xlu0 %1859 }
 0x383   : > { %7713 = vst [vmem:[#allocation108_spill] sm:$0xff] %v6359_v42  ;;  %2105 = vrot.lane.b32.xlu1 %v7714_v11, %s4744_s17  ;;  %v7722_v42 = vld [vmem:[#allocation53_spill] sm:$0xff]  ;;  %v7723_v11 = vld [vmem:[#allocation54_spill] sm:$0xff] }
 0x384   : > { %2103 = vrot.lane.b32.xlu0 %v7715_v49, %s4744_s17 }
 0x385   : > { %v6365_v60 = vpop.permute.xlu1 %1865 }
 0x386   : > { %7716 = vst [vmem:[#allocation109_spill] sm:$0xff] %v6365_v60  ;;  %v6367_v22 = vpop.permute.xlu0 %1863 }
 0x387   : > { %7717 = vst [vmem:[#allocation110_spill] sm:$0xff] %v6367_v22  ;;  %2109 = vrot.lane.b32.xlu1 %v7718_v10, %s4744_s17  ;;  %v7726_v22 = vld [vmem:[#allocation56_spill] sm:$0xff]  ;;  %v7727_v10 = vld [vmem:[#allocation58_spill] sm:$0xff] }
 0x388   : > { %2107 = vrot.lane.b32.xlu0 %v7719_v62, %s4744_s17 }
 0x389   : > { %v6373_v19 = vpop.permute.xlu1 %1933 }
 0x38a   : > { %7720 = vst [vmem:[#allocation111_spill] sm:$0xff] %v6373_v19  ;;  %v6375_v26 = vpop.permute.xlu0 %1931 }
 0x38b   : > { %7721 = vst [vmem:[#allocation112_spill] sm:$0xff] %v6375_v26  ;;  %2113 = vrot.lane.b32.xlu1 %v7722_v42, %s4744_s17  ;;  %v7730_v26 = vld [vmem:[#allocation59_spill] sm:$0xff] }
 0x38c   : > { %2111 = vrot.lane.b32.xlu0 %v7723_v11, %s4744_s17  ;;  %v7731_v11 = vld [vmem:[#allocation60_spill] sm:$0xff] }
 0x38d   : > { %v6381_v49 = vpop.permute.xlu1 %1937 }
 0x38e   : > { %7724 = vst [vmem:[#allocation113_spill] sm:$0xff] %v6381_v49  ;;  %v6383_v60 = vpop.permute.xlu0 %1935 }
 0x38f   : > { %7725 = vst [vmem:[#allocation114_spill] sm:$0xff] %v6383_v60  ;;  %2117 = vrot.lane.b32.xlu1 %v7726_v22, %s4744_s17 }
 0x390   : > { %2115 = vrot.lane.b32.xlu0 %v7727_v10, %s4744_s17 }
 0x391   : > { %v6389_v62 = vpop.permute.xlu1 %1941 }
 0x392   : > { %7728 = vst [vmem:[#allocation115_spill] sm:$0xff] %v6389_v62  ;;  %v6391_v19 = vpop.permute.xlu0 %1939 }
 0x393   : > { %7729 = vst [vmem:[#allocation116_spill] sm:$0xff] %v6391_v19  ;;  %2121 = vrot.lane.b32.xlu1 %v7730_v26, %s4744_s17 }
 0x394   : > { %v4332_v42 = vpop.f32.mrb[26].mxu1  ;;  %2119 = vrot.lane.b32.xlu0 %v7731_v11, %s4744_s17  ;;  %s4747_s17 = smov 96  }
 0x395   : > { %v2861_v49 = vadd.f32 %v4332_v42, %v5949_v1  ;;  %v2855_v60 = vpop.f32.mrb[27].mxu1  ;;  %v6398_v27 = vpop.permute.xlu1 %1945 }
 0x396   : > { %7732 = vst [vmem:[#allocation117_spill] sm:$0xff] %v6398_v27  ;;  %v2856_v22 = vadd.f32 %v5949_v1, %v2855_v60  ;;  %v6401_v0 = vpop.permute.xlu0 %1943 }
 0x397   : > { %7733 = vst [vmem:[#allocation118_spill] sm:$0xff] %v6401_v0  ;;  %2189 = vrot.lane.b32.xlu1 %v5613_v38, %s4745_s30  ;;  %v2911_v19 = vmax.f32 %v2861_v49, 0.0 }
 0x398   : > { %v2910_v62 = vmax.f32 %v2856_v22, 0.0  ;;  %2187 = vrot.lane.b32.xlu0 %v5617_v61, %s4745_s30  ;;  %v6424_v22 = vld [vmem:[%s7506_s5] ss:$0 sm:$0xff] }
 0x399   : > { %v6407_v26 = vpop.permute.xlu1 %1949  ;;  %7738 = vst [vmem:[#allocation123_spill] sm:$0xff] %v6424_v22 }
 0x39a   : > { %7734 = vst [vmem:[#allocation119_spill] sm:$0xff] %v6407_v26  ;;  %4410 = vmatprep.mubr.f32.mxu0 %v2910_v62  ;;  %v6409_v42 = vpop.permute.xlu0 %1947 }
 0x39b   : > { %7735 = vst [vmem:[#allocation120_spill] sm:$0xff] %v6409_v42  ;;  %4411 = vmatmul.mubr.f32.gmra.mrb[58].mxu0 %v2911_v19  ;;  %2193 = vrot.lane.b32.xlu1 %v5627_v57, %s4745_s30 }
 0x39c   : > { %2191 = vrot.lane.b32.xlu0 %v5636_v17, %s4745_s30 }
 0x39d   : > { %v6415_v60 = vpop.permute.xlu1 %1953 }
 0x39e   : > { %7736 = vst [vmem:[#allocation121_spill] sm:$0xff] %v6415_v60  ;;  %v6417_v27 = vpop.permute.xlu0 %1951 }
 0x39f   : > { %7737 = vst [vmem:[#allocation122_spill] sm:$0xff] %v6417_v27  ;;  %2197 = vrot.lane.b32.xlu1 %v5647_v43, %s4745_s30 }
 0x3a0   : > { %2195 = vrot.lane.b32.xlu0 %v5653_v9, %s4745_s30 }
 0x3a1   : > { %v6428_v49 = vpop.permute.xlu1 %1957  ;;  %v4373_v19 = vpop.f32.mrb[32].mxu0 }
 0x3a2   : > { %7739 = vst [vmem:[#allocation124_spill] sm:$0xff] %v6428_v49  ;;  %v3011_v62 = vadd.f32 %v4373_v19, %v6424_v22  ;;  %v3005_v42 = vpop.f32.mrb[33].mxu0  ;;  %v6431_v60 = vpop.permute.xlu0 %1955 }
 0x3a3   : > { %7740 = vst [vmem:[#allocation125_spill] sm:$0xff] %v6431_v60  ;;  %v3006_v27 = vadd.f32 %v6424_v22, %v3005_v42  ;;  %2201 = vrot.lane.b32.xlu1 %v5668_v31, %s4745_s30 }
 0x3a4   : > { %2199 = vrot.lane.b32.xlu0 %v5679_v25, %s4745_s30  ;;  %v3165_v43 = vmax.f32 %v3011_v62, 0.0 }
 0x3a5   : > { %v3164_v26 = vmax.f32 %v3006_v27, 0.0  ;;  %v6438_v0 = vpop.permute.xlu1 %1961  ;;  %v4376_v9 = vpop.f32.mrb[34].mxu0 }
 0x3a6   : > { %7741 = vst [vmem:[#allocation126_spill] sm:$0xff] %v6438_v0  ;;  %v3021_v49 = vadd.f32 %v4376_v9, %v6424_v22  ;;  %v3015_v17 = vpop.f32.mrb[35].mxu0  ;;  %v6441_v19 = vpop.permute.xlu0 %1959 }
 0x3a7   : > { %7742 = vst [vmem:[#allocation127_spill] sm:$0xff] %v6441_v19  ;;  %v3016_v60 = vadd.f32 %v6424_v22, %v3015_v17  ;;  %2205 = vrot.lane.b32.xlu1 %v5690_v46, %s4745_s30  ;;  %4451 = vmatprep.mubr.f32.mxu1 %v3164_v26 }
 0x3a8   : > { %4452 = vmatmul.mubr.f32.vlgmr.msra.gmra.mrb[32].mxu1 %v3165_v43  ;;  %2203 = vrot.lane.b32.xlu0 %v5694_v32, %s4745_s30  ;;  %v3167_v62 = vmax.f32 %v3021_v49, 0.0 }
 0x3a9   : > { %v3166_v27 = vmax.f32 %v3016_v60, 0.0  ;;  %v6448_v42 = vpop.permute.xlu1 %1965  ;;  %v4379_v0 = vpop.f32.mrb[36].mxu0 }
 0x3aa   : > { %7743 = vst [vmem:[#allocation128_spill] sm:$0xff] %v6448_v42  ;;  %v3031_v9 = vadd.f32 %v4379_v0, %v6424_v22  ;;  %v3025_v25 = vpop.f32.mrb[37].mxu0  ;;  %v6451_v31 = vpop.permute.xlu0 %1963 }
 0x3ab   : > { %7744 = vst [vmem:[#allocation129_spill] sm:$0xff] %v6451_v31  ;;  %v3026_v17 = vadd.f32 %v6424_v22, %v3025_v25  ;;  %2209 = vrot.lane.b32.xlu1 %v5704_v63, %s4745_s30  ;;  %4454 = vmatprep.mubr.f32.mxu1 %v3166_v27 }
 0x3ac   : > { %4455 = vmatmul.mubr.f32.gmra.mrb[34].mxu1 %v3167_v62  ;;  %2207 = vrot.lane.b32.xlu0 %v5712_v36, %s4745_s30  ;;  %v3169_v49 = vmax.f32 %v3031_v9, 0.0 }
 0x3ad   : > { %v3168_v43 = vmax.f32 %v3026_v17, 0.0  ;;  %v4335_v26 = vpop.f32.mrb[28].mxu1  ;;  %v6458_v60 = vpop.permute.xlu1 %1969 }
 0x3ae   : > { %7745 = vst [vmem:[#allocation130_spill] sm:$0xff] %v6458_v60  ;;  %v2871_v0 = vadd.f32 %v4335_v26, %v5949_v1  ;;  %v4382_v42 = vpop.f32.mrb[38].mxu0  ;;  %v2865_v19 = vpop.f32.mrb[29].mxu1 }
 0x3af   : > { %v3041_v31 = vadd.f32 %v4382_v42, %v6424_v22  ;;  %v2866_v25 = vadd.f32 %v5949_v1, %v2865_v19  ;;  %v3035_v32 = vpop.f32.mrb[39].mxu0  ;;  %v6463_v63 = vpop.permute.xlu0 %1967  ;;  %2213 = vrot.lane.b32.xlu1 %v5734_v23, %s4745_s30  ;;  %4457 = vmatprep.mubr.f32.mxu1 %v3168_v43 }
 0x3b0   : > { %7746 = vst [vmem:[#allocation131_spill] sm:$0xff] %v6463_v63  ;;  %v3036_v27 = vadd.f32 %v6424_v22, %v3035_v32  ;;  %4458 = vmatmul.mubr.f32.gmra.mrb[36].mxu1 %v3169_v49  ;;  %2211 = vrot.lane.b32.xlu0 %v5736_v39, %s4745_s30  ;;  %v2913_v17 = vmax.f32 %v2871_v0, 0.0 }
 0x3b1   : > { %v2912_v62 = vmax.f32 %v2866_v25, 0.0  ;;  %v6470_v9 = vpop.permute.xlu1 %1973  ;;  %v3171_v19 = vmax.f32 %v3041_v31, 0.0 }
 0x3b2   : > { %7747 = vst [vmem:[#allocation132_spill] sm:$0xff] %v6470_v9  ;;  %v3170_v42 = vmax.f32 %v3036_v27, 0.0  ;;  %v4385_v26 = vpop.f32.mrb[40].mxu0 }
 0x3b3   : > { %v3051_v60 = vadd.f32 %v4385_v26, %v6424_v22  ;;  %v3045_v63 = vpop.f32.mrb[41].mxu0  ;;  %v6473_v36 = vpop.permute.xlu0 %1971  ;;  %4413 = vmatprep.mubr.f32.mxu0 %v2912_v62  ;;  %2217 = vrot.lane.b32.xlu1 %v5804_v4, %s4745_s30 }
 0x3b4   : > { %7748 = vst [vmem:[#allocation133_spill] sm:$0xff] %v6473_v36  ;;  %v3046_v32 = vadd.f32 %v6424_v22, %v3045_v63  ;;  %4460 = vmatprep.mubr.f32.mxu1 %v3170_v42  ;;  %4414 = vmatmul.mubr.f32.gmra.mrb[60].mxu0 %v2913_v17 }
 0x3b5   : > { %4461 = vmatmul.mubr.f32.gmra.mrb[38].mxu1 %v3171_v19  ;;  %2215 = vrot.lane.b32.xlu0 %v5815_v53, %s4745_s30  ;;  %v6480_v43 = vpop.permute.xlu1 %1977  ;;  %v3173_v0 = vmax.f32 %v3051_v60, 0.0 }
 0x3b6   : > { %7749 = vst [vmem:[#allocation134_spill] sm:$0xff] %v6480_v43  ;;  %v3172_v31 = vmax.f32 %v3046_v32, 0.0  ;;  %v4388_v49 = vpop.f32.mrb[42].mxu0 }
 0x3b7   : > { %v3061_v25 = vadd.f32 %v4388_v49, %v6424_v22  ;;  %v3055_v27 = vpop.f32.mrb[43].mxu0  ;;  %v6483_v62 = vpop.permute.xlu0 %1975  ;;  %2221 = vrot.lane.b32.xlu1 %v5862_v44, %s4745_s30 }
 0x3b8   : > { %7750 = vst [vmem:[#allocation135_spill] sm:$0xff] %v6483_v62  ;;  %v3056_v63 = vadd.f32 %v6424_v22, %v3055_v27  ;;  %4463 = vmatprep.mubr.f32.mxu1 %v3172_v31 }
 0x3b9   : > { %4464 = vmatmul.mubr.f32.gmra.mrb[40].mxu1 %v3173_v0  ;;  %2219 = vrot.lane.b32.xlu0 %v5872_v33, %s4745_s30  ;;  %v6490_v17 = vpop.permute.xlu1 %1981  ;;  %v3175_v26 = vmax.f32 %v3061_v25, 0.0 }
 0x3ba   : > { %7751 = vst [vmem:[#allocation136_spill] sm:$0xff] %v6490_v17  ;;  %v3174_v42 = vmax.f32 %v3056_v63, 0.0 }
 0x3bb   : > { %v6492_v60 = vpop.permute.xlu0 %1979  ;;  %2225 = vrot.lane.b32.xlu1 %v5896_v34, %s4745_s30 }
 0x3bc   : > { %7752 = vst [vmem:[#allocation137_spill] sm:$0xff] %v6492_v60  ;;  %4466 = vmatprep.mubr.f32.mxu1 %v3174_v42 }
 0x3bd   : > { %4467 = vmatmul.mubr.f32.gmra.mrb[42].mxu1 %v3175_v26  ;;  %2223 = vrot.lane.b32.xlu0 %v5900_v6, %s4745_s30  ;;  %v6498_v19 = vpop.permute.xlu1 %1985 }
 0x3be   : > { %7753 = vst [vmem:[#allocation138_spill] sm:$0xff] %v6498_v19 }
 0x3bf   : > { %v6500_v32 = vpop.permute.xlu0 %1983  ;;  %2229 = vrot.lane.b32.xlu1 %v5906_v15, %s4745_s30  ;;  %v4391_v31 = vpop.f32.mrb[44].mxu0 }
 0x3c0   : > { %7754 = vst [vmem:[#allocation139_spill] sm:$0xff] %v6500_v32  ;;  %v3071_v49 = vadd.f32 %v4391_v31, %v6424_v22  ;;  %v3065_v0 = vpop.f32.mrb[45].mxu0 }
 0x3c1   : > { %v3066_v25 = vadd.f32 %v6424_v22, %v3065_v0  ;;  %2227 = vrot.lane.b32.xlu0 %v5910_v45, %s4745_s30  ;;  %v6508_v27 = vpop.permute.xlu1 %1989 }
 0x3c2   : > { %7755 = vst [vmem:[#allocation140_spill] sm:$0xff] %v6508_v27  ;;  %v3177_v26 = vmax.f32 %v3071_v49, 0.0 }
 0x3c3   : > { %v3176_v63 = vmax.f32 %v3066_v25, 0.0  ;;  %v6510_v42 = vpop.permute.xlu0 %1987  ;;  %2233 = vrot.lane.b32.xlu1 %v5916_v2, %s4745_s30 }
 0x3c4   : > { %7756 = vst [vmem:[#allocation141_spill] sm:$0xff] %v6510_v42 }
 0x3c5   : > { %2231 = vrot.lane.b32.xlu0 %v5920_v7, %s4745_s30  ;;  %v6516_v19 = vpop.permute.xlu1 %1993  ;;  %4469 = vmatprep.mubr.f32.mxu1 %v3176_v63 }
 0x3c6   : > { %7757 = vst [vmem:[#allocation142_spill] sm:$0xff] %v6516_v19  ;;  %4470 = vmatmul.mubr.f32.gmra.mrb[44].mxu1 %v3177_v26 }
 0x3c7   : > { %v6518_v31 = vpop.permute.xlu0 %1991  ;;  %2237 = vrot.lane.b32.xlu1 %v5926_v20, %s4745_s30 }
 0x3c8   : > { %7758 = vst [vmem:[#allocation143_spill] sm:$0xff] %v6518_v31 }
 0x3c9   : > { %2235 = vrot.lane.b32.xlu0 %v5930_v54, %s4745_s30  ;;  %v6524_v0 = vpop.permute.xlu1 %2061 }
 0x3cb   : > { %v6526_v25 = vpop.permute.xlu0 %2059  ;;  %2241 = vrot.lane.b32.xlu1 %v5936_v37, %s4745_s30 }
 0x3cc   : > { %v4338_v49 = vpop.f32.mrb[30].mxu1 }
 0x3cd   : > { %v2881_v19 = vadd.f32 %v4338_v49, %v5949_v1  ;;  %2239 = vrot.lane.b32.xlu0 %v5940_v48, %s4745_s30  ;;  %v6533_v63 = vpop.permute.xlu1 %2065  ;;  %v2875_v26 = vpop.f32.mrb[31].mxu1 }
 0x3ce   : > { %7759 = vst [vmem:[#allocation144_spill] sm:$0xff] %v6533_v63  ;;  %v2876_v31 = vadd.f32 %v5949_v1, %v2875_v26 }
 0x3cf   : > { %v6536_v27 = vpop.permute.xlu0 %2063  ;;  %2245 = vrot.lane.b32.xlu1 %v5959_v18, %s4745_s30  ;;  %v2915_v32 = vmax.f32 %v2881_v19, 0.0 }
 0x3d0   : > { %7760 = vst [vmem:[#allocation145_spill] sm:$0xff] %v6536_v27  ;;  %v2914_v42 = vmax.f32 %v2876_v31, 0.0 }
 0x3d1   : > { %2243 = vrot.lane.b32.xlu0 %v5963_v29, %s4745_s30  ;;  %v6542_v17 = vpop.permute.xlu1 %2069 }
 0x3d2   : > { %7761 = vst [vmem:[#allocation146_spill] sm:$0xff] %v6542_v17  ;;  %4416 = vmatprep.mubr.f32.mxu0 %v2914_v42  ;;  %v7795_v17 = vld [vmem:[#allocation53_spill] sm:$0xff] }
 0x3d3   : > { %v6544_v49 = vpop.permute.xlu0 %2067  ;;  %2249 = vrot.lane.b32.xlu1 %v5987_v47, %s4745_s30  ;;  %4417 = vmatmul.mubr.f32.gmra.mrb[62].mxu0 %v2915_v32 }
 0x3d4   : > { %7762 = vst [vmem:[#allocation147_spill] sm:$0xff] %v6544_v49 }
 0x3d5   : > { %2247 = vrot.lane.b32.xlu0 %v5991_v5, %s4745_s30  ;;  %v6550_v1 = vpop.permute.xlu1 %2073 }
 0x3d6   : > { %7763 = vst [vmem:[#allocation148_spill] sm:$0xff] %v6550_v1 }
 0x3d7   : > { %v6552_v26 = vpop.permute.xlu0 %2071  ;;  %2317 = vrot.lane.b32.xlu1 %v5625_v14, %s4745_s30 }
 0x3d8   : > { %7764 = vst [vmem:[#allocation149_spill] sm:$0xff] %v6552_v26  ;;  %v4394_v19 = vpop.f32.mrb[46].mxu0 }
 0x3d9   : > { %v3081_v31 = vadd.f32 %v4394_v19, %v6424_v22  ;;  %2315 = vrot.lane.b32.xlu0 %v5631_v55, %s4745_s30  ;;  %v6559_v42 = vpop.permute.xlu1 %2077  ;;  %v3075_v60 = vpop.f32.mrb[47].mxu0 }
 0x3da   : > { %7765 = vst [vmem:[#allocation150_spill] sm:$0xff] %v6559_v42  ;;  %v3076_v32 = vadd.f32 %v6424_v22, %v3075_v60 }
 0x3db   : > { %v6562_v62 = vpop.permute.xlu0 %2075  ;;  %2321 = vrot.lane.b32.xlu1 %v5664_v30, %s4745_s30  ;;  %v3179_v36 = vmax.f32 %v3081_v31, 0.0 }
 0x3dc   : > { %7766 = vst [vmem:[#allocation151_spill] sm:$0xff] %v6562_v62  ;;  %v3178_v43 = vmax.f32 %v3076_v32, 0.0 }
 0x3dd   : > { %2319 = vrot.lane.b32.xlu0 %v5672_v50, %s4745_s30  ;;  %v6568_v9 = vpop.permute.xlu1 %2081 }
 0x3de   : > { %7767 = vst [vmem:[#allocation152_spill] sm:$0xff] %v6568_v9  ;;  %4472 = vmatprep.mubr.f32.mxu1 %v3178_v43 }
 0x3df   : > { %v6570_v19 = vpop.permute.xlu0 %2079  ;;  %2325 = vrot.lane.b32.xlu1 %v5701_v12, %s4745_s30  ;;  %4473 = vmatmul.mubr.f32.gmra.mrb[46].mxu1 %v3179_v36 }
 0x3e0   : > { %7768 = vst [vmem:[#allocation153_spill] sm:$0xff] %v6570_v19 }
 0x3e1   : > { %2323 = vrot.lane.b32.xlu0 %v5708_v8, %s4745_s30  ;;  %v6576_v60 = vpop.permute.xlu1 %2085 }
 0x3e2   : > { %7769 = vst [vmem:[#allocation154_spill] sm:$0xff] %v6576_v60 }
 0x3e3   : > { %v6578_v62 = vpop.permute.xlu0 %2083  ;;  %2329 = vrot.lane.b32.xlu1 %v5724_v3, %s4745_s30 }
 0x3e4   : > { %7770 = vst [vmem:[#allocation155_spill] sm:$0xff] %v6578_v62 }
 0x3e5   : > { %2327 = vrot.lane.b32.xlu0 %v5728_v40, %s4745_s30  ;;  %v6584_v43 = vpop.permute.xlu1 %2089 }
 0x3e6   : > { %7771 = vst [vmem:[#allocation156_spill] sm:$0xff] %v6584_v43 }
 0x3e7   : > { %v6586_v31 = vpop.permute.xlu0 %2087  ;;  %2333 = vrot.lane.b32.xlu1 %v5747_v24, %s4745_s30 }
 0x3e8   : > { %7772 = vst [vmem:[#allocation157_spill] sm:$0xff] %v6586_v31 }
 0x3e9   : > { %2331 = vrot.lane.b32.xlu0 %v5753_v41, %s4745_s30  ;;  %v6592_v36 = vpop.permute.xlu1 %2093 }
 0x3ea   : > { %7773 = vst [vmem:[#allocation158_spill] sm:$0xff] %v6592_v36 }
 0x3eb   : > { %v6594_v32 = vpop.permute.xlu0 %2091  ;;  %2337 = vrot.lane.b32.xlu1 %v5775_v52, %s4745_s30 }
 0x3ec   : > { %7774 = vst [vmem:[#allocation159_spill] sm:$0xff] %v6594_v32 }
 0x3ed   : > { %2335 = vrot.lane.b32.xlu0 %v5779_v56, %s4745_s30  ;;  %v6600_v62 = vpop.permute.xlu1 %2097 }
 0x3ee   : > { %7775 = vst [vmem:[#allocation160_spill] sm:$0xff] %v6600_v62 }
 0x3ef   : > { %v6602_v43 = vpop.permute.xlu0 %2095  ;;  %2341 = vrot.lane.b32.xlu1 %v5794_v28, %s4745_s30 }
 0x3f0   : > { %7776 = vst [vmem:[#allocation161_spill] sm:$0xff] %v6602_v43 }
 0x3f1   : > { %2339 = vrot.lane.b32.xlu0 %v5798_v58, %s4745_s30  ;;  %v6608_v31 = vpop.permute.xlu1 %2101  ;;  %v4397_v36 = vpop.f32.mrb[48].mxu0 }
 0x3f2   : > { %7777 = vst [vmem:[#allocation162_spill] sm:$0xff] %v6608_v31  ;;  %v3091_v32 = vadd.f32 %v4397_v36, %v6424_v22  ;;  %v3085_v60 = vpop.f32.mrb[49].mxu0  ;;  %v7794_v31 = vld [vmem:[#allocation50_spill] sm:$0xff] }
 0x3f3   : > { %v3086_v19 = vadd.f32 %v6424_v22, %v3085_v60  ;;  %v6612_v9 = vpop.permute.xlu0 %2099  ;;  %2345 = vrot.lane.b32.xlu1 %v5828_v51, %s4745_s30 }
 0x3f4   : > { %7778 = vst [vmem:[#allocation163_spill] sm:$0xff] %v6612_v9  ;;  %v3181_v42 = vmax.f32 %v3091_v32, 0.0 }
 0x3f5   : > { %v3180_v43 = vmax.f32 %v3086_v19, 0.0  ;;  %2343 = vrot.lane.b32.xlu0 %v5832_v16, %s4745_s30  ;;  %v6618_v62 = vpop.permute.xlu1 %2105 }
 0x3f6   : > { %7779 = vst [vmem:[#allocation164_spill] sm:$0xff] %v6618_v62  ;;  %v7790_v62 = vld [vmem:[#allocation48_spill] sm:$0xff] }
 0x3f7   : > { %v6620_v26 = vpop.permute.xlu0 %2103  ;;  %2349 = vrot.lane.b32.xlu1 %v5880_v21, %s4745_s30  ;;  %4475 = vmatprep.mubr.f32.mxu1 %v3180_v43  ;;  %v7785_v43 = vld [vmem:[#allocation43_spill] sm:$0xff] }
 0x3f8   : > { %7780 = vst [vmem:[#allocation165_spill] sm:$0xff] %v6620_v26  ;;  %4476 = vmatmul.mubr.f32.gmra.mrb[48].mxu1 %v3181_v42  ;;  %v7786_v42 = vld [vmem:[#allocation44_spill] sm:$0xff] }
 0x3f9   : > { %2347 = vrot.lane.b32.xlu0 %v5884_v13, %s4745_s30  ;;  %v6626_v60 = vpop.permute.xlu1 %2109 }
 0x3fa   : > { %7781 = vst [vmem:[#allocation166_spill] sm:$0xff] %v6626_v60 }
 0x3fb   : > { %v6628_v36 = vpop.permute.xlu0 %2107  ;;  %2353 = vrot.lane.b32.xlu1 %v5999_v59, %s4745_s30 }
 0x3fc   : > { %7782 = vst [vmem:[#allocation167_spill] sm:$0xff] %v6628_v36  ;;  %v7789_v36 = vld [vmem:[#allocation46_spill] sm:$0xff] }
 0x3fd   : > { %2351 = vrot.lane.b32.xlu0 %v6003_v35, %s4745_s30  ;;  %v6634_v19 = vpop.permute.xlu1 %2113 }
 0x3fe   : > { %7783 = vst [vmem:[#allocation168_spill] sm:$0xff] %v6634_v19 }
 0x3ff   : > { %v6636_v32 = vpop.permute.xlu0 %2111  ;;  %2357 = vrot.lane.b32.xlu1 %v7785_v43, %s4745_s30 }
 0x400   : > { %7784 = vst [vmem:[#allocation169_spill] sm:$0xff] %v6636_v32  ;;  %v7793_v32 = vld [vmem:[#allocation49_spill] sm:$0xff] }
 0x401   : > { %2355 = vrot.lane.b32.xlu0 %v7786_v42, %s4745_s30  ;;  %v6642_v26 = vpop.permute.xlu1 %2117 }
 0x402   : > { %7787 = vst [vmem:[#allocation43_spill] sm:$0xff] %v6642_v26 }
 0x403   : > { %v6644_v60 = vpop.permute.xlu0 %2115  ;;  %2361 = vrot.lane.b32.xlu1 %v7789_v36, %s4745_s30  ;;  %v7799_v36 = vld [vmem:[#allocation56_spill] sm:$0xff] }
 0x404   : > { %7788 = vst [vmem:[#allocation170_spill] sm:$0xff] %v6644_v60 }
 0x405   : > { %2359 = vrot.lane.b32.xlu0 %v7790_v62, %s4745_s30  ;;  %v6650_v9 = vpop.permute.xlu1 %2121 }
 0x406   : > { %7791 = vst [vmem:[#allocation171_spill] sm:$0xff] %v6650_v9 }
 0x407   : > { %v6652_v19 = vpop.permute.xlu0 %2119  ;;  %2365 = vrot.lane.b32.xlu1 %v7793_v32, %s4745_s30 }
 0x408   : > { %7792 = vst [vmem:[#allocation172_spill] sm:$0xff] %v6652_v19  ;;  %v7796_v19 = vld [vmem:[#allocation54_spill] sm:$0xff] }
 0x409   : > { %2363 = vrot.lane.b32.xlu0 %v7794_v31, %s4745_s30  ;;  %v6658_v1 = vpop.permute.xlu1 %2189 }
 0x40a   : > { %v4400_v26 = vpop.f32.mrb[50].mxu0 }
 0x40b   : > { %v3101_v60 = vadd.f32 %v4400_v26, %v6424_v22  ;;  %v6661_v49 = vpop.permute.xlu0 %2187  ;;  %2369 = vrot.lane.b32.xlu1 %v7795_v17, %s4745_s30  ;;  %v3095_v62 = vpop.f32.mrb[51].mxu0 }
 0x40c   : > { %v3096_v9 = vadd.f32 %v6424_v22, %v3095_v62 }
 0x40d   : > { %2367 = vrot.lane.b32.xlu0 %v7796_v19, %s4745_s30  ;;  %v6668_v32 = vpop.permute.xlu1 %2193  ;;  %v3183_v31 = vmax.f32 %v3101_v60, 0.0  ;;  %v7802_v19 = vld [vmem:[#allocation59_spill] sm:$0xff] }
 0x40e   : > { %7797 = vst [vmem:[#allocation173_spill] sm:$0xff] %v6668_v32  ;;  %v3182_v27 = vmax.f32 %v3096_v9, 0.0 }
 0x40f   : > { %v6670_v63 = vpop.permute.xlu0 %2191  ;;  %2373 = vrot.lane.b32.xlu1 %v7799_v36, %s4745_s30 }
 0x410   : > { %7798 = vst [vmem:[#allocation174_spill] sm:$0xff] %v6670_v63  ;;  %4478 = vmatprep.mubr.f32.mxu1 %v3182_v27  ;;  %v7837_v63 = vld [vmem:[#allocation10_spill] sm:$0xff] }
 0x411   : > { %2371 = vrot.lane.b32.xlu0 %v7727_v10, %s4745_s30  ;;  %v6676_v26 = vpop.permute.xlu1 %2197  ;;  %4479 = vmatmul.mubr.f32.gmra.mrb[50].mxu1 %v3183_v31 }
 0x412   : > { %7800 = vst [vmem:[#allocation175_spill] sm:$0xff] %v6676_v26 }
 0x413   : > { %v6678_v62 = vpop.permute.xlu0 %2195  ;;  %2377 = vrot.lane.b32.xlu1 %v7802_v19, %s4745_s30 }
 0x414   : > { %7801 = vst [vmem:[#allocation176_spill] sm:$0xff] %v6678_v62 }
 0x415   : > { %2375 = vrot.lane.b32.xlu0 %v7731_v11, %s4745_s30  ;;  %v6684_v9 = vpop.permute.xlu1 %2201 }
 0x416   : > { %7803 = vst [vmem:[#allocation177_spill] sm:$0xff] %v6684_v9 }
 0x417   : > { %v6686_v60 = vpop.permute.xlu0 %2199 }
 0x418   : > { %7804 = vst [vmem:[#allocation178_spill] sm:$0xff] %v6686_v60 }
 0x419   : > { %v6688_v36 = vpop.permute.xlu1 %2205 }
 0x41a   : > { %7805 = vst [vmem:[#allocation179_spill] sm:$0xff] %v6688_v36 }
 0x41b   : > { %v6690_v27 = vpop.permute.xlu0 %2203 }
 0x41c   : > { %7806 = vst [vmem:[#allocation180_spill] sm:$0xff] %v6690_v27 }
 0x41d   : > { %v6692_v10 = vpop.permute.xlu1 %2209 }
 0x41e   : > { %7807 = vst [vmem:[#allocation181_spill] sm:$0xff] %v6692_v10 }
 0x41f   : > { %v6694_v26 = vpop.permute.xlu0 %2207 }
 0x420   : > { %7808 = vst [vmem:[#allocation182_spill] sm:$0xff] %v6694_v26 }
 0x421   : > { %v6696_v31 = vpop.permute.xlu1 %2213 }
 0x422   : > { %7809 = vst [vmem:[#allocation183_spill] sm:$0xff] %v6696_v31 }
 0x423   : > { %v6698_v17 = vpop.permute.xlu0 %2211  ;;  %v4403_v19 = vpop.f32.mrb[52].mxu0 }
 0x424   : > { %7810 = vst [vmem:[#allocation184_spill] sm:$0xff] %v6698_v17  ;;  %v3111_v62 = vadd.f32 %v4403_v19, %v6424_v22  ;;  %v3105_v11 = vpop.f32.mrb[53].mxu0 }
 0x425   : > { %v3106_v9 = vadd.f32 %v6424_v22, %v3105_v11  ;;  %v6702_v32 = vpop.permute.xlu1 %2217 }
 0x426   : > { %7811 = vst [vmem:[#allocation185_spill] sm:$0xff] %v6702_v32  ;;  %v3185_v27 = vmax.f32 %v3111_v62, 0.0  ;;  %v7822_v62 = vld [vmem:[#allocation33_spill] sm:$0xff] }
 0x427   : > { %v3184_v60 = vmax.f32 %v3106_v9, 0.0  ;;  %v6704_v36 = vpop.permute.xlu0 %2215 }
 0x428   : > { %7812 = vst [vmem:[#allocation186_spill] sm:$0xff] %v6704_v36  ;;  %v7829_v36 = vld [vmem:[#allocation38_spill] sm:$0xff] }
 0x429   : > { %v6706_v42 = vpop.permute.xlu1 %2221  ;;  %4481 = vmatprep.mubr.f32.mxu1 %v3184_v60  ;;  %v1740_v60 = vadd.f32 %v5613_v38, %v7822_v62 }
 0x42a   : > { %7813 = vst [vmem:[#allocation187_spill] sm:$0xff] %v6706_v42  ;;  %4482 = vmatmul.mubr.f32.gmra.mrb[52].mxu1 %v3185_v27  ;;  %v7823_v27 = vld [vmem:[#allocation34_spill] sm:$0xff] }
 0x42b   : > { %v6708_v10 = vpop.permute.xlu0 %2219  ;;  %v1739_v42 = vadd.f32 %v7823_v27, %v5617_v61  ;;  %v7830_v27 = vld [vmem:[#allocation41_spill] sm:$0xff]  ;;  %v7835_v61 = vld [vmem:[#allocation7_spill] sm:$0xff] }
 0x42c   : > { %7814 = vst [vmem:[#allocation188_spill] sm:$0xff] %v6708_v10  ;;  %v6748_v38 = vadd.f32 %v7830_v27, %v5664_v30 }
 0x42d   : > { %v6710_v31 = vpop.permute.xlu1 %2225 }
 0x42e   : > { %7815 = vst [vmem:[#allocation189_spill] sm:$0xff] %v6710_v31  ;;  %v7824_v31 = vld [vmem:[#allocation35_spill] sm:$0xff]  ;;  %7831 = vst [vmem:[#allocation34_spill] sm:$0xff] %v6748_v38 }
 0x42f   : > { %v6712_v17 = vpop.permute.xlu0 %2223  ;;  %v6730_v10 = vadd.f32 %v7824_v31, %v5625_v14  ;;  %v7832_v14 = vld [vmem:[#allocation42_spill] sm:$0xff] }
 0x430   : > { %7816 = vst [vmem:[#allocation190_spill] sm:$0xff] %v6712_v17  ;;  %v6752_v31 = vadd.f32 %v7832_v14, %v5672_v50  ;;  %v7842_v50 = vld [vmem:[#allocation52_spill] sm:$0xff] }
 0x431   : > { %v6714_v19 = vpop.permute.xlu1 %2229  ;;  %v6771_v14 = vadd.f32 %v7842_v50, %v5708_v8  ;;  %v7852_v8 = vld [vmem:[#allocation63_spill] sm:$0xff] }
 0x432   : > { %7817 = vst [vmem:[#allocation191_spill] sm:$0xff] %v6714_v19  ;;  %v7825_v19 = vld [vmem:[#allocation36_spill] sm:$0xff]  ;;  %7833 = vst [vmem:[#allocation35_spill] sm:$0xff] %v6752_v31  ;;  %v7843_v31 = vld [vmem:[#allocation55_spill] sm:$0xff]  ;;  %v6792_v50 = vadd.f32 %v5690_v46, %v7852_v8 }
 0x433   : > { %v6716_v26 = vpop.permute.xlu0 %2227  ;;  %v6734_v17 = vadd.f32 %v7825_v19, %v5631_v55  ;;  %v7834_v19 = vld [vmem:[#allocation45_spill] sm:$0xff]  ;;  %v7860_v46 = vld [vmem:[#allocation14_spill] sm:$0xff] }
 0x434   : > { %7818 = vst [vmem:[#allocation192_spill] sm:$0xff] %v6716_v26 }
 0x435   : > { %v6718_v11 = vpop.permute.xlu1 %2233 }
 0x436   : > { %7819 = vst [vmem:[#allocation193_spill] sm:$0xff] %v6718_v11  ;;  %v7827_v11 = vld [vmem:[#allocation37_spill] sm:$0xff] }
 0x437   : > { %v6720_v9 = vpop.permute.xlu0 %2231 }
 0x438   : > { %7820 = vst [vmem:[#allocation194_spill] sm:$0xff] %v6720_v9  ;;  %v6740_v9 = vadd.f32 %v5627_v57, %v7827_v11  ;;  %v7838_v11 = vld [vmem:[#allocation47_spill] sm:$0xff] }
 0x439   : > { %v6722_v32 = vpop.permute.xlu1 %2237  ;;  %v6760_v57 = vadd.f32 %v7838_v11, %v7837_v63  ;;  %v7847_v11 = vld [vmem:[#allocation57_spill] sm:$0xff] }
 0x43a   : > { %7821 = vst [vmem:[#allocation195_spill] sm:$0xff] %v6722_v32  ;;  %v7828_v32 = vld [vmem:[#allocation6_spill] sm:$0xff] }
 0x43b   : > { %v6736_v26 = vpop.permute.xlu0 %2235  ;;  %v6744_v62 = vadd.f32 %v7829_v36, %v7828_v32  ;;  %v7839_v36 = vld [vmem:[#allocation51_spill] sm:$0xff] }
 0x43c   : > { %7826 = vst [vmem:[#allocation33_spill] sm:$0xff] %v6736_v26  ;;  %v4406_v55 = vpop.f32.mrb[54].mxu0  ;;  %v6756_v26 = vadd.f32 %v7835_v61, %v7834_v19  ;;  %v6764_v32 = vadd.f32 %v7839_v36, %v5701_v12  ;;  %v7844_v19 = vld [vmem:[#allocation8_spill] sm:$0xff]  ;;  %v7848_v36 = vld [vmem:[#allocation61_spill] sm:$0xff] }
 0x43d   : > { %v3121_v30 = vadd.f32 %v4406_v55, %v6424_v22  ;;  %v6767_v27 = vpop.permute.xlu1 %2241  ;;  %v3115_v38 = vpop.f32.mrb[55].mxu0  ;;  %v6775_v61 = vadd.f32 %v7844_v19, %v7843_v31  ;;  %v6784_v55 = vadd.f32 %v7848_v36, %v5724_v3  ;;  %v7853_v31 = vld [vmem:[#allocation12_spill] sm:$0xff]  ;;  %v7857_v3 = vld [vmem:[#allocation66_spill] sm:$0xff] }
 0x43e   : > { %7836 = vst [vmem:[#allocation36_spill] sm:$0xff] %v6756_v26  ;;  %7840 = vst [vmem:[#allocation37_spill] sm:$0xff] %v6764_v32  ;;  %v7846_v26 = vld [vmem:[#allocation9_spill] sm:$0xff]  ;;  %v3116_v12 = vadd.f32 %v6424_v22, %v3115_v38  ;;  %v7854_v19 = vld [vmem:[#allocation64_spill] sm:$0xff]  ;;  %v6806_v36 = vadd.f32 %v7857_v3, %v5753_v41 }
 0x43f   : > { %7841 = vst [vmem:[#allocation38_spill] sm:$0xff] %v6767_v27  ;;  %7845 = vst [vmem:[#allocation41_spill] sm:$0xff] %v6775_v61  ;;  %v6779_v63 = vadd.f32 %v7847_v11, %v7846_v26  ;;  %v7850_v27 = vld [vmem:[#allocation62_spill] sm:$0xff]  ;;  %v6796_v61 = vadd.f32 %v7854_v19, %v7853_v31  ;;  %v6798_v11 = vpop.permute.xlu0 %2239  ;;  %v7856_v38 = vld [vmem:[#allocation65_spill] sm:$0xff] }
 0x440   : > { %7849 = vst [vmem:[#allocation42_spill] sm:$0xff] %v6784_v55  ;;  %v6788_v32 = vadd.f32 %v7850_v27, %v5728_v40  ;;  %7855 = vst [vmem:[#allocation47_spill] sm:$0xff] %v6798_v11  ;;  %v6802_v26 = vadd.f32 %v7856_v38, %v5747_v24  ;;  %v7858_v40 = vld [vmem:[#allocation67_spill] sm:$0xff]  ;;  %v7859_v27 = vld [vmem:[#allocation13_spill] sm:$0xff]  ;;  %v3186_v8 = vmax.f32 %v3116_v12, 0.0  ;;  %v3187_v11 = vmax.f32 %v3121_v30, 0.0 }
 0x441   : > { %v6810_v22 = vadd.f32 %v7859_v27, %v7858_v40  ;;  %v7862_v19 = vld [vmem:[#allocation69_spill] sm:$0xff]  ;;  %v7863_v24 = vld [vmem:[#allocation70_spill] sm:$0xff]  ;;  %v6824_v41 = vpop.permute.xlu1 %2245  ;;  %v7865_v3 = vld [vmem:[#allocation71_spill] sm:$0xff] }
 0x442   : > { %7851 = vst [vmem:[#allocation45_spill] sm:$0xff] %v6788_v32  ;;  %v7861_v32 = vld [vmem:[#allocation68_spill] sm:$0xff]  ;;  %v6818_v31 = vadd.f32 %v7862_v19, %v5775_v52  ;;  %v6822_v38 = vadd.f32 %v7863_v24, %v5779_v56  ;;  %7864 = vst [vmem:[#allocation51_spill] sm:$0xff] %v6824_v41  ;;  %v6828_v40 = vadd.f32 %v5734_v23, %v7865_v3  ;;  %v7868_v52 = vld [vmem:[#allocation74_spill] sm:$0xff]  ;;  %4484 = vmatprep.mubr.f32.mxu1 %v3186_v8 }
 0x443   : > { %v6814_v55 = vadd.f32 %v7861_v32, %v7860_v46  ;;  %v7866_v12 = vld [vmem:[#allocation72_spill] sm:$0xff]  ;;  %v7867_v32 = vld [vmem:[#allocation73_spill] sm:$0xff]  ;;  %v6840_v19 = vadd.f32 %v7868_v52, %v5798_v58  ;;  %v7869_v56 = vld [vmem:[#allocation75_spill] sm:$0xff]  ;;  %4485 = vmatmul.mubr.f32.gmra.mrb[54].mxu1 %v3187_v11 }
 0x444   : > { %v6832_v27 = vadd.f32 %v7866_v12, %v5736_v39  ;;  %v6836_v46 = vadd.f32 %v7867_v32, %v5794_v28  ;;  %v6844_v30 = vadd.f32 %v5804_v4, %v7869_v56  ;;  %v7870_v24 = vld [vmem:[#allocation76_spill] sm:$0xff]  ;;  %v7871_v12 = vld [vmem:[#allocation77_spill] sm:$0xff]  ;;  %v7872_v28 = vld [vmem:[#allocation78_spill] sm:$0xff]  ;;  %v6858_v39 = vpop.permute.xlu0 %2243 }
 0x445   : > { %v6848_v3 = vadd.f32 %v7870_v24, %v5815_v53  ;;  %v6852_v23 = vadd.f32 %v7871_v12, %v5828_v51  ;;  %v6856_v32 = vadd.f32 %v7872_v28, %v5832_v16  ;;  %7873 = vst [vmem:[#allocation52_spill] sm:$0xff] %v6858_v39  ;;  %v7874_v58 = vld [vmem:[#allocation79_spill] sm:$0xff]  ;;  %v7875_v52 = vld [vmem:[#allocation80_spill] sm:$0xff]  ;;  %v7876_v24 = vld [vmem:[#allocation81_spill] sm:$0xff] }
 0x446   : > { %v6862_v8 = vadd.f32 %v5862_v44, %v7874_v58  ;;  %v6866_v56 = vadd.f32 %v7875_v52, %v5872_v33  ;;  %v6870_v4 = vadd.f32 %v7876_v24, %v5880_v21  ;;  %v7877_v51 = vld [vmem:[#allocation111_spill] sm:$0xff]  ;;  %v7878_v16 = vld [vmem:[#allocation82_spill] sm:$0xff]  ;;  %v7880_v58 = vld [vmem:[#allocation84_spill] sm:$0xff]  ;;  %v6889_v21 = vpop.permute.xlu1 %2249 }
 0x447   : > { %v2028_v12 = vadd.f32 %v7877_v51, %v1740_v60  ;;  %v6875_v28 = vadd.f32 %v7878_v16, %v5884_v13  ;;  %v7879_v53 = vld [vmem:[#allocation83_spill] sm:$0xff]  ;;  %v6883_v44 = vadd.f32 %v7880_v58, %v5900_v6  ;;  %v7881_v52 = vld [vmem:[#allocation85_spill] sm:$0xff]  ;;  %7882 = vst [vmem:[#allocation55_spill] sm:$0xff] %v6889_v21  ;;  %v7883_v60 = vld [vmem:[#allocation86_spill] sm:$0xff] }
 0x448   : > { %v6879_v11 = vadd.f32 %v5896_v34, %v7879_v53  ;;  %v6887_v33 = vadd.f32 %v5906_v15, %v7881_v52  ;;  %v6893_v24 = vadd.f32 %v7883_v60, %v5910_v45  ;;  %v7884_v13 = vld [vmem:[#allocation87_spill] sm:$0xff]  ;;  %v7885_v53 = vld [vmem:[#allocation112_spill] sm:$0xff]  ;;  %v7887_v52 = vld [vmem:[#allocation89_spill] sm:$0xff] }
 0x449   : > { %v6897_v51 = vadd.f32 %v5916_v2, %v7884_v13  ;;  %v2027_v16 = vadd.f32 %v7885_v53, %v1739_v42  ;;  %v2284_v34 = vadd.f32 %v6658_v1, %v2028_v12  ;;  %v7886_v58 = vld [vmem:[#allocation88_spill] sm:$0xff]  ;;  %v6907_v15 = vadd.f32 %v5926_v20, %v7887_v52  ;;  %v7888_v21 = vld [vmem:[#allocation90_spill] sm:$0xff]  ;;  %v7889_v45 = vld [vmem:[#allocation91_spill] sm:$0xff]  ;;  %v6917_v2 = vpop.permute.xlu0 %2247 }
 0x44a   : > { %v6903_v6 = vadd.f32 %v7886_v58, %v5920_v7  ;;  %v6911_v60 = vadd.f32 %v7888_v21, %v5930_v54  ;;  %v6915_v13 = vadd.f32 %v5936_v37, %v7889_v45  ;;  %7891 = vst [vmem:[#allocation61_spill] sm:$0xff] %v6917_v2  ;;  %v7892_v1 = vld [vmem:[#allocation92_spill] sm:$0xff]  ;;  %v7893_v12 = vld [vmem:[#allocation93_spill] sm:$0xff]  ;;  %v2156_v58 = vadd.f32 %v6524_v0, %v6730_v10  ;;  %v7895_v52 = vld [vmem:[#allocation94_spill] sm:$0xff]  ;;  %v2318_v54 = vpop.permute.xlu1 %2317 }
 0x44b   : > { %v6921_v42 = vadd.f32 %v7892_v1, %v5940_v48  ;;  %v6925_v53 = vadd.f32 %v5959_v18, %v7893_v12  ;;  %v2283_v21 = vadd.f32 %v6661_v49, %v2027_v16  ;;  %v6932_v20 = vadd.f32 %v7895_v52, %v5963_v29  ;;  %v7897_v45 = vld [vmem:[#allocation95_spill] sm:$0xff]  ;;  %v7899_v1 = vld [vmem:[#allocation96_spill] sm:$0xff]  ;;  %v7901_v12 = vld [vmem:[#allocation97_spill] sm:$0xff] }
 0x44c   : > { %7890 = vst [vmem:[#allocation57_spill] sm:$0xff] %v6915_v13  ;;  %v6936_v37 = vadd.f32 %v5987_v47, %v7897_v45  ;;  %v6940_v48 = vadd.f32 %v7899_v1, %v5991_v5  ;;  %v6944_v18 = vadd.f32 %v7901_v12, %v5999_v59  ;;  %v7902_v10 = vld [vmem:[#allocation114_spill] sm:$0xff]  ;;  %v2155_v49 = vadd.f32 %v6526_v25, %v6734_v17  ;;  %v7904_v1 = vld [vmem:[#allocation99_spill] sm:$0xff]  ;;  %v7905_v59 = vld [vmem:[#allocation113_spill] sm:$0xff] }
 0x44d   : > { %7894 = vst [vmem:[#allocation62_spill] sm:$0xff] %v6925_v53  ;;  %7896 = vst [vmem:[#allocation63_spill] sm:$0xff] %v6932_v20  ;;  %v2029_v0 = vadd.f32 %v7902_v10, %v6744_v62  ;;  %v2444_v16 = vmul.f32 %v2284_v34, %v2284_v34  ;;  %v2412_v52 = vadd.f32 %v2318_v54, %v2156_v58  ;;  %v7903_v45 = vld [vmem:[#allocation98_spill] sm:$0xff]  ;;  %v2316_v29 = vpop.permute.xlu0 %2315  ;;  %v7907_v34 = vld [vmem:[#allocation44_spill] sm:$0xff] }
 0x44e   : > { %7898 = vst [vmem:[#allocation64_spill] sm:$0xff] %v6936_v37  ;;  %7900 = vst [vmem:[#allocation65_spill] sm:$0xff] %v6940_v48  ;;  %v6952_v47 = vadd.f32 %v7903_v45, %v6003_v35  ;;  %v6956_v5 = vadd.f32 %v7904_v1, %v7785_v43  ;;  %v2030_v12 = vadd.f32 %v7905_v59, %v6740_v9  ;;  %v7906_v62 = vld [vmem:[#allocation174_spill] sm:$0xff]  ;;  %v7908_v54 = vld [vmem:[#allocation100_spill] sm:$0xff]  ;;  %v2322_v59 = vpop.permute.xlu1 %2321 }
 0x44f   : > { %v2443_v7 = vmul.f32 %v2283_v21, %v2283_v21  ;;  %v2285_v10 = vadd.f32 %v7906_v62, %v2029_v0  ;;  %v2411_v2 = vadd.f32 %v2316_v29, %v2155_v49  ;;  %v2476_v17 = vsub.f32 %v2444_v16, %v2412_v52  ;;  %v7909_v35 = vld [vmem:[#allocation46_spill] sm:$0xff]  ;;  %v7910_v58 = vld [vmem:[#allocation101_spill] sm:$0xff]  ;;  %v7912_v1 = vld [vmem:[#allocation144_spill] sm:$0xff] }
 0x450   : > { %v6963_v25 = vadd.f32 %v7908_v54, %v7907_v34  ;;  %v6967_v45 = vadd.f32 %v7910_v58, %v7909_v35  ;;  %v7911_v43 = vld [vmem:[#allocation34_spill] sm:$0xff]  ;;  %v7913_v48 = vld [vmem:[#allocation173_spill] sm:$0xff]  ;;  %v7914_v21 = vld [vmem:[#allocation116_spill] sm:$0xff] }
 0x451   : > { %v2158_v41 = vadd.f32 %v7912_v1, %v7911_v43  ;;  %v2286_v9 = vadd.f32 %v7913_v48, %v2030_v12  ;;  %v2031_v39 = vadd.f32 %v7914_v21, %v6760_v57  ;;  %v7915_v0 = vld [vmem:[#allocation35_spill] sm:$0xff]  ;;  %v7916_v29 = vld [vmem:[#allocation145_spill] sm:$0xff]  ;;  %v2511_v16 = vsel %vm2507_vm0, %v2476_v17, 0.0  ;;  %v7917_v62 = vld [vmem:[#allocation48_spill] sm:$0xff]  ;;  %v2320_v53 = vpop.permute.xlu0 %2319 }
 0x452   : > { %v2157_v49 = vadd.f32 %v7916_v29, %v7915_v0  ;;  %v2475_v52 = vsub.f32 %v2443_v7, %v2411_v2  ;;  %v7918_v34 = vld [vmem:[#allocation102_spill] sm:$0xff]  ;;  %v7919_v35 = vld [vmem:[#allocation49_spill] sm:$0xff]  ;;  %v7920_v58 = vld [vmem:[#allocation103_spill] sm:$0xff]  ;;  %2512 = vadd.xlane.f32.xlu1 %v2511_v16  ;;  %v2445_v57 = vmul.f32 %v2285_v10, %v2285_v10 }
 0x453   : > { %v6979_v54 = vadd.f32 %v7918_v34, %v7917_v62  ;;  %v6983_v37 = vadd.f32 %v7920_v58, %v7919_v35  ;;  %v7922_v43 = vld [vmem:[#allocation36_spill] sm:$0xff]  ;;  %v7923_v48 = vld [vmem:[#allocation115_spill] sm:$0xff]  ;;  %v2414_v1 = vadd.f32 %v2322_v59, %v2158_v41  ;;  %v7925_v7 = vld [vmem:[#allocation50_spill] sm:$0xff]  ;;  %v2446_v41 = vmul.f32 %v2286_v9, %v2286_v9  ;;  %v2326_v59 = vpop.permute.xlu1 %2325 }
 0x454   : > { %v2032_v12 = vadd.f32 %v7923_v48, %v7922_v43  ;;  %v7924_v21 = vld [vmem:[#allocation176_spill] sm:$0xff]  ;;  %v2413_v29 = vadd.f32 %v2320_v53, %v2157_v49  ;;  %v2508_v2 = vsel %vm2507_vm0, %v2475_v52, 0.0  ;;  %v7928_v34 = vld [vmem:[#allocation53_spill] sm:$0xff]  ;;  %v7931_v58 = vld [vmem:[#allocation118_spill] sm:$0xff] }
 0x455   : > { %7921 = vst [vmem:[#allocation66_spill] sm:$0xff] %v6983_v37  ;;  %v2287_v0 = vadd.f32 %v7924_v21, %v2031_v39  ;;  %v7926_v17 = vld [vmem:[#allocation104_spill] sm:$0xff]  ;;  %v7929_v20 = vld [vmem:[#allocation105_spill] sm:$0xff]  ;;  %v2033_v43 = vadd.f32 %v7931_v58, %v6779_v63  ;;  %2509 = vadd.xlane.f32.xlu0 %v2508_v2  ;;  %v7933_v16 = vld [vmem:[#allocation146_spill] sm:$0xff]  ;;  %v2324_v2 = vpop.permute.xlu0 %2323  ;;  %v2478_v58 = vsub.f32 %v2446_v41, %v2414_v1  ;;  %v4409_v1 = vpop.f32.mrb[56].mxu0 }
 0x456   : > { %v6991_v62 = vadd.f32 %v7926_v17, %v7925_v7  ;;  %v6995_v35 = vadd.f32 %v7929_v20, %v7928_v34  ;;  %v7932_v10 = vld [vmem:[#allocation37_spill] sm:$0xff]  ;;  %v7934_v53 = vld [vmem:[#allocation147_spill] sm:$0xff]  ;;  %v2477_v21 = vsub.f32 %v2445_v57, %v2413_v29  ;;  %v7936_v7 = vld [vmem:[#allocation54_spill] sm:$0xff] }
 0x457   : > { %v2160_v39 = vadd.f32 %v7933_v16, %v7932_v10  ;;  %v2159_v49 = vadd.f32 %v7934_v53, %v6771_v14  ;;  %v7935_v52 = vld [vmem:[#allocation175_spill] sm:$0xff]  ;;  %v7937_v17 = vld [vmem:[#allocation106_spill] sm:$0xff]  ;;  %v7938_v20 = vld [vmem:[#allocation41_spill] sm:$0xff] }
 0x458   : > { %7927 = vst [vmem:[#allocation67_spill] sm:$0xff] %v6991_v62  ;;  %7930 = vst [vmem:[#allocation68_spill] sm:$0xff] %v6995_v35  ;;  %v2288_v48 = vadd.f32 %v7935_v52, %v2032_v12  ;;  %v7006_v13 = vadd.f32 %v7937_v17, %v7936_v7  ;;  %v7939_v34 = vld [vmem:[#allocation117_spill] sm:$0xff]  ;;  %v7940_v63 = vld [vmem:[#allocation178_spill] sm:$0xff]  ;;  %v2447_v62 = vmul.f32 %v2287_v0, %v2287_v0  ;;  %v2514_v16 = vsel %vm2507_vm0, %v2477_v21, 0.0  ;;  %v3125_v21 = vpop.f32.mrb[57].mxu0 }
 0x459   : > { %v2034_v35 = vadd.f32 %v7939_v34, %v7938_v20  ;;  %v2289_v9 = vadd.f32 %v7940_v63, %v2033_v43  ;;  %v2416_v37 = vadd.f32 %v2326_v59, %v2160_v39  ;;  %v2415_v10 = vadd.f32 %v2324_v2, %v2159_v49  ;;  %v7941_v14 = vld [vmem:[#allocation119_spill] sm:$0xff]  ;;  %v7942_v57 = vld [vmem:[#allocation120_spill] sm:$0xff]  ;;  %v7943_v53 = vld [vmem:[#allocation42_spill] sm:$0xff]  ;;  %2515 = vadd.xlane.f32.xlu0 %v2514_v16  ;;  %v2330_v43 = vpop.permute.xlu1 %2329 }
 0x45a   : > { %v2036_v12 = vadd.f32 %v7941_v14, %v6792_v50  ;;  %v2035_v29 = vadd.f32 %v7942_v57, %v6796_v61  ;;  %v7944_v52 = vld [vmem:[#allocation148_spill] sm:$0xff]  ;;  %v7945_v17 = vld [vmem:[#allocation45_spill] sm:$0xff]  ;;  %v2448_v0 = vmul.f32 %v2288_v48, %v2288_v48  ;;  %v7948_v39 = vld [vmem:[#allocation123_spill] sm:$0xff]  ;;  %v2328_v57 = vpop.permute.xlu0 %2327 }
 0x45b   : > { %v2162_v7 = vadd.f32 %v7944_v52, %v7943_v53  ;;  %v7946_v20 = vld [vmem:[#allocation149_spill] sm:$0xff]  ;;  %v3131_v49 = vadd.f32 %v4409_v1, %v7948_v39  ;;  %v2479_v63 = vsub.f32 %v2447_v62, %v2415_v10  ;;  %v2449_v50 = vmul.f32 %v2289_v9, %v2289_v9  ;;  %v7949_v2 = vld [vmem:[#allocation180_spill] sm:$0xff]  ;;  %v7950_v48 = vld [vmem:[#allocation122_spill] sm:$0xff] }
 0x45c   : > { %v2161_v34 = vadd.f32 %v7946_v20, %v7945_v17  ;;  %v7947_v41 = vld [vmem:[#allocation177_spill] sm:$0xff]  ;;  %v2291_v14 = vadd.f32 %v7949_v2, %v2035_v29  ;;  %v3126_v61 = vadd.f32 %v7948_v39, %v3125_v21  ;;  %v2517_v53 = vsel %vm2507_vm0, %v2478_v58, 0.0  ;;  %v7951_v1 = vld [vmem:[#allocation150_spill] sm:$0xff]  ;;  %v7952_v62 = vld [vmem:[#allocation179_spill] sm:$0xff] }
 0x45d   : > { %v2290_v59 = vadd.f32 %v7947_v41, %v2034_v35  ;;  %v2418_v52 = vadd.f32 %v2330_v43, %v2162_v7  ;;  %v2520_v16 = vsel %vm2507_vm0, %v2479_v63, 0.0  ;;  %v2480_v20 = vsub.f32 %v2448_v0, %v2416_v37  ;;  %2518 = vadd.xlane.f32.xlu0 %v2517_v53  ;;  %v2334_v29 = vpop.permute.xlu1 %2333  ;;  %v7953_v21 = vld [vmem:[#allocation151_spill] sm:$0xff]  ;;  %v7954_v37 = vld [vmem:[#allocation121_spill] sm:$0xff] }
 0x45e   : > { %v2417_v17 = vadd.f32 %v2328_v57, %v2161_v34  ;;  %v2037_v35 = vadd.f32 %v7950_v48, %v6814_v55  ;;  %v2164_v41 = vadd.f32 %v7951_v1, %v6802_v26  ;;  %v2292_v9 = vadd.f32 %v7952_v62, %v2036_v12  ;;  %2521 = vadd.xlane.f32.xlu1 %v2520_v16  ;;  %v7955_v55 = vld [vmem:[#allocation182_spill] sm:$0xff]  ;;  %v2332_v26 = vpop.permute.xlu0 %2331  ;;  %v7959_v48 = vld [vmem:[#allocation152_spill] sm:$0xff]  ;;  %v7960_v1 = vld [vmem:[#allocation153_spill] sm:$0xff] }
 0x45f   : > { %v3188_v10 = vmax.f32 %v3126_v61, 0.0  ;;  %v2163_v58 = vadd.f32 %v7953_v21, %v6806_v36  ;;  %v2450_v7 = vmul.f32 %v2290_v59, %v2290_v59  ;;  %v3189_v34 = vmax.f32 %v3131_v49, 0.0  ;;  %v7956_v36 = vld [vmem:[#allocation56_spill] sm:$0xff]  ;;  %v7957_v59 = vld [vmem:[#allocation107_spill] sm:$0xff] }
 0x460   : > { %v2481_v43 = vsub.f32 %v2449_v50, %v2417_v17  ;;  %v2038_v0 = vadd.f32 %v7954_v37, %v6810_v22  ;;  %v2451_v63 = vmul.f32 %v2291_v14, %v2291_v14  ;;  %v2293_v2 = vadd.f32 %v7955_v55, %v2037_v35  ;;  %v7958_v50 = vld [vmem:[#allocation125_spill] sm:$0xff]  ;;  %v7964_v55 = vld [vmem:[#allocation58_spill] sm:$0xff] }
 0x461   : > { %v2420_v57 = vadd.f32 %v2334_v29, %v2164_v41  ;;  %4487 = vmatprep.mubr.f32.mxu1 %v3188_v10  ;;  %v2419_v12 = vadd.f32 %v2332_v26, %v2163_v58  ;;  %v2523_v61 = vsel %vm2507_vm0, %v2480_v20, 0.0  ;;  %v2482_v16 = vsub.f32 %v2450_v7, %v2418_v52  ;;  %v2338_v17 = vpop.permute.xlu1 %2337  ;;  %v7961_v41 = vld [vmem:[#allocation181_spill] sm:$0xff]  ;;  %v7962_v10 = vld [vmem:[#allocation124_spill] sm:$0xff] }
 0x462   : > { %4488 = vmatmul.mubr.f32.gmra.mrb[56].mxu1 %v3189_v34  ;;  %v2526_v53 = vsel %vm2507_vm0, %v2481_v43, 0.0  ;;  %v7040_v49 = vadd.f32 %v7957_v59, %v7956_v36  ;;  %v2039_v22 = vadd.f32 %v7958_v50, %v6832_v27  ;;  %v2452_v14 = vmul.f32 %v2292_v9, %v2292_v9  ;;  %2524 = vadd.xlane.f32.xlu0 %v2523_v61  ;;  %v7963_v58 = vld [vmem:[#allocation184_spill] sm:$0xff]  ;;  %v2336_v27 = vpop.permute.xlu0 %2335  ;;  %v7970_v50 = vld [vmem:[#allocation126_spill] sm:$0xff] }
 0x463   : > { %2527 = vadd.xlane.f32.xlu1 %v2526_v53  ;;  %v2166_v35 = vadd.f32 %v7959_v48, %v6818_v31  ;;  %v2165_v20 = vadd.f32 %v7960_v1, %v6822_v38  ;;  %v2294_v62 = vadd.f32 %v7961_v41, %v2038_v0  ;;  %v2483_v52 = vsub.f32 %v2451_v63, %v2419_v12  ;;  %v7965_v26 = vld [vmem:[#allocation108_spill] sm:$0xff]  ;;  %v7966_v0 = vld [vmem:[#allocation127_spill] sm:$0xff] }
 0x464   : > { %v2040_v29 = vadd.f32 %v7962_v10, %v6828_v40  ;;  %v2453_v21 = vmul.f32 %v2293_v2, %v2293_v2  ;;  %v2295_v7 = vadd.f32 %v7963_v58, %v2039_v22  ;;  %v2484_v9 = vsub.f32 %v2452_v14, %v2420_v57  ;;  %v7967_v40 = vld [vmem:[#allocation154_spill] sm:$0xff]  ;;  %v7968_v57 = vld [vmem:[#allocation155_spill] sm:$0xff]  ;;  %v7975_v58 = vld [vmem:[#allocation128_spill] sm:$0xff] }
 0x465   : > { %v2422_v34 = vadd.f32 %v2338_v17, %v2166_v35  ;;  %v2421_v43 = vadd.f32 %v2336_v27, %v2165_v20  ;;  %v2529_v37 = vsel %vm2507_vm0, %v2482_v16, 0.0  ;;  %v2532_v31 = vsel %vm2507_vm0, %v2483_v52, 0.0  ;;  %v2342_v12 = vpop.permute.xlu1 %2341  ;;  %v7969_v16 = vld [vmem:[#allocation183_spill] sm:$0xff]  ;;  %v7971_v17 = vld [vmem:[#allocation186_spill] sm:$0xff]  ;;  %v7973_v52 = vld [vmem:[#allocation156_spill] sm:$0xff] }
 0x466   : > { %v7056_v38 = vadd.f32 %v7965_v26, %v7964_v55  ;;  %v2041_v63 = vadd.f32 %v7966_v0, %v6848_v3  ;;  %v2168_v2 = vadd.f32 %v7967_v40, %v6836_v46  ;;  %2530 = vadd.xlane.f32.xlu0 %v2529_v37  ;;  %v2167_v61 = vadd.f32 %v7968_v57, %v6840_v19  ;;  %v2340_v3 = vpop.permute.xlu0 %2339  ;;  %v7972_v19 = vld [vmem:[#allocation129_spill] sm:$0xff]  ;;  %v7978_v55 = vld [vmem:[#allocation188_spill] sm:$0xff] }
 0x467   : > { %2533 = vadd.xlane.f32.xlu1 %v2532_v31  ;;  %v2454_v53 = vmul.f32 %v2294_v62, %v2294_v62  ;;  %v2296_v36 = vadd.f32 %v7969_v16, %v2040_v29  ;;  %v2485_v59 = vsub.f32 %v2453_v21, %v2421_v43  ;;  %v2042_v22 = vadd.f32 %v7970_v50, %v6844_v30  ;;  %v7974_v29 = vld [vmem:[#allocation185_spill] sm:$0xff]  ;;  %v7981_v16 = vld [vmem:[#allocation130_spill] sm:$0xff] }
 0x468   : > { %v2455_v14 = vmul.f32 %v2295_v7, %v2295_v7  ;;  %v2297_v48 = vadd.f32 %v7971_v17, %v2041_v63  ;;  %v2535_v35 = vsel %vm2507_vm0, %v2484_v9, 0.0  ;;  %v2424_v46 = vadd.f32 %v2342_v12, %v2168_v2  ;;  %v7976_v27 = vld [vmem:[#allocation157_spill] sm:$0xff] }
 0x469   : > { %v2423_v1 = vadd.f32 %v2340_v3, %v2167_v61  ;;  %v2538_v20 = vsel %vm2507_vm0, %v2485_v59, 0.0  ;;  %v2486_v41 = vsub.f32 %v2454_v53, %v2422_v34  ;;  %v2043_v62 = vadd.f32 %v7972_v19, %v6866_v56  ;;  %v2346_v30 = vpop.permute.xlu1 %2345  ;;  %v7977_v34 = vld [vmem:[#allocation131_spill] sm:$0xff] }
 0x46a   : > { %v2170_v10 = vadd.f32 %v7973_v52, %v6852_v23  ;;  %v2298_v21 = vadd.f32 %v7974_v29, %v2042_v22  ;;  %2536 = vadd.xlane.f32.xlu0 %v2535_v35  ;;  %v2044_v7 = vadd.f32 %v7975_v58, %v6862_v8  ;;  %v2169_v9 = vadd.f32 %v7976_v27, %v6856_v32  ;;  %v2344_v0 = vpop.permute.xlu0 %2343  ;;  %v7979_v8 = vld [vmem:[#allocation158_spill] sm:$0xff]  ;;  %v7980_v61 = vld [vmem:[#allocation187_spill] sm:$0xff]  ;;  %v7989_v58 = vld [vmem:[#allocation189_spill] sm:$0xff] }
 0x46b   : > { %2539 = vadd.xlane.f32.xlu1 %v2538_v20  ;;  %v2456_v43 = vmul.f32 %v2296_v36, %v2296_v36  ;;  %v2487_v37 = vsub.f32 %v2455_v14, %v2423_v1  ;;  %v2045_v31 = vadd.f32 %v7977_v34, %v6883_v44  ;;  %v2457_v56 = vmul.f32 %v2297_v48, %v2297_v48  ;;  %v7982_v59 = vld [vmem:[#allocation159_spill] sm:$0xff]  ;;  %v7983_v22 = vld [vmem:[#allocation190_spill] sm:$0xff]  ;;  %v7984_v48 = vld [vmem:[#allocation132_spill] sm:$0xff] }
 0x46c   : > { %v2299_v26 = vadd.f32 %v7978_v55, %v2043_v62  ;;  %v2426_v23 = vadd.f32 %v2346_v30, %v2170_v10  ;;  %v2425_v63 = vadd.f32 %v2344_v0, %v2169_v9  ;;  %v2541_v40 = vsel %vm2507_vm0, %v2486_v41, 0.0  ;;  %v7987_v10 = vld [vmem:[#allocation160_spill] sm:$0xff] }
 0x46d   : > { %v2544_v2 = vsel %vm2507_vm0, %v2487_v37, 0.0  ;;  %v2488_v12 = vsub.f32 %v2456_v43, %v2424_v46  ;;  %v2172_v57 = vadd.f32 %v7979_v8, %v6870_v4  ;;  %v2458_v32 = vmul.f32 %v2298_v21, %v2298_v21  ;;  %v2350_v44 = vpop.permute.xlu1 %2349  ;;  %v7985_v4 = vld [vmem:[#allocation133_spill] sm:$0xff]  ;;  %v7990_v37 = vld [vmem:[#allocation192_spill] sm:$0xff]  ;;  %v7993_v8 = vld [vmem:[#allocation191_spill] sm:$0xff] }
 0x46e   : > { %v2300_v53 = vadd.f32 %v7980_v61, %v2044_v7  ;;  %2542 = vadd.xlane.f32.xlu0 %v2541_v40  ;;  %v2046_v36 = vadd.f32 %v7981_v16, %v6879_v11  ;;  %v2171_v50 = vadd.f32 %v7982_v59, %v6875_v28  ;;  %v2301_v14 = vadd.f32 %v7983_v22, %v2045_v31  ;;  %v2348_v1 = vpop.permute.xlu0 %2347  ;;  %v7986_v28 = vld [vmem:[#allocation134_spill] sm:$0xff]  ;;  %v4412_v9 = vpop.f32.mrb[58].mxu0  ;;  %v7994_v61 = vld [vmem:[#allocation163_spill] sm:$0xff] }
 0x46f   : > { %2545 = vadd.xlane.f32.xlu1 %v2544_v2  ;;  %v2489_v17 = vsub.f32 %v2457_v56, %v2425_v63  ;;  %v2048_v3 = vadd.f32 %v7984_v48, %v6887_v33  ;;  %v2047_v35 = vadd.f32 %v7985_v4, %v6893_v24  ;;  %v2428_v46 = vadd.f32 %v2350_v44, %v2172_v57  ;;  %v7988_v24 = vld [vmem:[#allocation161_spill] sm:$0xff]  ;;  %v7991_v63 = vld [vmem:[#allocation135_spill] sm:$0xff]  ;;  %v7992_v2 = vld [vmem:[#allocation162_spill] sm:$0xff] }
 0x470   : > { %v2490_v20 = vsub.f32 %v2458_v32, %v2426_v23  ;;  %v2459_v41 = vmul.f32 %v2299_v26, %v2299_v26  ;;  %v2427_v19 = vadd.f32 %v2348_v1, %v2171_v50  ;;  %v2547_v62 = vsel %vm2507_vm0, %v2488_v12, 0.0  ;;  %v7995_v59 = vld [vmem:[#allocation194_spill] sm:$0xff]  ;;  %v7996_v4 = vld [vmem:[#allocation59_spill] sm:$0xff] }
 0x471   : > { %v2550_v11 = vsel %vm2507_vm0, %v2489_v17, 0.0  ;;  %v2050_v52 = vadd.f32 %v7986_v28, %v6897_v51  ;;  %v2174_v29 = vadd.f32 %v7987_v10, %v6944_v18  ;;  %v2460_v21 = vmul.f32 %v2300_v53, %v2300_v53  ;;  %v2354_v33 = vpop.permute.xlu1 %2353  ;;  %v3135_v51 = vpop.f32.mrb[59].mxu0  ;;  %v8001_v10 = vld [vmem:[#allocation193_spill] sm:$0xff] }
 0x472   : > { %2548 = vadd.xlane.f32.xlu0 %v2547_v62  ;;  %v2173_v30 = vadd.f32 %v7988_v24, %v6952_v47  ;;  %v2302_v7 = vadd.f32 %v7989_v58, %v2046_v36  ;;  %v2461_v27 = vmul.f32 %v2301_v14, %v2301_v14  ;;  %v2491_v43 = vsub.f32 %v2459_v41, %v2427_v19  ;;  %v2352_v56 = vpop.permute.xlu0 %2351  ;;  %v7999_v19 = vld [vmem:[#allocation164_spill] sm:$0xff]  ;;  %v8003_v58 = vld [vmem:[#allocation33_spill] sm:$0xff] }
 0x473   : > { %2551 = vadd.xlane.f32.xlu1 %v2550_v11  ;;  %v2303_v34 = vadd.f32 %v7990_v37, %v2047_v35  ;;  %v2430_v31 = vadd.f32 %v2354_v33, %v2174_v29  ;;  %v2553_v55 = vsel %vm2507_vm0, %v2490_v20, 0.0  ;;  %v2492_v18 = vsub.f32 %v2460_v21, %v2428_v46  ;;  %v7997_v35 = vld [vmem:[#allocation109_spill] sm:$0xff]  ;;  %v8002_v33 = vld [vmem:[#allocation136_spill] sm:$0xff] }
 0x474   : > { %v3141_v26 = vadd.f32 %v4412_v9, %v7948_v39  ;;  %v2429_v23 = vadd.f32 %v2352_v56, %v2173_v30  ;;  %v3136_v0 = vadd.f32 %v7948_v39, %v3135_v51  ;;  %v2556_v47 = vsel %vm2507_vm0, %v2491_v43, 0.0  ;;  %v8000_v11 = vld [vmem:[#allocation165_spill] sm:$0xff]  ;;  %v8007_v51 = vld [vmem:[#allocation66_spill] sm:$0xff] }
 0x475   : > { %v2049_v40 = vadd.f32 %v7991_v63, %v6903_v6  ;;  %v2176_v12 = vadd.f32 %v7992_v2, %v6956_v5  ;;  %v2304_v57 = vadd.f32 %v7993_v8, %v2048_v3  ;;  %v2358_v32 = vpop.permute.xlu1 %2357  ;;  %v2175_v53 = vadd.f32 %v7994_v61, %v6963_v25  ;;  %v7998_v25 = vld [vmem:[#allocation137_spill] sm:$0xff]  ;;  %v8011_v63 = vld [vmem:[#allocation195_spill] sm:$0xff]  ;;  %v8013_v8 = vld [vmem:[#allocation138_spill] sm:$0xff] }
 0x476   : > { %2554 = vadd.xlane.f32.xlu0 %v2553_v55  ;;  %v2462_v44 = vmul.f32 %v2302_v7, %v2302_v7  ;;  %v3190_v16 = vmax.f32 %v3136_v0, 0.0  ;;  %v2493_v36 = vsub.f32 %v2461_v27, %v2429_v23  ;;  %v2463_v39 = vmul.f32 %v2303_v34, %v2303_v34  ;;  %v2356_v14 = vpop.permute.xlu0 %2355  ;;  %v8004_v34 = vld [vmem:[#allocation60_spill] sm:$0xff]  ;;  %v8010_v23 = vld [vmem:[#allocation167_spill] sm:$0xff] }
 0x477   : > { %2557 = vadd.xlane.f32.xlu1 %v2556_v47  ;;  %v2305_v50 = vadd.f32 %v7995_v59, %v2049_v40  ;;  %v2432_v22 = vadd.f32 %v2358_v32, %v2176_v12  ;;  %v2559_v6 = vsel %vm2507_vm0, %v2492_v18, 0.0  ;;  %v3191_v17 = vmax.f32 %v3141_v26, 0.0  ;;  %v8009_v26 = vld [vmem:[#allocation67_spill] sm:$0xff]  ;;  %v8012_v12 = vld [vmem:[#allocation57_spill] sm:$0xff] }
 0x478   : > { %v2431_v5 = vadd.f32 %v2356_v14, %v2175_v53  ;;  %4490 = vmatprep.mubr.f32.mxu1 %v3190_v16  ;;  %v2562_v48 = vsel %vm2507_vm0, %v2493_v36, 0.0  ;;  %v2494_v3 = vsub.f32 %v2462_v44, %v2430_v31  ;;  %v7122_v46 = vadd.f32 %v7997_v35, %v7996_v4  ;;  %v8014_v61 = vld [vmem:[#allocation47_spill] sm:$0xff]  ;;  %v8019_v4 = vld [vmem:[#allocation38_spill] sm:$0xff] }
 0x479   : > { %v2051_v1 = vadd.f32 %v7998_v25, %v6911_v60  ;;  %v2464_v20 = vmul.f32 %v2304_v57, %v2304_v57  ;;  %v2362_v41 = vpop.permute.xlu1 %2361  ;;  %v2178_v62 = vadd.f32 %v7999_v19, %v6967_v45  ;;  %v2177_v28 = vadd.f32 %v8000_v11, %v6979_v54  ;;  %4491 = vmatmul.mubr.f32.gmra.mrb[58].mxu1 %v3191_v17  ;;  %v8005_v54 = vld [vmem:[#allocation110_spill] sm:$0xff]  ;;  %v8015_v14 = vld [vmem:[#allocation63_spill] sm:$0xff]  ;;  %v8022_v19 = vld [vmem:[#allocation169_spill] sm:$0xff] }
 0x47a   : > { %2560 = vadd.xlane.f32.xlu0 %v2559_v6  ;;  %v2306_v29 = vadd.f32 %v8001_v10, %v2050_v52  ;;  %v2495_v21 = vsub.f32 %v2463_v39, %v2431_v5  ;;  %v2052_v24 = vadd.f32 %v8002_v33, %v6907_v15  ;;  %v2465_v30 = vmul.f32 %v2305_v50, %v2305_v50  ;;  %v2360_v7 = vpop.permute.xlu0 %2359  ;;  %v8006_v52 = vld [vmem:[#allocation139_spill] sm:$0xff]  ;;  %v8008_v15 = vld [vmem:[#allocation166_spill] sm:$0xff]  ;;  %v8016_v6 = vld [vmem:[#allocation141_spill] sm:$0xff] }
 0x47b   : > { %2563 = vadd.xlane.f32.xlu1 %v2562_v48  ;;  %v2307_v60 = vadd.f32 %v8003_v58, %v2051_v1  ;;  %v2496_v27 = vsub.f32 %v2464_v20, %v2432_v22  ;;  %v2434_v9 = vadd.f32 %v2362_v41, %v2178_v62  ;;  %v2433_v43 = vadd.f32 %v2360_v7, %v2177_v28  ;;  %v7150_v44 = vpop.f32.mrb[32].mxu1  ;;  %v8017_v5 = vld [vmem:[#allocation68_spill] sm:$0xff]  ;;  %v8020_v1 = vld [vmem:[#allocation62_spill] sm:$0xff] }
 0x47c   : > { %v2565_v37 = vsel %vm2507_vm0, %v2494_v3, 0.0  ;;  %v2568_v45 = vsel %vm2507_vm0, %v2495_v21, 0.0  ;;  %v7138_v31 = vadd.f32 %v8005_v54, %v8004_v34  ;;  %v2053_v56 = vadd.f32 %v8006_v52, %v6921_v42  ;;  %v7153_v59 = vpop.f32.mrb[33].mxu1  ;;  %v8018_v48 = vld [vmem:[#allocation168_spill] sm:$0xff]  ;;  %v8027_v34 = vld [vmem:[#allocation143_spill] sm:$0xff] }
 0x47d   : > { %v2180_v55 = vadd.f32 %v8008_v15, %v8007_v51  ;;  %v2366_v18 = vpop.permute.xlu1 %2365  ;;  %v2179_v0 = vadd.f32 %v8010_v23, %v8009_v26  ;;  %v2466_v47 = vmul.f32 %v2306_v29, %v2306_v29  ;;  %v2308_v40 = vadd.f32 %v8011_v63, %v2052_v24  ;;  %v8021_v20 = vld [vmem:[#allocation140_spill] sm:$0xff]  ;;  %v8024_v29 = vld [vmem:[#allocation142_spill] sm:$0xff]  ;;  %v8028_v52 = vld [vmem:[#allocation43_spill] sm:$0xff] }
 0x47e   : > { %2566 = vadd.xlane.f32.xlu0 %v2565_v37  ;;  %v2497_v2 = vsub.f32 %v2465_v30, %v2433_v43  ;;  %v2054_v57 = vadd.f32 %v8013_v8, %v8012_v12  ;;  %v2467_v32 = vmul.f32 %v2307_v60, %v2307_v60  ;;  %v2309_v53 = vadd.f32 %v8014_v61, %v2053_v56  ;;  %v2364_v42 = vpop.permute.xlu0 %2363  ;;  %v8023_v10 = vld [vmem:[#allocation64_spill] sm:$0xff]  ;;  %v8030_v26 = vld [vmem:[#allocation51_spill] sm:$0xff]  ;;  %v8033_v8 = vld [vmem:[#allocation61_spill] sm:$0xff] }
 0x47f   : > { %2569 = vadd.xlane.f32.xlu1 %v2568_v45  ;;  %v2571_v16 = vsel %vm2507_vm0, %v2496_v27, 0.0  ;;  %v2436_v36 = vadd.f32 %v2366_v18, %v2180_v55  ;;  %v2435_v39 = vadd.f32 %v2364_v42, %v2179_v0  ;;  %v2498_v22 = vsub.f32 %v2466_v47, %v2434_v9  ;;  %v8025_v24 = vld [vmem:[#allocation52_spill] sm:$0xff]  ;;  %v7168_v7 = vpop.f32.mrb[34].mxu1  ;;  %v8026_v45 = vld [vmem:[#allocation65_spill] sm:$0xff]  ;;  %v8029_v55 = vld [vmem:[#allocation170_spill] sm:$0xff] }
 0x480   : > { %v2574_v50 = vsel %vm2507_vm0, %v2497_v2, 0.0  ;;  %v2055_v17 = vadd.f32 %v8016_v6, %v8015_v14  ;;  %v2182_v3 = vadd.f32 %v8018_v48, %v8017_v5  ;;  %v2310_v35 = vadd.f32 %v8019_v4, %v2054_v57  ;;  %v7170_v9 = vpop.f32.mrb[35].mxu1  ;;  %v8031_v0 = vld [vmem:[#allocation55_spill] sm:$0xff] }
 0x481   : > { %v2370_v25 = vpop.permute.xlu1 %2369  ;;  %v2056_v41 = vadd.f32 %v8021_v20, %v8020_v1  ;;  %v2181_v62 = vadd.f32 %v8022_v19, %v7006_v13  ;;  %v2468_v11 = vmul.f32 %v2308_v40, %v2308_v40  ;;  %v2499_v28 = vsub.f32 %v2467_v32, %v2435_v39  ;;  %v8032_v40 = vld [vmem:[#allocation171_spill] sm:$0xff]  ;;  %v8034_v39 = vld [vmem:[#allocation172_spill] sm:$0xff] }
 0x482   : > { %2572 = vadd.xlane.f32.xlu0 %v2571_v16  ;;  %v2058_v21 = vadd.f32 %v8024_v29, %v8023_v10  ;;  %v2469_v33 = vmul.f32 %v2309_v53, %v2309_v53  ;;  %v2311_v30 = vadd.f32 %v8025_v24, %v2055_v17  ;;  %v2438_v58 = vadd.f32 %v2370_v25, %v2182_v3  ;;  %v2368_v60 = vpop.permute.xlu0 %2367 }
 0x483   : > { %2575 = vadd.xlane.f32.xlu1 %v2574_v50  ;;  %v2437_v27 = vadd.f32 %v2368_v60, %v2181_v62  ;;  %v2577_v43 = vsel %vm2507_vm0, %v2498_v22, 0.0  ;;  %v2580_v37 = vsel %vm2507_vm0, %v2499_v28, 0.0  ;;  %v2500_v13 = vsub.f32 %v2468_v11, %v2436_v36 }
 0x484   : > { %v2057_v54 = vadd.f32 %v8027_v34, %v8026_v45  ;;  %v2184_v56 = vadd.f32 %v8028_v52, %v7040_v49  ;;  %v2470_v51 = vmul.f32 %v2310_v35, %v2310_v35  ;;  %v2183_v18 = vadd.f32 %v8029_v55, %v7056_v38  ;;  %v4459_v49 = vpop.f32.mrb[36].mxu1 }
 0x485   : > { %v2374_v15 = vpop.permute.xlu1 %2373  ;;  %v2312_v23 = vadd.f32 %v8030_v26, %v2056_v41  ;;  %v2314_v47 = vadd.f32 %v8031_v0, %v2058_v21  ;;  %v2501_v63 = vsub.f32 %v2469_v33, %v2437_v27  ;;  %v2186_v2 = vadd.f32 %v8032_v40, %v7122_v46  ;;  %v3298_v16 = vpop.f32.mrb[37].mxu1  ;;  %v8035_v26 = vld [vmem:[#allocation4_spill] sm:$0xff] }
 0x486   : > { %2578 = vadd.xlane.f32.xlu0 %v2577_v43  ;;  %v2471_v12 = vmul.f32 %v2311_v30, %v2311_v30  ;;  %v2313_v57 = vadd.f32 %v8033_v8, %v2057_v54  ;;  %v2372_v32 = vpop.permute.xlu0 %2371  ;;  %v2502_v61 = vsub.f32 %v2470_v51, %v2438_v58  ;;  %v2440_v53 = vadd.f32 %v2374_v15, %v2184_v56 }
 0x487   : > { %2581 = vadd.xlane.f32.xlu1 %v2580_v37  ;;  %v2439_v42 = vadd.f32 %v2372_v32, %v2183_v18  ;;  %v2583_v36 = vsel %vm2507_vm0, %v2500_v13, 0.0  ;;  %v2586_v38 = vsel %vm2507_vm0, %v2501_v63, 0.0  ;;  %v2185_v50 = vadd.f32 %v8034_v39, %v7138_v31  ;;  %v4415_v3 = vpop.f32.mrb[60].mxu0  ;;  %v4729_v31 = vld [vmem:[%s7506_s5] ss:$0 sm:$0xff] }
 0x488   : > { %v2472_v46 = vmul.f32 %v2312_v23, %v2312_v23  ;;  %v2474_v14 = vmul.f32 %v2314_v47, %v2314_v47  ;;  %v2473_v5 = vmul.f32 %v2313_v57, %v2313_v57  ;;  %v2589_v4 = vsel %vm2507_vm0, %v2502_v61, 0.0  ;;  %v4462_v1 = vpop.f32.mrb[38].mxu1  ;;  %v3145_v20 = vpop.f32.mrb[61].mxu0 }
 0x489   : > { %v2378_v22 = vpop.permute.xlu1 %2377  ;;  %v2503_v17 = vsub.f32 %v2471_v12, %v2439_v42  ;;  %v3151_v62 = vadd.f32 %v4729_v31, %v4415_v3  ;;  %v3146_v11 = vadd.f32 %v4729_v31, %v3145_v20  ;;  %v3308_v28 = vpop.f32.mrb[39].mxu1  ;;  %v7219_v15 = vstv %s1481_s16  ;;  %v8037_v42 = vld [vmem:[#allocation10_spill] sm:$0xff] }
 0x48a   : > { %2584 = vadd.xlane.f32.xlu0 %v2583_v36  ;;  %v2442_v6 = vadd.f32 %v2378_v22, %v2186_v2  ;;  %v2376_v48 = vpop.permute.xlu0 %2375  ;;  %v2504_v19 = vsub.f32 %v2472_v46, %v2440_v53  ;;  %v1483_v23 = vadd.f32 %v7219_v15, %v8035_v26  ;;  %v8036_v2 = vld [vmem:[#allocation6_spill] sm:$0xff]  ;;  %v8038_v22 = vld [vmem:[#allocation9_spill] sm:$0xff] }
 0x48b   : > { %2587 = vadd.xlane.f32.xlu1 %v2586_v38  ;;  %v2441_v25 = vadd.f32 %v2376_v48, %v2185_v50  ;;  %v2592_v41 = vsel %vm2507_vm0, %v2503_v17, 0.0  ;;  %v3192_v21 = vmax.f32 %v3146_v11, 0.0  ;;  %v3193_v58 = vmax.f32 %v3151_v62, 0.0  ;;  %v8039_v48 = vld [vmem:[#allocation12_spill] sm:$0xff]  ;;  %v8040_v20 = vld [vmem:[#allocation14_spill] sm:$0xff] }
 0x48c   : > { %v2506_v35 = vsub.f32 %v2474_v14, %v2442_v6  ;;  %v4465_v33 = vpop.f32.mrb[40].mxu1  ;;  %v2595_v24 = vsel %vm2507_vm0, %v2504_v19, 0.0  ;;  %v1485_v12 = vadd.f32 %v7219_v15, %v8036_v2  ;;  %v1489_v46 = vadd.f32 %v7219_v15, %v8038_v22 }
 0x48d   : > { %v2505_v10 = vsub.f32 %v2473_v5, %v2441_v25  ;;  %v3318_v60 = vpop.f32.mrb[41].mxu1  ;;  %4493 = vmatprep.mubr.f32.mxu1 %v3192_v21  ;;  %v1491_v3 = vadd.f32 %v7219_v15, %v8039_v48 }
 0x48e   : > { %2590 = vadd.xlane.f32.xlu0 %v2589_v4  ;;  %v2601_v29 = vsel %vm2507_vm0, %v2506_v35, 0.0  ;;  %4494 = vmatmul.mubr.f32.gmra.mrb[60].mxu1 %v3193_v58 }
 0x48f   : > { %2593 = vadd.xlane.f32.xlu1 %v2592_v41  ;;  %v2598_v30 = vsel %vm2507_vm0, %v2505_v10, 0.0  ;;  %v1493_v41 = vadd.f32 %v7219_v15, %v8040_v20 }
 0x490   : > { %v4468_v27 = vpop.f32.mrb[42].mxu1 }
 0x491   : > { %v3328_v43 = vpop.f32.mrb[43].mxu1 }
 0x492   : > { %2596 = vadd.xlane.f32.xlu0 %v2595_v24 }
 0x493   : > { %2599 = vadd.xlane.f32.xlu1 %v2598_v30  ;;  %v8042_v30 = vld [vmem:[#allocation18_spill] sm:$0xff] }
 0x494   : > { %v1497_v58 = vadd.f32 %v7219_v15, %v8042_v30 }
 0x496   : > { %2602 = vadd.xlane.f32.xlu0 %v2601_v29 }
 0x499   : > { %v4471_v37 = vpop.f32.mrb[44].mxu1 }
 0x49a   : > { %v3338_v13 = vpop.f32.mrb[45].mxu1 }
 0x4a4   : > { %3501 = vrot.lane.b32.xlu1 %v7153_v59, %s4746_s15 }
 0x4a6   : > { %v4418_v45 = vpop.f32.mrb[62].mxu0 }
 0x4a7   : > { %v3161_v34 = vadd.f32 %v4729_v31, %v4418_v45  ;;  %v3155_v54 = vpop.f32.mrb[63].mxu0 }
 0x4a8   : > { %3507 = vrot.lane.b32.xlu1 %v7168_v7, %s4746_s15  ;;  %v3156_v52 = vadd.f32 %v4729_v31, %v3155_v54 }
 0x4a9   : > { %v3195_v51 = vmax.f32 %v3161_v34, 0.0  ;;  %v8043_v34 = vld [vmem:[#allocation20_spill] sm:$0xff] }
 0x4aa   : > { %v3194_v56 = vmax.f32 %v3156_v52, 0.0  ;;  %v1499_v54 = vadd.f32 %v7219_v15, %v8043_v34 }
 0x4ac   : > { %3505 = vrot.lane.b32.xlu1 %v7170_v9, %s4746_s15  ;;  %3503 = vrot.lane.b32.xlu0 %v7150_v44, %s4746_s15 }
 0x4ad   : > { %4496 = vmatprep.mubr.f32.mxu1 %v3194_v56 }
 0x4ae   : > { %4497 = vmatmul.mubr.f32.gmra.mrb[62].mxu1 %v3195_v51 }
 0x4b0   : > { %3511 = vrot.lane.b32.xlu1 %v4459_v49, %s4746_s15  ;;  %3509 = vrot.lane.b32.xlu0 %v3298_v16, %s4746_s15  ;;  %v1487_v16 = vadd.f32 %v7219_v15, %v8037_v42 }
 0x4b2   : > { %v4474_v59 = vpop.f32.mrb[46].mxu1 }
 0x4b3   : > { %v3348_v44 = vpop.f32.mrb[47].mxu1 }
 0x4b4   : > { %3515 = vrot.lane.b32.xlu1 %v4462_v1, %s4746_s15  ;;  %3513 = vrot.lane.b32.xlu0 %v3308_v28, %s4746_s15  ;;  %v8041_v28 = vld [vmem:[#allocation16_spill] sm:$0xff] }
 0x4b5   : > { %v1495_v10 = vadd.f32 %v7219_v15, %v8041_v28 }
 0x4b8   : > { %3519 = vrot.lane.b32.xlu1 %v4465_v33, %s4746_s15  ;;  %3517 = vrot.lane.b32.xlu0 %v3318_v60, %s4746_s15 }
 0x4bc   : > { %3523 = vrot.lane.b32.xlu1 %v4468_v27, %s4746_s15  ;;  %3521 = vrot.lane.b32.xlu0 %v3328_v43, %s4746_s15 }
 0x4c0   : > { %3527 = vrot.lane.b32.xlu1 %v4471_v37, %s4746_s15  ;;  %3525 = vrot.lane.b32.xlu0 %v3338_v13, %s4746_s15 }
 0x4c4   : > { %3531 = vrot.lane.b32.xlu1 %v4474_v59, %s4746_s15  ;;  %3529 = vrot.lane.b32.xlu0 %v3348_v44, %s4746_s15  ;;  %v8044_v44 = vld [vmem:[#allocation22_spill] sm:$0xff] }
 0x4cb   : > { %v4477_v7 = vpop.f32.mrb[48].mxu1 }
 0x4cc   : > { %v3358_v9 = vpop.f32.mrb[49].mxu1  ;;  %3535 = vrot.lane.b32.xlu1 %v4477_v7, %s4746_s15  ;;  %v1501_v7 = vadd.f32 %v7219_v15, %v8044_v44  ;;  %v8052_v44 = vld [vmem:[#allocation40_spill] sm:$0xff] }
 0x4cd   : > { %3533 = vrot.lane.b32.xlu0 %v3358_v9, %s4746_s15 }
 0x4df   : > { %v7225_v47 = vpop.xlane.xlu1 %2512 }
 0x4e2   : > { %v2510_v55 = vpop.xlane.xlu0 %2509 }
 0x4e3   : > { %v2604_v18 = vmul.f32 0.5, %v2510_v55 }
 0x4e4   : > { %v4480_v8 = vpop.f32.mrb[50].mxu1 }
 0x4e5   : > { %v7223_v0 = vadd.f32 %v2604_v18, %v1483_v23  ;;  %v3368_v57 = vpop.f32.mrb[51].mxu1  ;;  %3539 = vrot.lane.b32.xlu1 %v4480_v8, %s4746_s15  ;;  %v8045_v23 = vld [vmem:[#allocation24_spill] sm:$0xff] }
 0x4e6   : > { %v2516_v63 = vpop.xlane.xlu0 %2515  ;;  %3537 = vrot.lane.b32.xlu0 %v3368_v57, %s4746_s15  ;;  %v8046_v57 = vld [vmem:[#allocation26_spill] sm:$0xff] }
 0x4e7   : > { %v2606_v40 = vmul.f32 0.5, %v2516_v63  ;;  %v1503_v63 = vadd.f32 %v7219_v15, %v8045_v23 }
 0x4e9   : > { %v7230_v32 = vadd.f32 %v2606_v40, %v1485_v12 }
 0x4ea   : > { %v7232_v61 = vpop.xlane.xlu0 %2518 }
 0x4eb   : > { %v2522_v49 = vpop.xlane.xlu1 %2521 }
 0x4ec   : > { %v2608_v53 = vmul.f32 0.5, %v2522_v49  ;;  %v1505_v49 = vadd.f32 %v7219_v15, %v8046_v57 }
 0x4ee   : > { %v7237_v36 = vadd.f32 %v2608_v53, %v1487_v16 }
 0x4ef   : > { %v7239_v39 = vpop.xlane.xlu0 %2524 }
 0x4f0   : > { %v2528_v38 = vpop.xlane.xlu1 %2527 }
 0x4f1   : > { %v2610_v50 = vmul.f32 0.5, %v2528_v38 }
 0x4f3   : > { %v7243_v14 = vadd.f32 %v2610_v50, %v1489_v46  ;;  %v7245_v17 = vpop.xlane.xlu0 %2530  ;;  %v8047_v50 = vld [vmem:[#allocation28_spill] sm:$0xff] }
 0x4f4   : > { %v2534_v6 = vpop.xlane.xlu1 %2533  ;;  %v1507_v22 = vadd.f32 %v7219_v15, %v8047_v50 }
 0x4f5   : > { %v2612_v5 = vmul.f32 0.5, %v2534_v6 }
 0x4f7   : > { %v7249_v4 = vadd.f32 %v2612_v5, %v1491_v3  ;;  %v7251_v25 = vpop.xlane.xlu0 %2536  ;;  %v8048_v3 = vld [vmem:[#allocation30_spill] sm:$0xff] }
 0x4f8   : > { %v2540_v35 = vpop.xlane.xlu1 %2539 }
 0x4f9   : > { %v2614_v1 = vmul.f32 0.5, %v2540_v35  ;;  %v1509_v35 = vadd.f32 %v7219_v15, %v8048_v3 }
 0x4fb   : > { %v7255_v19 = vadd.f32 %v2614_v1, %v1493_v41  ;;  %v7257_v62 = vpop.xlane.xlu0 %2542 }
 0x4fc   : > { %v2546_v31 = vpop.xlane.xlu1 %2545 }
 0x4fd   : > { %v2616_v11 = vmul.f32 0.5, %v2546_v31  ;;  %v4483_v60 = vpop.f32.mrb[52].mxu1 }
 0x4fe   : > { %3543 = vrot.lane.b32.xlu1 %v4483_v60, %s4746_s15  ;;  %v3378_v45 = vpop.f32.mrb[53].mxu1 }
 0x4ff   : > { %v7261_v29 = vadd.f32 %v2616_v11, %v1495_v10  ;;  %v7263_v33 = vpop.xlane.xlu0 %2548  ;;  %3541 = vrot.lane.b32.xlu0 %v3378_v45, %s4746_s15  ;;  %v8049_v10 = vld [vmem:[#allocation29_spill] sm:$0xff] }
 0x500   : > { %v2552_v21 = vpop.xlane.xlu1 %2551 }
 0x501   : > { %v2618_v24 = vmul.f32 0.5, %v2552_v21  ;;  %v1510_v21 = vadd.f32 %v8049_v10, %v7219_v15 }
 0x503   : > { %v7267_v27 = vadd.f32 %v2618_v24, %v1497_v58  ;;  %v7269_v37 = vpop.xlane.xlu0 %2554  ;;  %v8050_v24 = vld [vmem:[#allocation32_spill] sm:$0xff] }
 0x504   : > { %v2558_v43 = vpop.xlane.xlu1 %2557  ;;  %v1511_v30 = vadd.f32 %v7219_v15, %v8050_v24  ;;  %v2607_v24 = vmul.f32 0.5, %v7232_v61 }
 0x505   : > { %v2620_v13 = vmul.f32 0.5, %v2558_v43 }
 0x507   : > { %v7275_v52 = vadd.f32 %v2620_v13, %v1499_v54  ;;  %v7277_v51 = vpop.xlane.xlu0 %2560 }
 0x508   : > { %v2564_v56 = vpop.xlane.xlu1 %2563 }
 0x509   : > { %v2622_v59 = vmul.f32 0.5, %v2564_v56  ;;  %v8051_v56 = vld [vmem:[#allocation31_spill] sm:$0xff] }
 0x50b   : > { %v7281_v9 = vadd.f32 %v2622_v59, %v1501_v7  ;;  %v7283_v18 = vpop.xlane.xlu0 %2566  ;;  %v1512_v59 = vadd.f32 %v8051_v56, %v7219_v15  ;;  %v1513_v7 = vadd.f32 %v7219_v15, %v8052_v44  ;;  %v2609_v56 = vmul.f32 0.5, %v7239_v39  ;;  %v8057_v39 = vld [vmem:[#allocation8_spill] sm:$0xff] }
 0x50c   : > { %v2570_v55 = vpop.xlane.xlu1 %2569 }
 0x50d   : > { %v2624_v26 = vmul.f32 0.5, %v2570_v55 }
 0x50f   : > { %v7287_v40 = vadd.f32 %v2624_v26, %v1503_v63  ;;  %v7289_v12 = vpop.xlane.xlu0 %2572 }
 0x510   : > { %v2576_v2 = vpop.xlane.xlu1 %2575 }
 0x511   : > { %v2626_v8 = vmul.f32 0.5, %v2576_v2  ;;  %v8053_v2 = vld [vmem:[#allocation39_spill] sm:$0xff] }
 0x513   : > { %v7293_v53 = vadd.f32 %v2626_v8, %v1505_v49  ;;  %v7295_v16 = vpop.xlane.xlu0 %2578  ;;  %v1514_v8 = vadd.f32 %v8053_v2, %v7219_v15 }
 0x514   : > { %v2582_v42 = vpop.xlane.xlu1 %2581 }
 0x515   : > { %v2628_v38 = vmul.f32 0.5, %v2582_v42 }
 0x516   : > { %v4486_v28 = vpop.f32.mrb[54].mxu1 }
 0x517   : > { %v7299_v46 = vadd.f32 %v2628_v38, %v1507_v22  ;;  %v7301_v5 = vpop.xlane.xlu0 %2584  ;;  %v3388_v58 = vpop.f32.mrb[55].mxu1  ;;  %3547 = vrot.lane.b32.xlu1 %v4486_v28, %s4746_s15 }
 0x518   : > { %v2588_v6 = vpop.xlane.xlu1 %2587  ;;  %3545 = vrot.lane.b32.xlu0 %v3388_v58, %s4746_s15 }
 0x519   : > { %v2630_v48 = vmul.f32 0.5, %v2588_v6 }
 0x51b   : > { %v7305_v1 = vadd.f32 %v2630_v48, %v1509_v35  ;;  %v2591_v41 = vpop.xlane.xlu0 %2590 }
 0x51c   : > { %v2594_v20 = vpop.xlane.xlu1 %2593  ;;  %v2631_v11 = vmul.f32 0.5, %v2591_v41 }
 0x51d   : > { %v2632_v31 = vmul.f32 0.5, %v2594_v20 }
 0x51e   : > { %v7313_v60 = vadd.f32 %v2631_v11, %v1510_v21  ;;  %v8054_v11 = vld [vmem:[#allocation3_spill] sm:$0xff] }
 0x51f   : > { %v7315_v43 = vadd.f32 %v2632_v31, %v1511_v30  ;;  %v2597_v45 = vpop.xlane.xlu0 %2596  ;;  %v2605_v31 = vmul.f32 0.5, %v7225_v47  ;;  %v1484_v28 = vadd.f32 %v8054_v11, %v7219_v15 }
 0x520   : > { %v2600_v13 = vpop.xlane.xlu1 %2599  ;;  %v2633_v54 = vmul.f32 0.5, %v2597_v45  ;;  %v8055_v45 = vld [vmem:[#allocation5_spill] sm:$0xff] }
 0x521   : > { %v2634_v34 = vmul.f32 0.5, %v2600_v13  ;;  %v3438_v30 = vadd.f32 %v2605_v31, %v1484_v28 }
 0x522   : > { %v7321_v55 = vadd.f32 %v2633_v54, %v1512_v59 }
 0x523   : > { %v7323_v26 = vadd.f32 %v2634_v34, %v1513_v7  ;;  %v2603_v23 = vpop.xlane.xlu0 %2602  ;;  %v1486_v34 = vadd.f32 %v8055_v45, %v7219_v15  ;;  %v8056_v7 = vld [vmem:[#allocation7_spill] sm:$0xff]  ;;  %v2619_v45 = vmul.f32 0.5, %v7269_v37 }
 0x524   : > { %v2635_v63 = vmul.f32 0.5, %v2603_v23  ;;  %v3502_v48 = vpop.permute.xlu1 %3501  ;;  %v1488_v23 = vadd.f32 %v8056_v7, %v7219_v15  ;;  %v8062_v37 = vld [vmem:[#allocation19_spill] sm:$0xff] }
 0x525   : > { %v3597_v47 = vadd.f32 %v3502_v48, %v7223_v0  ;;  %v3440_v59 = vadd.f32 %v2607_v24, %v1486_v34  ;;  %v8058_v48 = vld [vmem:[#allocation11_spill] sm:$0xff]  ;;  %v1500_v7 = vadd.f32 %v8062_v37, %v7219_v15 }
 0x526   : > { %v7327_v57 = vadd.f32 %v2635_v63, %v1514_v8  ;;  %v2611_v8 = vmul.f32 0.5, %v7245_v17 }
 0x527   : > { %v3504_v20 = vpop.permute.xlu0 %3503 }
 0x528   : > { %v3508_v3 = vpop.permute.xlu1 %3507  ;;  %v3598_v54 = vadd.f32 %v3504_v20, %v3438_v30  ;;  %v2615_v20 = vmul.f32 0.5, %v7257_v62  ;;  %v8060_v30 = vld [vmem:[#allocation15_spill] sm:$0xff] }
 0x529   : > { %v3600_v61 = vadd.f32 %v3508_v3, %v3440_v59  ;;  %v1492_v3 = vadd.f32 %v8058_v48, %v7219_v15  ;;  %v2621_v59 = vmul.f32 0.5, %v7277_v51  ;;  %v8063_v51 = vld [vmem:[#allocation21_spill] sm:$0xff]  ;;  %v2627_v48 = vmul.f32 0.5, %v7295_v16 }
 0x52b   : > { %v3510_v10 = vpop.permute.xlu0 %3509 }
 0x52c   : > { %v3506_v35 = vpop.permute.xlu1 %3505 }
 0x52d   : > { %v3599_v63 = vadd.f32 %v3506_v35, %v7230_v32 }
 0x52f   : > { %v3514_v44 = vpop.permute.xlu0 %3513 }
 0x530   : > { %v3512_v41 = vpop.permute.xlu1 %3511  ;;  %v3603_v35 = vadd.f32 %v3514_v44, %v7243_v14 }
 0x534   : > { %v3516_v13 = vpop.permute.xlu1 %3515 }
 0x535   : > { %v4489_v49 = vpop.f32.mrb[56].mxu1 }
 0x536   : > { %v3398_v42 = vpop.f32.mrb[57].mxu1  ;;  %3551 = vrot.lane.b32.xlu1 %v4489_v49, %s4746_s15  ;;  %v3442_v49 = vadd.f32 %v2609_v56, %v1488_v23 }
 0x537   : > { %3549 = vrot.lane.b32.xlu0 %v3398_v42, %s4746_s15  ;;  %v1490_v42 = vadd.f32 %v8057_v39, %v7219_v15 }
 0x538   : > { %v3520_v2 = vpop.permute.xlu1 %3519  ;;  %v3602_v0 = vadd.f32 %v3512_v41, %v3442_v49  ;;  %v3454_v49 = vadd.f32 %v2621_v59, %v1500_v7 }
 0x53c   : > { %v3524_v32 = vpop.permute.xlu1 %3523 }
 0x54c   : > { %v4492_v38 = vpop.f32.mrb[58].mxu1 }
 0x54d   : > { %v3408_v50 = vpop.f32.mrb[59].mxu1  ;;  %3555 = vrot.lane.b32.xlu1 %v4492_v38, %s4746_s15  ;;  %v3518_v38 = vpop.permute.xlu0 %3517 }
 0x54e   : > { %3553 = vrot.lane.b32.xlu0 %v3408_v50, %s4746_s15  ;;  %v3601_v50 = vadd.f32 %v3510_v10, %v7237_v36  ;;  %v3605_v28 = vadd.f32 %v3518_v38, %v7249_v4  ;;  %v3528_v10 = vpop.permute.xlu1 %3527  ;;  %v2625_v38 = vmul.f32 0.5, %v7289_v12 }
 0x551   : > { %v3522_v31 = vpop.permute.xlu0 %3521 }
 0x552   : > { %v3532_v4 = vpop.permute.xlu1 %3531 }
 0x555   : > { %v3526_v62 = vpop.permute.xlu0 %3525 }
 0x556   : > { %v3609_v56 = vadd.f32 %v3526_v62, %v7261_v29 }
 0x559   : > { %v3530_v44 = vpop.permute.xlu0 %3529 }
 0x55a   : > { %v3611_v23 = vadd.f32 %v3530_v44, %v7267_v27 }
 0x561   : > { %v4495_v22 = vpop.f32.mrb[60].mxu1 }
 0x562   : > { %v3418_v6 = vpop.f32.mrb[61].mxu1  ;;  %3559 = vrot.lane.b32.xlu1 %v4495_v22, %s4746_s15  ;;  %v2613_v22 = vmul.f32 0.5, %v7251_v25  ;;  %v8059_v25 = vld [vmem:[#allocation13_spill] sm:$0xff] }
 0x563   : > { %3557 = vrot.lane.b32.xlu0 %v3418_v6, %s4746_s15  ;;  %v3444_v6 = vadd.f32 %v2611_v8, %v1490_v42  ;;  %v1494_v11 = vadd.f32 %v8059_v25, %v7219_v15  ;;  %v3534_v8 = vpop.permute.xlu0 %3533 }
 0x564   : > { %v3446_v41 = vadd.f32 %v2613_v22, %v1492_v3  ;;  %v3613_v39 = vadd.f32 %v3534_v8, %v7275_v52  ;;  %v8064_v22 = vld [vmem:[#allocation23_spill] sm:$0xff] }
 0x565   : > { %v3604_v17 = vadd.f32 %v3516_v13, %v3444_v6  ;;  %v3448_v24 = vadd.f32 %v2615_v20, %v1494_v11  ;;  %v3607_v13 = vadd.f32 %v3522_v31, %v7255_v19  ;;  %v1504_v6 = vadd.f32 %v8064_v22, %v7219_v15  ;;  %v8066_v11 = vld [vmem:[#allocation27_spill] sm:$0xff] }
 0x566   : > { %v3606_v36 = vadd.f32 %v3520_v2, %v3446_v41  ;;  %v2623_v2 = vmul.f32 0.5, %v7283_v18 }
 0x567   : > { %v3608_v14 = vadd.f32 %v3524_v32, %v3448_v24  ;;  %v3538_v27 = vpop.permute.xlu0 %3537  ;;  %v3458_v3 = vadd.f32 %v2625_v38, %v1504_v6 }
 0x568   : > { %v3615_v32 = vadd.f32 %v3538_v27, %v7281_v9 }
 0x571   : > { %v3542_v52 = vpop.permute.xlu0 %3541 }
 0x572   : > { %v3617_v41 = vadd.f32 %v3542_v52, %v7287_v40 }
 0x581   : > { %v4498_v21 = vpop.f32.mrb[62].mxu1 }
 0x582   : > { %v3428_v58 = vpop.f32.mrb[63].mxu1  ;;  %3563 = vrot.lane.b32.xlu1 %v4498_v21, %s4746_s15  ;;  %v2617_v21 = vmul.f32 0.5, %v7263_v33 }
 0x583   : > { %3561 = vrot.lane.b32.xlu0 %v3428_v58, %s4746_s15  ;;  %v1496_v58 = vadd.f32 %v8060_v30, %v7219_v15 }
 0x585   : > { %v3450_v34 = vadd.f32 %v2617_v21, %v1496_v58 }
 0x586   : > { %3663 = vrot.lane.b32.xlu1 %v3598_v54, %s4747_s17  ;;  %v8061_v54 = vld [vmem:[#allocation17_spill] sm:$0xff] }
 0x587   : > { %3661 = vrot.lane.b32.xlu0 %v3597_v47, %s4747_s17  ;;  %v3610_v33 = vadd.f32 %v3528_v10, %v3450_v34  ;;  %v1498_v47 = vadd.f32 %v8061_v54, %v7219_v15 }
 0x58a   : > { %3667 = vrot.lane.b32.xlu1 %v3600_v61, %s4747_s17  ;;  %v3452_v61 = vadd.f32 %v2619_v45, %v1498_v47  ;;  %v3546_v9 = vpop.permute.xlu0 %3545 }
 0x58b   : > { %3665 = vrot.lane.b32.xlu0 %v3599_v63, %s4747_s17  ;;  %v3536_v63 = vpop.permute.xlu1 %3535  ;;  %v3619_v10 = vadd.f32 %v3546_v9, %v7293_v53 }
 0x58c   : > { %v3612_v19 = vadd.f32 %v3532_v4, %v3452_v61  ;;  %v3614_v29 = vadd.f32 %v3536_v63, %v3454_v49 }
 0x58e   : > { %3671 = vrot.lane.b32.xlu1 %v3602_v0, %s4747_s17  ;;  %v1502_v0 = vadd.f32 %v8063_v51, %v7219_v15 }
 0x58f   : > { %3669 = vrot.lane.b32.xlu0 %v3601_v50, %s4747_s17  ;;  %v3540_v42 = vpop.permute.xlu1 %3539 }
 0x590   : > { %v3456_v50 = vadd.f32 %v2623_v2, %v1502_v0 }
 0x592   : > { %3675 = vrot.lane.b32.xlu1 %v3604_v17, %s4747_s17  ;;  %v3616_v18 = vadd.f32 %v3540_v42, %v3456_v50 }
 0x593   : > { %3673 = vrot.lane.b32.xlu0 %v3603_v35, %s4747_s17  ;;  %v3544_v17 = vpop.permute.xlu1 %3543  ;;  %v8065_v35 = vld [vmem:[#allocation25_spill] sm:$0xff] }
 0x594   : > { %v3618_v12 = vadd.f32 %v3544_v17, %v3458_v3  ;;  %v1506_v20 = vadd.f32 %v8065_v35, %v7219_v15 }
 0x596   : > { %3679 = vrot.lane.b32.xlu1 %v3606_v36, %s4747_s17  ;;  %v2629_v36 = vmul.f32 0.5, %v7301_v5  ;;  %v3460_v25 = vadd.f32 %v2627_v48, %v1506_v20 }
 0x597   : > { %3677 = vrot.lane.b32.xlu0 %v3605_v28, %s4747_s17  ;;  %v3548_v31 = vpop.permute.xlu1 %3547  ;;  %v1508_v28 = vadd.f32 %v8066_v11, %v7219_v15 }
 0x598   : > { %v3620_v16 = vadd.f32 %v3548_v31, %v3460_v25 }
 0x599   : > { %v3462_v24 = vadd.f32 %v2629_v36, %v1508_v28 }
 0x59a   : > { %3683 = vrot.lane.b32.xlu1 %v3608_v14, %s4747_s17 }
 0x59b   : > { %3681 = vrot.lane.b32.xlu0 %v3607_v13, %s4747_s17 }
 0x59e   : > { %3687 = vrot.lane.b32.xlu1 %v3610_v33, %s4747_s17 }
 0x59f   : > { %3685 = vrot.lane.b32.xlu0 %v3609_v56, %s4747_s17 }
 0x5a2   : > { %3691 = vrot.lane.b32.xlu1 %v3612_v19, %s4747_s17 }
 0x5a3   : > { %3689 = vrot.lane.b32.xlu0 %v3611_v23, %s4747_s17 }
 0x5a6   : > { %3695 = vrot.lane.b32.xlu1 %v3614_v29, %s4747_s17 }
 0x5a7   : > { %3693 = vrot.lane.b32.xlu0 %v3613_v39, %s4747_s17 }
 0x5a8   : > { %v3552_v21 = vpop.permute.xlu1 %3551 }
 0x5a9   : > { %v3550_v14 = vpop.permute.xlu0 %3549  ;;  %v3622_v40 = vadd.f32 %v3552_v21, %v3462_v24 }
 0x5aa   : > { %3699 = vrot.lane.b32.xlu1 %v3616_v18, %s4747_s17  ;;  %v3621_v5 = vadd.f32 %v3550_v14, %v7299_v46 }
 0x5ab   : > { %3697 = vrot.lane.b32.xlu0 %v3615_v32, %s4747_s17 }
 0x5ae   : > { %3703 = vrot.lane.b32.xlu1 %v3618_v12, %s4747_s17 }
 0x5af   : > { %3701 = vrot.lane.b32.xlu0 %v3617_v41, %s4747_s17 }
 0x5b2   : > { %3707 = vrot.lane.b32.xlu1 %v3620_v16, %s4747_s17 }
 0x5b3   : > { %3705 = vrot.lane.b32.xlu0 %v3619_v10, %s4747_s17 }
 0x5b6   : > { %3711 = vrot.lane.b32.xlu1 %v3622_v40, %s4747_s17 }
 0x5b7   : > { %3709 = vrot.lane.b32.xlu0 %v3621_v5, %s4747_s17 }
 0x5bf   : > { %v3556_v62 = vpop.permute.xlu1 %3555 }
 0x5c0   : > { %v3624_v15 = vadd.f32 %v3556_v62, %v7313_v60  ;;  %v3554_v30 = vpop.permute.xlu0 %3553 }
 0x5c1   : > { %v3623_v53 = vadd.f32 %v3554_v30, %v7305_v1 }
 0x5c2   : > { %3715 = vrot.lane.b32.xlu1 %v3624_v15, %s4747_s17 }
 0x5c3   : > { %3713 = vrot.lane.b32.xlu0 %v3623_v53, %s4747_s17 }
 0x5d4   : > { %v3560_v58 = vpop.permute.xlu1 %3559 }
 0x5d5   : > { %v3626_v13 = vadd.f32 %v3560_v58, %v7321_v55  ;;  %v3558_v45 = vpop.permute.xlu0 %3557 }
 0x5d6   : > { %v3625_v46 = vadd.f32 %v3558_v45, %v7315_v43 }
 0x5d7   : > { %3719 = vrot.lane.b32.xlu1 %v3626_v13, %s4747_s17 }
 0x5d8   : > { %3717 = vrot.lane.b32.xlu0 %v3625_v46, %s4747_s17 }
 0x5f4   : > { %v3564_v34 = vpop.permute.xlu1 %3563 }
 0x5f5   : > { %v3628_v60 = vadd.f32 %v3564_v34, %v7327_v57  ;;  %v3562_v4 = vpop.permute.xlu0 %3561 }
 0x5f6   : > { %v3627_v1 = vadd.f32 %v3562_v4, %v7323_v26 }
 0x5f7   : > { %3723 = vrot.lane.b32.xlu1 %v3628_v60, %s4747_s17 }
 0x5f8   : > { %v3664_v43 = vpop.permute.xlu1 %3663  ;;  %3721 = vrot.lane.b32.xlu0 %v3627_v1, %s4747_s17 }
 0x5f9   : > { %3759 = vst.msk [vmem:[%s7430_s19 + $0x8] sm:$0xff] %vm3757_vm1, %v3664_v43  ;;  %v3662_v55 = vpop.permute.xlu0 %3661 }
 0x5fa   : > { %3758 = vst.msk [vmem:[%s7430_s19] sm:$0xff] %vm3757_vm1, %v3662_v55 }
 0x5fc   : > { %v3668_v26 = vpop.permute.xlu1 %3667 }
 0x5fd   : > { %3761 = vst.msk [vmem:[%s7430_s19 + $0x18] sm:$0xff] %vm3757_vm1, %v3668_v26  ;;  %v3666_v57 = vpop.permute.xlu0 %3665 }
 0x5fe   : > { %3760 = vst.msk [vmem:[%s7430_s19 + $0x10] sm:$0xff] %vm3757_vm1, %v3666_v57 }
 0x600   : > { %v3672_v33 = vpop.permute.xlu1 %3671 }
 0x601   : > { %3763 = vst.msk [vmem:[%s7430_s19 + $0x28] sm:$0xff] %vm3757_vm1, %v3672_v33  ;;  %v3670_v54 = vpop.permute.xlu0 %3669 }
 0x602   : > { %3762 = vst.msk [vmem:[%s7430_s19 + $0x20] sm:$0xff] %vm3757_vm1, %v3670_v54 }
 0x604   : > { %v3676_v47 = vpop.permute.xlu1 %3675 }
 0x605   : > { %3765 = vst.msk [vmem:[%s7430_s19 + $0x38] sm:$0xff] %vm3757_vm1, %v3676_v47  ;;  %v3674_v56 = vpop.permute.xlu0 %3673 }
 0x606   : > { %3764 = vst.msk [vmem:[%s7430_s19 + $0x30] sm:$0xff] %vm3757_vm1, %v3674_v56 }
 0x608   : > { %v3680_v59 = vpop.permute.xlu1 %3679 }
 0x609   : > { %3767 = vst.msk [vmem:[%s7430_s19 + $0x48] sm:$0xff] %vm3757_vm1, %v3680_v59  ;;  %v3678_v44 = vpop.permute.xlu0 %3677 }
 0x60a   : > { %3766 = vst.msk [vmem:[%s7430_s19 + $0x40] sm:$0xff] %vm3757_vm1, %v3678_v44 }
 0x60c   : > { %v3684_v61 = vpop.permute.xlu1 %3683 }
 0x60d   : > { %3769 = vst.msk [vmem:[%s7430_s19 + $0x58] sm:$0xff] %vm3757_vm1, %v3684_v61  ;;  %v3682_v19 = vpop.permute.xlu0 %3681 }
 0x60e   : > { %3768 = vst.msk [vmem:[%s7430_s19 + $0x50] sm:$0xff] %vm3757_vm1, %v3682_v19 }
 0x610   : > { %v3688_v37 = vpop.permute.xlu1 %3687 }
 0x611   : > { %3771 = vst.msk [vmem:[%s7430_s19 + $0x68] sm:$0xff] %vm3757_vm1, %v3688_v37  ;;  %v3686_v7 = vpop.permute.xlu0 %3685 }
 0x612   : > { %3770 = vst.msk [vmem:[%s7430_s19 + $0x60] sm:$0xff] %vm3757_vm1, %v3686_v7 }
 0x614   : > { %v3692_v23 = vpop.permute.xlu1 %3691 }
 0x615   : > { %3773 = vst.msk [vmem:[%s7430_s19 + $0x78] sm:$0xff] %vm3757_vm1, %v3692_v23  ;;  %v3690_v63 = vpop.permute.xlu0 %3689 }
 0x616   : > { %3772 = vst.msk [vmem:[%s7430_s19 + $0x70] sm:$0xff] %vm3757_vm1, %v3690_v63 }
 0x618   : > { %v3696_v2 = vpop.permute.xlu1 %3695 }
 0x619   : > { %3775 = vst.msk [vmem:[%s7430_s19 + $0x88] sm:$0xff] %vm3757_vm1, %v3696_v2  ;;  %v3694_v8 = vpop.permute.xlu0 %3693 }
 0x61a   : > { %3774 = vst.msk [vmem:[%s7430_s19 + $0x80] sm:$0xff] %vm3757_vm1, %v3694_v8 }
 0x61c   : > { %v3700_v49 = vpop.permute.xlu1 %3699 }
 0x61d   : > { %3777 = vst.msk [vmem:[%s7430_s19 + $0x98] sm:$0xff] %vm3757_vm1, %v3700_v49  ;;  %v3698_v29 = vpop.permute.xlu0 %3697 }
 0x61e   : > { %3776 = vst.msk [vmem:[%s7430_s19 + $0x90] sm:$0xff] %vm3757_vm1, %v3698_v29 }
 0x620   : > { %v3704_v51 = vpop.permute.xlu1 %3703 }
 0x621   : > { %3779 = vst.msk [vmem:[%s7430_s19 + $0xa8] sm:$0xff] %vm3757_vm1, %v3704_v51  ;;  %v3702_v0 = vpop.permute.xlu0 %3701 }
 0x622   : > { %3778 = vst.msk [vmem:[%s7430_s19 + $0xa0] sm:$0xff] %vm3757_vm1, %v3702_v0 }
 0x624   : > { %v3708_v39 = vpop.permute.xlu1 %3707 }
 0x625   : > { %3781 = vst.msk [vmem:[%s7430_s19 + $0xb8] sm:$0xff] %vm3757_vm1, %v3708_v39  ;;  %v3706_v42 = vpop.permute.xlu0 %3705 }
 0x626   : > { %3780 = vst.msk [vmem:[%s7430_s19 + $0xb0] sm:$0xff] %vm3757_vm1, %v3706_v42 }
 0x628   : > { %v3712_v38 = vpop.permute.xlu1 %3711 }
 0x629   : > { %3783 = vst.msk [vmem:[%s7430_s19 + $0xc8] sm:$0xff] %vm3757_vm1, %v3712_v38  ;;  %v3710_v50 = vpop.permute.xlu0 %3709 }
 0x62a   : > { %3782 = vst.msk [vmem:[%s7430_s19 + $0xc0] sm:$0xff] %vm3757_vm1, %v3710_v50 }
 0x634   : > { %v3716_v27 = vpop.permute.xlu1 %3715 }
 0x635   : > { %3785 = vst.msk [vmem:[%s7430_s19 + $0xd8] sm:$0xff] %vm3757_vm1, %v3716_v27  ;;  %v3714_v18 = vpop.permute.xlu0 %3713 }
 0x636   : > { %3784 = vst.msk [vmem:[%s7430_s19 + $0xd0] sm:$0xff] %vm3757_vm1, %v3714_v18 }
 0x649   : > { %v3720_v22 = vpop.permute.xlu1 %3719 }
 0x64a   : > { %3787 = vst.msk [vmem:[%s7430_s19 + $0xe8] sm:$0xff] %vm3757_vm1, %v3720_v22  ;;  %v3718_v6 = vpop.permute.xlu0 %3717 }
 0x64b   : > { %3786 = vst.msk [vmem:[%s7430_s19 + $0xe0] sm:$0xff] %vm3757_vm1, %v3718_v6 }
 0x669   : > { %v3724_v32 = vpop.permute.xlu1 %3723 }
 0x66a   : > { %3789 = vst.msk [vmem:[%s7430_s19 + $0xf8] sm:$0xff] %vm3757_vm1, %v3724_v32  ;;  %v3722_v17 = vpop.permute.xlu0 %3721 }
 0x66b   : > { %3788 = vst.msk [vmem:[%s7430_s19 + $0xf0] sm:$0xff] %vm3757_vm1, %v3722_v17 }
 0x66c PF: > { %s19_s29 = sadd.s32 1, %s4736_s29  }
 0x66d   : > { %p16_p4 = scmp.ge.s32.totalorder %s19_s29, 6  }
 0x66f   :  { %18 = sbr.rel (!%p16_p4) target bundleno = 2 (0x2), region = 82 }

</bundles_post_ra>
